<compile_context>
chip_gen: v6e
topology: v6e:2x2x1
jax: 0.10.0
libtpu: 0.0.40
codegen_flags: <defaults>
</compile_context>

<pallas_src>
import functools

import jax
import jax.numpy as jnp
from jax.experimental import pallas as pl
from jax.experimental.pallas import tpu as pltpu

EPS = 1e-5                      # nn.BatchNorm2d default eps
EXPANSION = 4
ACT_DTYPE = jnp.bfloat16        # storage dtype of inter-stage activations
VMEM_LIMIT = 48 * 1024 * 1024   # fits v5e/v6e (128 MiB) and v7x (64 MiB)
TILE_BUDGET = 6 * 1024 * 1024   # per-stage VMEM working budget for row tiles


def _round_up(x, m):
    return (x + m - 1) // m * m


def _pick_tile(p, row_bytes, budget=TILE_BUDGET):
    """Largest row tile (multiple of 8) fitting the budget; prefer a divisor of
    p (no padding / masking) and keep >= 4 grid steps when p is large."""
    cap = max(8, min(2048, (budget // max(int(row_bytes), 1)) // 8 * 8))
    if p >= 4 * 128:
        cap = min(cap, max(128, (p // 4) // 8 * 8))
    cap = min(cap, _round_up(p, 8))
    for cand in range(cap, 7, -8):
        if p % cand == 0:
            return cand
    return cap


def _cparams(*sem):
    return pltpu.CompilerParams(dimension_semantics=sem,
                                vmem_limit_bytes=VMEM_LIMIT)


# --------------------------------------------------------------------------
# Kernels
# --------------------------------------------------------------------------
def _matmul_stats_kernel(x_ref, w_ref, y_ref, s_ref, ss_ref):
    # x:(Tp,Cin) bf16, w:(Cin,Cout) bf16 (VMEM resident) -> y + per-tile stats.
    y = jnp.dot(x_ref[...], w_ref[...], preferred_element_type=jnp.float32)
    s_ref[...] = jnp.sum(y, axis=0).reshape(1, 1, -1)
    ss_ref[...] = jnp.sum(y * y, axis=0).reshape(1, 1, -1)
    y_ref[...] = y.astype(y_ref.dtype)


def _bn_relu_matmul_stats_kernel(y_in_ref, sc_ref, bi_ref, w_ref,
                                 y_ref, s_ref, ss_ref,
                                 *, p_valid, tile_p, need_mask):
    # Previous stage's BN + ReLU (f32) fused into this stage's bf16 matmul.
    h = jnp.maximum(y_in_ref[...].astype(jnp.float32) * sc_ref[...] + bi_ref[...],
                    0.0)
    if need_mask:  # only traced when the row count had to be padded
        row = (jax.lax.broadcasted_iota(jnp.int32, h.shape, 0)
               + pl.program_id(0) * tile_p)
        h = jnp.where(row < p_valid, h, 0.0)
    y = jnp.dot(h.astype(jnp.bfloat16), w_ref[...],
                preferred_element_type=jnp.float32)
    s_ref[...] = jnp.sum(y, axis=0).reshape(1, 1, -1)
    ss_ref[...] = jnp.sum(y * y, axis=0).reshape(1, 1, -1)
    y_ref[...] = y.astype(y_ref.dtype)


def _bn_add_relu_kernel(y_ref, sc_ref, bi_ref, r_ref, rsc_ref, rbi_ref, o_ref):
    # Final stage: BN(conv3) + BN(residual) + add + ReLU, all in f32.
    y = y_ref[...].astype(jnp.float32) * sc_ref[...] + bi_ref[...]
    r = r_ref[...].astype(jnp.float32) * rsc_ref[...] + rbi_ref[...]
    o_ref[...] = jnp.maximum(y + r, 0.0).astype(o_ref.dtype)


def _conv2_bn1_kernel(y1_ref, sc_ref, bi_ref, w_ref, y2_ref, s_ref, ss_ref,
                      pad_ref, *, H, W, stride):
    # One image per grid step.  Fuses BN1 + ReLU, zero padding (VMEM only) and
    # the 9 taps of the 3x3 conv as large matmuls over the flattened padded
    # image.  BN2 partial statistics are emitted alongside.
    Wp = W + 2
    Ho = (H - 1) // stride + 1
    Wo = (W - 1) // stride + 1
    cout = w_ref.shape[-1]

    # BN1 + ReLU in f32 (no HBM round trip for the activated tensor).
    h = jnp.maximum(
        y1_ref[...][0].astype(jnp.float32) * sc_ref[...] + bi_ref[...], 0.0)

    # Zero-padded image, flattened row-major into a (rows, C) f32 VMEM scratch
    # (f32 keeps the strided tap loads as plain 32-bit sublane accesses).
    pad_ref[...] = jnp.zeros(pad_ref.shape, pad_ref.dtype)
    for r in range(H):
        pad_ref[pl.ds((r + 1) * Wp + 1, W), :] = h[r]

    # 9 shifted matmuls: flat input index = stride*m + (kh*Wp + kw) for flat
    # output index m = i*Wp + j'.  Columns j' >= Wo are wrap-around garbage and
    # are dropped in the epilogue; the over-compute (Wp/Wo ~ 1.04-1.3x) buys
    # full-height (Ho*Wp row) MXU matmuls instead of per-row ones.
    m_flat = Ho * Wp
    w_all = w_ref[...]
    acc = jnp.zeros((m_flat, cout), jnp.float32)
    for kh in range(3):
        for kw in range(3):
            off = kh * Wp + kw
            sl = pl.ds(off, m_flat) if stride == 1 else pl.ds(off, m_flat, stride)
            lhs = pad_ref[sl, :].astype(jnp.bfloat16)
            acc = acc + jnp.dot(lhs, w_all[kh * 3 + kw],
                                preferred_element_type=jnp.float32)

    # Epilogue: keep only the Wo valid columns of each output row; stats in f32
    # before the bf16 store.  (Per-row slices avoid in-kernel reshapes of the
    # sublane dimension.)
    s = jnp.zeros((cout,), jnp.float32)
    ss = jnp.zeros((cout,), jnp.float32)
    for i in range(Ho):
        row = acc[i * Wp:i * Wp + Wo, :]
        s = s + jnp.sum(row, axis=0)
        ss = ss + jnp.sum(row * row, axis=0)
        y2_ref[pl.ds(0, 1), pl.ds(i, 1), :, :] = (
            row.reshape(1, 1, Wo, cout).astype(y2_ref.dtype))
    s_ref[...] = s.reshape(1, 1, cout)
    ss_ref[...] = ss.reshape(1, 1, cout)


# --------------------------------------------------------------------------
# pallas_call wrappers
# --------------------------------------------------------------------------
def matmul_stats(x2d, w, *, out_dtype=ACT_DTYPE):
    p, cin = x2d.shape
    cout = w.shape[1]
    row_bytes = 2 * (cin * x2d.dtype.itemsize + cout * 4)
    tile_p = _pick_tile(p, row_bytes)
    pp = _round_up(p, tile_p)
    if pp != p:
        x2d = jnp.pad(x2d, ((0, pp - p), (0, 0)))   # zero rows: no effect on sums
    n_tiles = pp // tile_p
    y, s, ss = pl.pallas_call(
        _matmul_stats_kernel,
        grid=(n_tiles,),
        in_specs=[pl.BlockSpec((tile_p, cin), lambda i: (i, 0)),
                  pl.BlockSpec((cin, cout), lambda i: (0, 0))],
        out_specs=[pl.BlockSpec((tile_p, cout), lambda i: (i, 0)),
                   pl.BlockSpec((1, 1, cout), lambda i: (i, 0, 0)),
                   pl.BlockSpec((1, 1, cout), lambda i: (i, 0, 0))],
        out_shape=[jax.ShapeDtypeStruct((pp, cout), out_dtype),
                   jax.ShapeDtypeStruct((n_tiles, 1, cout), jnp.float32),
                   jax.ShapeDtypeStruct((n_tiles, 1, cout), jnp.float32)],
        compiler_params=_cparams("parallel"),
    )(x2d, w)
    return (y if pp == p else y[:p]), s, ss


def bn_relu_matmul_stats(y_in, scale, bias, w, *, out_dtype=ACT_DTYPE):
    p, cprev = y_in.shape
    cout = w.shape[1]
    row_bytes = 2 * (cprev * y_in.dtype.itemsize + cout * 4)
    tile_p = _pick_tile(p, row_bytes)
    pp = _round_up(p, tile_p)
    need_mask = pp != p
    if need_mask:
        y_in = jnp.pad(y_in, ((0, pp - p), (0, 0)))
    n_tiles = pp // tile_p
    kern = functools.partial(_bn_relu_matmul_stats_kernel, p_valid=p,
                             tile_p=tile_p, need_mask=need_mask)
    y, s, ss = pl.pallas_call(
        kern,
        grid=(n_tiles,),
        in_specs=[pl.BlockSpec((tile_p, cprev), lambda i: (i, 0)),
                  pl.BlockSpec((1, cprev), lambda i: (0, 0)),
                  pl.BlockSpec((1, cprev), lambda i: (0, 0)),
                  pl.BlockSpec((cprev, cout), lambda i: (0, 0))],
        out_specs=[pl.BlockSpec((tile_p, cout), lambda i: (i, 0)),
                   pl.BlockSpec((1, 1, cout), lambda i: (i, 0, 0)),
                   pl.BlockSpec((1, 1, cout), lambda i: (i, 0, 0))],
        out_shape=[jax.ShapeDtypeStruct((pp, cout), out_dtype),
                   jax.ShapeDtypeStruct((n_tiles, 1, cout), jnp.float32),
                   jax.ShapeDtypeStruct((n_tiles, 1, cout), jnp.float32)],
        compiler_params=_cparams("parallel"),
    )(y_in, scale, bias, w)
    return (y[:p] if need_mask else y), s, ss


def bn_add_relu(y, scale, bias, res, rscale, rbias):
    p, c = y.shape
    row_bytes = 2 * (c * y.dtype.itemsize + c * res.dtype.itemsize + c * 4)
    tile_p = _pick_tile(p, row_bytes)
    pp = _round_up(p, tile_p)
    if pp != p:
        y = jnp.pad(y, ((0, pp - p), (0, 0)))
        res = jnp.pad(res, ((0, pp - p), (0, 0)))
    out = pl.pallas_call(
        _bn_add_relu_kernel,
        grid=(pp // tile_p,),
        in_specs=[pl.BlockSpec((tile_p, c), lambda i: (i, 0)),
                  pl.BlockSpec((1, c), lambda i: (0, 0)),
                  pl.BlockSpec((1, c), lambda i: (0, 0)),
                  pl.BlockSpec((tile_p, c), lambda i: (i, 0)),
                  pl.BlockSpec((1, c), lambda i: (0, 0)),
                  pl.BlockSpec((1, c), lambda i: (0, 0))],
        out_specs=pl.BlockSpec((tile_p, c), lambda i: (i, 0)),
        out_shape=jax.ShapeDtypeStruct((pp, c), jnp.float32),
        compiler_params=_cparams("parallel"),
    )(y, scale, bias, res, rscale, rbias)
    return out if pp == p else out[:p]


def conv2_bn1(y1_img, sc1, bi1, w9, *, stride, out_dtype=ACT_DTYPE):
    # y1_img: (N, H, W, C) pre-BN conv1 output; w9: (9, C, Cout), tap = kh*3+kw.
    n, h, w, c = y1_img.shape
    cout = w9.shape[-1]
    ho = (h - 1) // stride + 1
    wo = (w - 1) // stride + 1
    hp, wp = h + 2, w + 2
    # Highest flattened row touched by the strided taps (+1 guard), >= full pad.
    scr_rows = _round_up(max(hp * wp, (2 * wp + 2) + (ho * wp - 1) * stride + 1), 8)
    kern = functools.partial(_conv2_bn1_kernel, H=h, W=w, stride=stride)
    y2, s, ss = pl.pallas_call(
        kern,
        grid=(n,),
        in_specs=[pl.BlockSpec((1, h, w, c), lambda i: (i, 0, 0, 0)),
                  pl.BlockSpec((1, c), lambda i: (0, 0)),
                  pl.BlockSpec((1, c), lambda i: (0, 0)),
                  pl.BlockSpec((9, c, cout), lambda i: (0, 0, 0))],
        out_specs=[pl.BlockSpec((1, ho, wo, cout), lambda i: (i, 0, 0, 0)),
                   pl.BlockSpec((1, 1, cout), lambda i: (i, 0, 0)),
                   pl.BlockSpec((1, 1, cout), lambda i: (i, 0, 0))],
        out_shape=[jax.ShapeDtypeStruct((n, ho, wo, cout), out_dtype),
                   jax.ShapeDtypeStruct((n, 1, cout), jnp.float32),
                   jax.ShapeDtypeStruct((n, 1, cout), jnp.float32)],
        scratch_shapes=[pltpu.VMEM((scr_rows, c), jnp.float32)],
        compiler_params=_cparams("parallel"),
    )(y1_img, sc1, bi1, w9)
    return y2.reshape(n * ho * wo, cout), s, ss


def bn_coeffs(psum, psumsq, count, gamma, beta):
    # Tiny (tiles x C) reduction + scalar math; precompute scale/bias so the
    # normalize kernels are a single fused multiply-add per element.
    c = psum.shape[-1]
    s = jnp.sum(psum.reshape(-1, c), axis=0)
    ss = jnp.sum(psumsq.reshape(-1, c), axis=0)
    mean = s / count
    var = jnp.maximum(ss / count - mean * mean, 0.0)     # clamp f32 cancellation
    scale = gamma * jax.lax.rsqrt(var + EPS)
    bias = beta - mean * scale
    return scale.reshape(1, c), bias.reshape(1, c)


# --------------------------------------------------------------------------
# Bottleneck forward (NCHW in / NCHW out, like the PyTorch module)
# --------------------------------------------------------------------------
def bottleneck_forward(x_nchw, params, *, stride, downsample):
    x = jnp.transpose(x_nchw, (0, 2, 3, 1)).astype(jnp.float32)       # NHWC
    n, h, w, cin = x.shape
    cmid = params["w1"].shape[0]
    cexp = params["w3"].shape[0]
    ho = (h - 1) // stride + 1
    wo = (w - 1) // stride + 1
    p0, p1 = n * h * w, n * ho * wo
    bf = jnp.bfloat16

    # conv1 (1x1): bf16 matmul + BN1 partial stats; y1 stored bf16.
    w1m = jnp.transpose(params["w1"][:, :, 0, 0]).astype(bf)          # (Cin,Cmid)
    y1, s1, ss1 = matmul_stats(x.reshape(p0, cin).astype(bf), w1m)
    sc1, bi1 = bn_coeffs(s1, ss1, p0, params["g1"], params["b1"])

    # conv2 (3x3, stride, pad=1): BN1+ReLU fused, VMEM-only zero padding,
    # 9 big shifted matmuls, BN2 partial stats; y2 stored bf16.
    w2m = jnp.transpose(params["w2"], (2, 3, 1, 0)).reshape(9, cmid, cmid).astype(bf)
    y2, s2, ss2 = conv2_bn1(y1.reshape(n, h, w, cmid), sc1, bi1, w2m, stride=stride)
    sc2, bi2 = bn_coeffs(s2, ss2, p1, params["g2"], params["b2"])

    # conv3 (1x1): BN2 + ReLU fused into this matmul + BN3 partial stats.
    w3m = jnp.transpose(params["w3"][:, :, 0, 0]).astype(bf)          # (Cmid,Cexp)
    y3, s3, ss3 = bn_relu_matmul_stats(y2, sc2, bi2, w3m)
    sc3, bi3 = bn_coeffs(s3, ss3, p1, params["g3"], params["b3"])

    # residual branch
    if downsample:
        # XLA fuses this strided subsample into the NCHW->NHWC boundary copy.
        xs = x[:, ::stride, ::stride, :].reshape(p1, cin)
        wdm = jnp.transpose(params["wd"][:, :, 0, 0]).astype(bf)
        res, sd, ssd = matmul_stats(xs.astype(bf), wdm)
        rsc, rbi = bn_coeffs(sd, ssd, p1, params["gd"], params["bd"])
    else:
        assert stride == 1 and cin == cexp, \
            "identity residual requires stride == 1 and in_channels == expansion*out_channels"
        res = x.reshape(p1, cin)
        rsc = jnp.ones((1, cexp), jnp.float32)
        rbi = jnp.zeros((1, cexp), jnp.float32)

    # BN(conv3) + BN(residual) + add + ReLU in one fused pass.
    out = bn_add_relu(y3, sc3, bi3, res, rsc, rbi)
    return jnp.transpose(out.reshape(n, ho, wo, cexp), (0, 3, 1, 2))  # NCHW


# --------------------------------------------------------------------------
# Deterministic parameter init (PyTorch conv weight shapes: OIHW)
# --------------------------------------------------------------------------
def init_params(key, in_channels, out_channels):
    ks = jax.random.split(key, 12)
    exp = EXPANSION * out_channels
    f = jnp.float32
    return {
        "w1": 0.1 * jax.random.normal(ks[0], (out_channels, in_channels, 1, 1), f),
        "g1": 1.0 + 0.1 * jax.random.normal(ks[1], (out_channels,), f),
        "b1": 0.1 * jax.random.normal(ks[2], (out_channels,), f),
        "w2": 0.1 * jax.random.normal(ks[3], (out_channels, out_channels, 3, 3), f),
        "g2": 1.0 + 0.1 * jax.random.normal(ks[4], (out_channels,), f),
        "b2": 0.1 * jax.random.normal(ks[5], (out_channels,), f),
        "w3": 0.1 * jax.random.normal(ks[6], (exp, out_channels, 1, 1), f),
        "g3": 1.0 + 0.1 * jax.random.normal(ks[7], (exp,), f),
        "b3": 0.1 * jax.random.normal(ks[8], (exp,), f),
        "wd": 0.1 * jax.random.normal(ks[9], (exp, in_channels, 1, 1), f),
        "gd": 1.0 + 0.1 * jax.random.normal(ks[10], (exp,), f),
        "bd": 0.1 * jax.random.normal(ks[11], (exp,), f),
    }


# --------------------------------------------------------------------------
# Pure-JAX reference (training-mode BatchNorm, like a fresh nn.Module).
# --------------------------------------------------------------------------
def reference_forward(x, params, *, stride, downsample, conv_dtype=jnp.float32):
    hp = jax.lax.Precision.HIGHEST

    def conv(x, w, s, pad):
        return jax.lax.conv_general_dilated(
            x.astype(conv_dtype), w.astype(conv_dtype), (s, s), pad,
            dimension_numbers=("NCHW", "OIHW", "NCHW"),
            preferred_element_type=jnp.float32, precision=hp)

    def bn(x, g, b):
        mean = jnp.mean(x, axis=(0, 2, 3), keepdims=True)
        var = jnp.mean((x - mean) ** 2, axis=(0, 2, 3), keepdims=True)
        return (x - mean) * jax.lax.rsqrt(var + EPS) * g.reshape(1, -1, 1, 1) \
            + b.reshape(1, -1, 1, 1)

    i = x
    h = jax.nn.relu(bn(conv(x, params["w1"], 1, "VALID"), params["g1"], params["b1"]))
    h = jax.nn.relu(bn(conv(h, params["w2"], stride, ((1, 1), (1, 1))),
                       params["g2"], params["b2"]))
    h = bn(conv(h, params["w3"], 1, "VALID"), params["g3"], params["b3"])
    if downsample:
        i = bn(conv(i, params["wd"], stride, "VALID"), params["gd"], params["bd"])
    return jax.nn.relu(h + i)


# --------------------------------------------------------------------------
if __name__ == "__main__":
    key = jax.random.PRNGKey(0)
    kx, kp = jax.random.split(key)

    N, IN_CH, OUT_CH, HW, STRIDE = 2, 4, 4, 16, 2
    DOWNSAMPLE = True

    x = jax.random.normal(kx, (N, IN_CH, HW, HW), jnp.float32)
    params = init_params(kp, IN_CH, OUT_CH)

    fwd = jax.jit(functools.partial(bottleneck_forward, stride=STRIDE,
                                    downsample=DOWNSAMPLE))
    out = jax.block_until_ready(fwd(x, params))
    assert out.shape == (N, EXPANSION * OUT_CH, HW // STRIDE, HW // STRIDE), out.shape

    # Reference with the same conv precision policy (bf16 MXU inputs, f32
    # accumulation / BN); remaining differences are the bf16 storage of the
    # inter-stage activations.
    ref_bf16 = reference_forward(x, params, stride=STRIDE, downsample=DOWNSAMPLE,
                                 conv_dtype=jnp.bfloat16)
    err_bf16 = float(jnp.max(jnp.abs(out - ref_bf16)))
    assert err_bf16 < 6e-2, f"mismatch vs bf16-policy reference: {err_bf16}"

    # Loose sanity check vs. the pure-f32 reference (difference is the
    # intentional bf16 MXU-input / activation-storage policy, not a kernel bug).
    ref_f32 = reference_forward(x, params, stride=STRIDE, downsample=DOWNSAMPLE,
                                conv_dtype=jnp.float32)
    err_f32 = float(jnp.max(jnp.abs(out - ref_f32)))
    assert err_f32 < 1.5e-1, f"mismatch vs f32 reference: {err_f32}"

    print("KERNEL_OK")
</pallas_src>

<mosaic_0001>
module attributes {stable_mosaic.version = 11 : i64} {
  func.func @_bn_relu_matmul_stats_kernel(%arg0: i32, %arg1: memref<128x4xbf16, #tpu.memory_space<vmem>>, %arg2: memref<1x4xf32, #tpu.memory_space<vmem>>, %arg3: memref<1x4xf32, #tpu.memory_space<vmem>>, %arg4: memref<4x16xbf16, #tpu.memory_space<vmem>>, %arg5: memref<128x16xbf16, #tpu.memory_space<vmem>>, %arg6: memref<1x1x16xf32, #tpu.memory_space<vmem>>, %arg7: memref<1x1x16xf32, #tpu.memory_space<vmem>>) attributes {dimension_semantics = [#tpu.dimension_semantics<parallel>], iteration_bounds = array<i64: 1>, scalar_prefetch = 0 : i64, scratch_operands = 0 : i64, tpu.core_type = #tpu.core_type<tc>, window_params = [{transform_indices = @transform_0, window_bounds = array<i64: 128, 4>}, {pipeline_mode = #tpu.pipeline_mode<synchronous>, transform_indices = @transform_1, window_bounds = array<i64: 1, 4>}, {pipeline_mode = #tpu.pipeline_mode<synchronous>, transform_indices = @transform_2, window_bounds = array<i64: 1, 4>}, {pipeline_mode = #tpu.pipeline_mode<synchronous>, transform_indices = @transform_3, window_bounds = array<i64: 4, 16>}, {transform_indices = @transform_4, window_bounds = array<i64: 128, 16>}, {transform_indices = @transform_5, window_bounds = array<i64: 1, 1, 16>}, {transform_indices = @transform_6, window_bounds = array<i64: 1, 1, 16>}]} {
    %c0 = arith.constant 0 : index
    %c0_0 = arith.constant 0 : index
    %0 = vector.load %arg1[%c0, %c0_0] : memref<128x4xbf16, #tpu.memory_space<vmem>>, vector<128x4xbf16>
    %1 = arith.extf %0 : vector<128x4xbf16> to vector<128x4xf32>
    %c0_1 = arith.constant 0 : index
    %c0_2 = arith.constant 0 : index
    %2 = vector.load %arg2[%c0_1, %c0_2] : memref<1x4xf32, #tpu.memory_space<vmem>>, vector<1x4xf32>
    %3 = vector.broadcast %2 : vector<1x4xf32> to vector<128x4xf32>
    %4 = arith.mulf %1, %3 : vector<128x4xf32>
    %c0_3 = arith.constant 0 : index
    %c0_4 = arith.constant 0 : index
    %5 = vector.load %arg3[%c0_3, %c0_4] : memref<1x4xf32, #tpu.memory_space<vmem>>, vector<1x4xf32>
    %6 = vector.broadcast %5 : vector<1x4xf32> to vector<128x4xf32>
    %7 = arith.addf %4, %6 : vector<128x4xf32>
    %cst = arith.constant 0.000000e+00 : f32
    %8 = vector.broadcast %cst : f32 to vector<128x4xf32>
    %9 = arith.maximumf %7, %8 : vector<128x4xf32>
    %10 = arith.truncf %9 : vector<128x4xf32> to vector<128x4xbf16>
    %c0_5 = arith.constant 0 : index
    %c0_6 = arith.constant 0 : index
    %11 = vector.load %arg4[%c0_5, %c0_6] : memref<4x16xbf16, #tpu.memory_space<vmem>>, vector<4x16xbf16>
    %cst_7 = arith.constant dense<0.000000e+00> : vector<128x16xf32>
    %12 = tpu.matmul %10, %11, %cst_7 {dimension_numbers = #tpu.dot_dimension_numbers<[1], [0], [0], [1], [0, 0, 1, 1], [], []>} : vector<128x4xbf16>, vector<4x16xbf16>, vector<128x16xf32> -> vector<128x16xf32>
    %cst_8 = arith.constant dense<0.000000e+00> : vector<16xf32>
    %13 = vector.multi_reduction <add>, %12, %cst_8 [0] : vector<128x16xf32> to vector<16xf32>
    %14 = vector.shape_cast %13 : vector<16xf32> to vector<1x1x16xf32>
    %c0_9 = arith.constant 0 : index
    %c0_10 = arith.constant 0 : index
    %c0_11 = arith.constant 0 : index
    %15 = vector.load %arg6[%c0_9, %c0_10, %c0_11] : memref<1x1x16xf32, #tpu.memory_space<vmem>>, vector<1x1x16xf32>
    tpu.vector_store %arg6[%c0_9, %c0_10, %c0_11], %14 {strides = array<i32>} : memref<1x1x16xf32, #tpu.memory_space<vmem>>, vector<1x1x16xf32>,
    %16 = arith.mulf %12, %12 : vector<128x16xf32>
    %cst_12 = arith.constant dense<0.000000e+00> : vector<16xf32>
    %17 = vector.multi_reduction <add>, %16, %cst_12 [0] : vector<128x16xf32> to vector<16xf32>
    %18 = vector.shape_cast %17 : vector<16xf32> to vector<1x1x16xf32>
    %c0_13 = arith.constant 0 : index
    %c0_14 = arith.constant 0 : index
    %c0_15 = arith.constant 0 : index
    %19 = vector.load %arg7[%c0_13, %c0_14, %c0_15] : memref<1x1x16xf32, #tpu.memory_space<vmem>>, vector<1x1x16xf32>
    tpu.vector_store %arg7[%c0_13, %c0_14, %c0_15], %18 {strides = array<i32>} : memref<1x1x16xf32, #tpu.memory_space<vmem>>, vector<1x1x16xf32>,
    %20 = arith.truncf %12 : vector<128x16xf32> to vector<128x16xbf16>
    %c0_16 = arith.constant 0 : index
    %c0_17 = arith.constant 0 : index
    %21 = vector.load %arg5[%c0_16, %c0_17] : memref<128x16xbf16, #tpu.memory_space<vmem>>, vector<128x16xbf16>
    tpu.vector_store %arg5[%c0_16, %c0_17], %20 {strides = array<i32>} : memref<128x16xbf16, #tpu.memory_space<vmem>>, vector<128x16xbf16>,
    return
  }
  func.func @transform_0(%arg0: i32) -> (i32, i32) {
    %c0_i32 = arith.constant 0 : i32
    %c0_i32_0 = arith.constant 0 : i32
    return %arg0, %c0_i32 : i32, i32
  }
  func.func @transform_1(%arg0: i32) -> (i32, i32) {
    %c0_i32 = arith.constant 0 : i32
    %c0_i32_0 = arith.constant 0 : i32
    %c0_i32_1 = arith.constant 0 : i32
    return %c0_i32, %c0_i32_0 : i32, i32
  }
  func.func @transform_2(%arg0: i32) -> (i32, i32) {
    %c0_i32 = arith.constant 0 : i32
    %c0_i32_0 = arith.constant 0 : i32
    %c0_i32_1 = arith.constant 0 : i32
    return %c0_i32, %c0_i32_0 : i32, i32
  }
  func.func @transform_3(%arg0: i32) -> (i32, i32) {
    %c0_i32 = arith.constant 0 : i32
    %c0_i32_0 = arith.constant 0 : i32
    %c0_i32_1 = arith.constant 0 : i32
    return %c0_i32, %c0_i32_0 : i32, i32
  }
  func.func @transform_4(%arg0: i32) -> (i32, i32) {
    %c0_i32 = arith.constant 0 : i32
    %c0_i32_0 = arith.constant 0 : i32
    return %arg0, %c0_i32 : i32, i32
  }
  func.func @transform_5(%arg0: i32) -> (i32, i32, i32) {
    %c0_i32 = arith.constant 0 : i32
    %c0_i32_0 = arith.constant 0 : i32
    %c0_i32_1 = arith.constant 0 : i32
    return %arg0, %c0_i32, %c0_i32_0 : i32, i32, i32
  }
  func.func @transform_6(%arg0: i32) -> (i32, i32, i32) {
    %c0_i32 = arith.constant 0 : i32
    %c0_i32_0 = arith.constant 0 : i32
    %c0_i32_1 = arith.constant 0 : i32
    return %arg0, %c0_i32, %c0_i32_0 : i32, i32, i32
  }
}

module attributes {stable_mosaic.version = 11 : i64} {
  func.func @_matmul_stats_kernel(%arg0: i32, %arg1: memref<128x4xbf16, #tpu.memory_space<vmem>>, %arg2: memref<4x4xbf16, #tpu.memory_space<vmem>>, %arg3: memref<128x4xbf16, #tpu.memory_space<vmem>>, %arg4: memref<1x1x4xf32, #tpu.memory_space<vmem>>, %arg5: memref<1x1x4xf32, #tpu.memory_space<vmem>>) attributes {dimension_semantics = [#tpu.dimension_semantics<parallel>], iteration_bounds = array<i64: 4>, scalar_prefetch = 0 : i64, scratch_operands = 0 : i64, tpu.core_type = #tpu.core_type<tc>, window_params = [{transform_indices = @transform_0, window_bounds = array<i64: 128, 4>}, {pipeline_mode = #tpu.pipeline_mode<synchronous>, transform_indices = @transform_1, window_bounds = array<i64: 4, 4>}, {transform_indices = @transform_2, window_bounds = array<i64: 128, 4>}, {transform_indices = @transform_3, window_bounds = array<i64: 1, 1, 4>}, {transform_indices = @transform_4, window_bounds = array<i64: 1, 1, 4>}]} {
    %c0 = arith.constant 0 : index
    %c0_0 = arith.constant 0 : index
    %0 = vector.load %arg1[%c0, %c0_0] : memref<128x4xbf16, #tpu.memory_space<vmem>>, vector<128x4xbf16>
    %c0_1 = arith.constant 0 : index
    %c0_2 = arith.constant 0 : index
    %1 = vector.load %arg2[%c0_1, %c0_2] : memref<4x4xbf16, #tpu.memory_space<vmem>>, vector<4x4xbf16>
    %cst = arith.constant dense<0.000000e+00> : vector<128x4xf32>
    %2 = tpu.matmul %0, %1, %cst {dimension_numbers = #tpu.dot_dimension_numbers<[1], [0], [0], [1], [0, 0, 1, 1], [], []>} : vector<128x4xbf16>, vector<4x4xbf16>, vector<128x4xf32> -> vector<128x4xf32>
    %cst_3 = arith.constant dense<0.000000e+00> : vector<4xf32>
    %3 = vector.multi_reduction <add>, %2, %cst_3 [0] : vector<128x4xf32> to vector<4xf32>
    %4 = vector.shape_cast %3 : vector<4xf32> to vector<1x1x4xf32>
    %c0_4 = arith.constant 0 : index
    %c0_5 = arith.constant 0 : index
    %c0_6 = arith.constant 0 : index
    %5 = vector.load %arg4[%c0_4, %c0_5, %c0_6] : memref<1x1x4xf32, #tpu.memory_space<vmem>>, vector<1x1x4xf32>
    tpu.vector_store %arg4[%c0_4, %c0_5, %c0_6], %4 {strides = array<i32>} : memref<1x1x4xf32, #tpu.memory_space<vmem>>, vector<1x1x4xf32>,
    %6 = arith.mulf %2, %2 : vector<128x4xf32>
    %cst_7 = arith.constant dense<0.000000e+00> : vector<4xf32>
    %7 = vector.multi_reduction <add>, %6, %cst_7 [0] : vector<128x4xf32> to vector<4xf32>
    %8 = vector.shape_cast %7 : vector<4xf32> to vector<1x1x4xf32>
    %c0_8 = arith.constant 0 : index
    %c0_9 = arith.constant 0 : index
    %c0_10 = arith.constant 0 : index
    %9 = vector.load %arg5[%c0_8, %c0_9, %c0_10] : memref<1x1x4xf32, #tpu.memory_space<vmem>>, vector<1x1x4xf32>
    tpu.vector_store %arg5[%c0_8, %c0_9, %c0_10], %8 {strides = array<i32>} : memref<1x1x4xf32, #tpu.memory_space<vmem>>, vector<1x1x4xf32>,
    %10 = arith.truncf %2 : vector<128x4xf32> to vector<128x4xbf16>
    %c0_11 = arith.constant 0 : index
    %c0_12 = arith.constant 0 : index
    %11 = vector.load %arg3[%c0_11, %c0_12] : memref<128x4xbf16, #tpu.memory_space<vmem>>, vector<128x4xbf16>
    tpu.vector_store %arg3[%c0_11, %c0_12], %10 {strides = array<i32>} : memref<128x4xbf16, #tpu.memory_space<vmem>>, vector<128x4xbf16>,
    return
  }
  func.func @transform_0(%arg0: i32) -> (i32, i32) {
    %c0_i32 = arith.constant 0 : i32
    %c0_i32_0 = arith.constant 0 : i32
    return %arg0, %c0_i32 : i32, i32
  }
  func.func @transform_1(%arg0: i32) -> (i32, i32) {
    %c0_i32 = arith.constant 0 : i32
    %c0_i32_0 = arith.constant 0 : i32
    %c0_i32_1 = arith.constant 0 : i32
    return %c0_i32, %c0_i32_0 : i32, i32
  }
  func.func @transform_2(%arg0: i32) -> (i32, i32) {
    %c0_i32 = arith.constant 0 : i32
    %c0_i32_0 = arith.constant 0 : i32
    return %arg0, %c0_i32 : i32, i32
  }
  func.func @transform_3(%arg0: i32) -> (i32, i32, i32) {
    %c0_i32 = arith.constant 0 : i32
    %c0_i32_0 = arith.constant 0 : i32
    %c0_i32_1 = arith.constant 0 : i32
    return %arg0, %c0_i32, %c0_i32_0 : i32, i32, i32
  }
  func.func @transform_4(%arg0: i32) -> (i32, i32, i32) {
    %c0_i32 = arith.constant 0 : i32
    %c0_i32_0 = arith.constant 0 : i32
    %c0_i32_1 = arith.constant 0 : i32
    return %arg0, %c0_i32, %c0_i32_0 : i32, i32, i32
  }
}

module attributes {stable_mosaic.version = 11 : i64} {
  func.func @_conv2_bn1_kernel(%arg0: i32, %arg1: memref<1x16x16x4xbf16, #tpu.memory_space<vmem>>, %arg2: memref<1x4xf32, #tpu.memory_space<vmem>>, %arg3: memref<1x4xf32, #tpu.memory_space<vmem>>, %arg4: memref<9x4x4xbf16, #tpu.memory_space<vmem>>, %arg5: memref<1x8x8x4xbf16, #tpu.memory_space<vmem>>, %arg6: memref<1x1x4xf32, #tpu.memory_space<vmem>>, %arg7: memref<1x1x4xf32, #tpu.memory_space<vmem>>, %arg8: memref<328x4xf32, #tpu.memory_space<vmem>>) attributes {dimension_semantics = [#tpu.dimension_semantics<parallel>], iteration_bounds = array<i64: 2>, scalar_prefetch = 0 : i64, scratch_operands = 1 : i64, tpu.core_type = #tpu.core_type<tc>, window_params = [{transform_indices = @transform_0, window_bounds = array<i64: 1, 16, 16, 4>}, {pipeline_mode = #tpu.pipeline_mode<synchronous>, transform_indices = @transform_1, window_bounds = array<i64: 1, 4>}, {pipeline_mode = #tpu.pipeline_mode<synchronous>, transform_indices = @transform_2, window_bounds = array<i64: 1, 4>}, {pipeline_mode = #tpu.pipeline_mode<synchronous>, transform_indices = @transform_3, window_bounds = array<i64: 9, 4, 4>}, {transform_indices = @transform_4, window_bounds = array<i64: 1, 8, 8, 4>}, {transform_indices = @transform_5, window_bounds = array<i64: 1, 1, 4>}, {transform_indices = @transform_6, window_bounds = array<i64: 1, 1, 4>}]} {
    %c0 = arith.constant 0 : index
    %c0_0 = arith.constant 0 : index
    %c0_1 = arith.constant 0 : index
    %c0_2 = arith.constant 0 : index
    %0 = vector.load %arg1[%c0, %c0_0, %c0_1, %c0_2] : memref<1x16x16x4xbf16, #tpu.memory_space<vmem>>, vector<1x16x16x4xbf16>
    %1 = vector.shape_cast %0 : vector<1x16x16x4xbf16> to vector<16x16x4xbf16>
    %2 = arith.extf %1 : vector<16x16x4xbf16> to vector<16x16x4xf32>
    %c0_3 = arith.constant 0 : index
    %c0_4 = arith.constant 0 : index
    %3 = vector.load %arg2[%c0_3, %c0_4] : memref<1x4xf32, #tpu.memory_space<vmem>>, vector<1x4xf32>
    %4 = vector.shape_cast %3 : vector<1x4xf32> to vector<1x1x4xf32>
    %5 = vector.broadcast %4 : vector<1x1x4xf32> to vector<16x16x4xf32>
    %6 = arith.mulf %2, %5 : vector<16x16x4xf32>
    %c0_5 = arith.constant 0 : index
    %c0_6 = arith.constant 0 : index
    %7 = vector.load %arg3[%c0_5, %c0_6] : memref<1x4xf32, #tpu.memory_space<vmem>>, vector<1x4xf32>
    %8 = vector.shape_cast %7 : vector<1x4xf32> to vector<1x1x4xf32>
    %9 = vector.broadcast %8 : vector<1x1x4xf32> to vector<16x16x4xf32>
    %10 = arith.addf %6, %9 : vector<16x16x4xf32>
    %cst = arith.constant 0.000000e+00 : f32
    %11 = vector.broadcast %cst : f32 to vector<16x16x4xf32>
    %12 = arith.maximumf %10, %11 : vector<16x16x4xf32>
    %cst_7 = arith.constant 0.000000e+00 : f32
    %13 = vector.broadcast %cst_7 : f32 to vector<328x4xf32>
    %c0_8 = arith.constant 0 : index
    %c0_9 = arith.constant 0 : index
    %14 = vector.load %arg8[%c0_8, %c0_9] : memref<328x4xf32, #tpu.memory_space<vmem>>, vector<328x4xf32>
    tpu.vector_store %arg8[%c0_8, %c0_9], %13 {strides = array<i32>} : memref<328x4xf32, #tpu.memory_space<vmem>>, vector<328x4xf32>,
    %15 = vector.extract_strided_slice %12 {offsets = [0, 0, 0], sizes = [1, 16, 4], strides = [1, 1, 1]} : vector<16x16x4xf32> to vector<1x16x4xf32>
    %16 = vector.shape_cast %15 : vector<1x16x4xf32> to vector<16x4xf32>
    %c19 = arith.constant 19 : index
    %c0_10 = arith.constant 0 : index
    %17 = vector.load %arg8[%c19, %c0_10] : memref<328x4xf32, #tpu.memory_space<vmem>>, vector<16x4xf32>
    tpu.vector_store %arg8[%c19, %c0_10], %16 {strides = array<i32>} : memref<328x4xf32, #tpu.memory_space<vmem>>, vector<16x4xf32>,
    %18 = vector.extract_strided_slice %12 {offsets = [1, 0, 0], sizes = [1, 16, 4], strides = [1, 1, 1]} : vector<16x16x4xf32> to vector<1x16x4xf32>
    %19 = vector.shape_cast %18 : vector<1x16x4xf32> to vector<16x4xf32>
    %c37 = arith.constant 37 : index
    %c0_11 = arith.constant 0 : index
    %20 = vector.load %arg8[%c37, %c0_11] : memref<328x4xf32, #tpu.memory_space<vmem>>, vector<16x4xf32>
    tpu.vector_store %arg8[%c37, %c0_11], %19 {strides = array<i32>} : memref<328x4xf32, #tpu.memory_space<vmem>>, vector<16x4xf32>,
    %21 = vector.extract_strided_slice %12 {offsets = [2, 0, 0], sizes = [1, 16, 4], strides = [1, 1, 1]} : vector<16x16x4xf32> to vector<1x16x4xf32>
    %22 = vector.shape_cast %21 : vector<1x16x4xf32> to vector<16x4xf32>
    %c55 = arith.constant 55 : index
    %c0_12 = arith.constant 0 : index
    %23 = vector.load %arg8[%c55, %c0_12] : memref<328x4xf32, #tpu.memory_space<vmem>>, vector<16x4xf32>
    tpu.vector_store %arg8[%c55, %c0_12], %22 {strides = array<i32>} : memref<328x4xf32, #tpu.memory_space<vmem>>, vector<16x4xf32>,
    %24 = vector.extract_strided_slice %12 {offsets = [3, 0, 0], sizes = [1, 16, 4], strides = [1, 1, 1]} : vector<16x16x4xf32> to vector<1x16x4xf32>
    %25 = vector.shape_cast %24 : vector<1x16x4xf32> to vector<16x4xf32>
    %c73 = arith.constant 73 : index
    %c0_13 = arith.constant 0 : index
    %26 = vector.load %arg8[%c73, %c0_13] : memref<328x4xf32, #tpu.memory_space<vmem>>, vector<16x4xf32>
    tpu.vector_store %arg8[%c73, %c0_13], %25 {strides = array<i32>} : memref<328x4xf32, #tpu.memory_space<vmem>>, vector<16x4xf32>,
    %27 = vector.extract_strided_slice %12 {offsets = [4, 0, 0], sizes = [1, 16, 4], strides = [1, 1, 1]} : vector<16x16x4xf32> to vector<1x16x4xf32>
    %28 = vector.shape_cast %27 : vector<1x16x4xf32> to vector<16x4xf32>
    %c91 = arith.constant 91 : index
    %c0_14 = arith.constant 0 : index
    %29 = vector.load %arg8[%c91, %c0_14] : memref<328x4xf32, #tpu.memory_space<vmem>>, vector<16x4xf32>
    tpu.vector_store %arg8[%c91, %c0_14], %28 {strides = array<i32>} : memref<328x4xf32, #tpu.memory_space<vmem>>, vector<16x4xf32>,
    %30 = vector.extract_strided_slice %12 {offsets = [5, 0, 0], sizes = [1, 16, 4], strides = [1, 1, 1]} : vector<16x16x4xf32> to vector<1x16x4xf32>
    %31 = vector.shape_cast %30 : vector<1x16x4xf32> to vector<16x4xf32>
    %c109 = arith.constant 109 : index
    %c0_15 = arith.constant 0 : index
    %32 = vector.load %arg8[%c109, %c0_15] : memref<328x4xf32, #tpu.memory_space<vmem>>, vector<16x4xf32>
    tpu.vector_store %arg8[%c109, %c0_15], %31 {strides = array<i32>} : memref<328x4xf32, #tpu.memory_space<vmem>>, vector<16x4xf32>,
    %33 = vector.extract_strided_slice %12 {offsets = [6, 0, 0], sizes = [1, 16, 4], strides = [1, 1, 1]} : vector<16x16x4xf32> to vector<1x16x4xf32>
    %34 = vector.shape_cast %33 : vector<1x16x4xf32> to vector<16x4xf32>
    %c127 = arith.constant 127 : index
    %c0_16 = arith.constant 0 : index
    %35 = vector.load %arg8[%c127, %c0_16] : memref<328x4xf32, #tpu.memory_space<vmem>>, vector<16x4xf32>
    tpu.vector_store %arg8[%c127, %c0_16], %34 {strides = array<i32>} : memref<328x4xf32, #tpu.memory_space<vmem>>, vector<16x4xf32>,
    %36 = vector.extract_strided_slice %12 {offsets = [7, 0, 0], sizes = [1, 16, 4], strides = [1, 1, 1]} : vector<16x16x4xf32> to vector<1x16x4xf32>
    %37 = vector.shape_cast %36 : vector<1x16x4xf32> to vector<16x4xf32>
    %c145 = arith.constant 145 : index
    %c0_17 = arith.constant 0 : index
    %38 = vector.load %arg8[%c145, %c0_17] : memref<328x4xf32, #tpu.memory_space<vmem>>, vector<16x4xf32>
    tpu.vector_store %arg8[%c145, %c0_17], %37 {strides = array<i32>} : memref<328x4xf32, #tpu.memory_space<vmem>>, vector<16x4xf32>,
    %39 = vector.extract_strided_slice %12 {offsets = [8, 0, 0], sizes = [1, 16, 4], strides = [1, 1, 1]} : vector<16x16x4xf32> to vector<1x16x4xf32>
    %40 = vector.shape_cast %39 : vector<1x16x4xf32> to vector<16x4xf32>
    %c163 = arith.constant 163 : index
    %c0_18 = arith.constant 0 : index
    %41 = vector.load %arg8[%c163, %c0_18] : memref<328x4xf32, #tpu.memory_space<vmem>>, vector<16x4xf32>
    tpu.vector_store %arg8[%c163, %c0_18], %40 {strides = array<i32>} : memref<328x4xf32, #tpu.memory_space<vmem>>, vector<16x4xf32>,
    %42 = vector.extract_strided_slice %12 {offsets = [9, 0, 0], sizes = [1, 16, 4], strides = [1, 1, 1]} : vector<16x16x4xf32> to vector<1x16x4xf32>
    %43 = vector.shape_cast %42 : vector<1x16x4xf32> to vector<16x4xf32>
    %c181 = arith.constant 181 : index
    %c0_19 = arith.constant 0 : index
    %44 = vector.load %arg8[%c181, %c0_19] : memref<328x4xf32, #tpu.memory_space<vmem>>, vector<16x4xf32>
    tpu.vector_store %arg8[%c181, %c0_19], %43 {strides = array<i32>} : memref<328x4xf32, #tpu.memory_space<vmem>>, vector<16x4xf32>,
    %45 = vector.extract_strided_slice %12 {offsets = [10, 0, 0], sizes = [1, 16, 4], strides = [1, 1, 1]} : vector<16x16x4xf32> to vector<1x16x4xf32>
    %46 = vector.shape_cast %45 : vector<1x16x4xf32> to vector<16x4xf32>
    %c199 = arith.constant 199 : index
    %c0_20 = arith.constant 0 : index
    %47 = vector.load %arg8[%c199, %c0_20] : memref<328x4xf32, #tpu.memory_space<vmem>>, vector<16x4xf32>
    tpu.vector_store %arg8[%c199, %c0_20], %46 {strides = array<i32>} : memref<328x4xf32, #tpu.memory_space<vmem>>, vector<16x4xf32>,
    %48 = vector.extract_strided_slice %12 {offsets = [11, 0, 0], sizes = [1, 16, 4], strides = [1, 1, 1]} : vector<16x16x4xf32> to vector<1x16x4xf32>
    %49 = vector.shape_cast %48 : vector<1x16x4xf32> to vector<16x4xf32>
    %c217 = arith.constant 217 : index
    %c0_21 = arith.constant 0 : index
    %50 = vector.load %arg8[%c217, %c0_21] : memref<328x4xf32, #tpu.memory_space<vmem>>, vector<16x4xf32>
    tpu.vector_store %arg8[%c217, %c0_21], %49 {strides = array<i32>} : memref<328x4xf32, #tpu.memory_space<vmem>>, vector<16x4xf32>,
    %51 = vector.extract_strided_slice %12 {offsets = [12, 0, 0], sizes = [1, 16, 4], strides = [1, 1, 1]} : vector<16x16x4xf32> to vector<1x16x4xf32>
    %52 = vector.shape_cast %51 : vector<1x16x4xf32> to vector<16x4xf32>
    %c235 = arith.constant 235 : index
    %c0_22 = arith.constant 0 : index
    %53 = vector.load %arg8[%c235, %c0_22] : memref<328x4xf32, #tpu.memory_space<vmem>>, vector<16x4xf32>
    tpu.vector_store %arg8[%c235, %c0_22], %52 {strides = array<i32>} : memref<328x4xf32, #tpu.memory_space<vmem>>, vector<16x4xf32>,
    %54 = vector.extract_strided_slice %12 {offsets = [13, 0, 0], sizes = [1, 16, 4], strides = [1, 1, 1]} : vector<16x16x4xf32> to vector<1x16x4xf32>
    %55 = vector.shape_cast %54 : vector<1x16x4xf32> to vector<16x4xf32>
    %c253 = arith.constant 253 : index
    %c0_23 = arith.constant 0 : index
    %56 = vector.load %arg8[%c253, %c0_23] : memref<328x4xf32, #tpu.memory_space<vmem>>, vector<16x4xf32>
    tpu.vector_store %arg8[%c253, %c0_23], %55 {strides = array<i32>} : memref<328x4xf32, #tpu.memory_space<vmem>>, vector<16x4xf32>,
    %57 = vector.extract_strided_slice %12 {offsets = [14, 0, 0], sizes = [1, 16, 4], strides = [1, 1, 1]} : vector<16x16x4xf32> to vector<1x16x4xf32>
    %58 = vector.shape_cast %57 : vector<1x16x4xf32> to vector<16x4xf32>
    %c271 = arith.constant 271 : index
    %c0_24 = arith.constant 0 : index
    %59 = vector.load %arg8[%c271, %c0_24] : memref<328x4xf32, #tpu.memory_space<vmem>>, vector<16x4xf32>
    tpu.vector_store %arg8[%c271, %c0_24], %58 {strides = array<i32>} : memref<328x4xf32, #tpu.memory_space<vmem>>, vector<16x4xf32>,
    %60 = vector.extract_strided_slice %12 {offsets = [15, 0, 0], sizes = [1, 16, 4], strides = [1, 1, 1]} : vector<16x16x4xf32> to vector<1x16x4xf32>
    %61 = vector.shape_cast %60 : vector<1x16x4xf32> to vector<16x4xf32>
    %c289 = arith.constant 289 : index
    %c0_25 = arith.constant 0 : index
    %62 = vector.load %arg8[%c289, %c0_25] : memref<328x4xf32, #tpu.memory_space<vmem>>, vector<16x4xf32>
    tpu.vector_store %arg8[%c289, %c0_25], %61 {strides = array<i32>} : memref<328x4xf32, #tpu.memory_space<vmem>>, vector<16x4xf32>,
    %c0_26 = arith.constant 0 : index
    %c0_27 = arith.constant 0 : index
    %c0_28 = arith.constant 0 : index
    %63 = vector.load %arg4[%c0_26, %c0_27, %c0_28] : memref<9x4x4xbf16, #tpu.memory_space<vmem>>, vector<9x4x4xbf16>
    %cst_29 = arith.constant 0.000000e+00 : f32
    %64 = vector.broadcast %cst_29 : f32 to vector<144x4xf32>
    %c0_30 = arith.constant 0 : index
    %c0_31 = arith.constant 0 : index
    %65 = tpu.strided_load %arg8[%c0_30, %c0_31] {strides = array<i32: 2, 1>} : memref<328x4xf32, #tpu.memory_space<vmem>>, vector<144x4xf32>
    %66 = arith.truncf %65 : vector<144x4xf32> to vector<144x4xbf16>
    %67 = vector.extract_strided_slice %63 {offsets = [0, 0, 0], sizes = [1, 4, 4], strides = [1, 1, 1]} : vector<9x4x4xbf16> to vector<1x4x4xbf16>
    %68 = vector.shape_cast %67 : vector<1x4x4xbf16> to vector<4x4xbf16>
    %cst_32 = arith.constant dense<0.000000e+00> : vector<144x4xf32>
    %69 = tpu.matmul %66, %68, %cst_32 {dimension_numbers = #tpu.dot_dimension_numbers<[1], [0], [0], [1], [0, 0, 1, 1], [], []>} : vector<144x4xbf16>, vector<4x4xbf16>, vector<144x4xf32> -> vector<144x4xf32>
    %70 = arith.addf %64, %69 : vector<144x4xf32>
    %c1 = arith.constant 1 : index
    %c0_33 = arith.constant 0 : index
    %71 = tpu.strided_load %arg8[%c1, %c0_33] {strides = array<i32: 2, 1>} : memref<328x4xf32, #tpu.memory_space<vmem>>, vector<144x4xf32>
    %72 = arith.truncf %71 : vector<144x4xf32> to vector<144x4xbf16>
    %73 = vector.extract_strided_slice %63 {offsets = [1, 0, 0], sizes = [1, 4, 4], strides = [1, 1, 1]} : vector<9x4x4xbf16> to vector<1x4x4xbf16>
    %74 = vector.shape_cast %73 : vector<1x4x4xbf16> to vector<4x4xbf16>
    %cst_34 = arith.constant dense<0.000000e+00> : vector<144x4xf32>
    %75 = tpu.matmul %72, %74, %cst_34 {dimension_numbers = #tpu.dot_dimension_numbers<[1], [0], [0], [1], [0, 0, 1, 1], [], []>} : vector<144x4xbf16>, vector<4x4xbf16>, vector<144x4xf32> -> vector<144x4xf32>
    %76 = arith.addf %70, %75 : vector<144x4xf32>
    %c2 = arith.constant 2 : index
    %c0_35 = arith.constant 0 : index
    %77 = tpu.strided_load %arg8[%c2, %c0_35] {strides = array<i32: 2, 1>} : memref<328x4xf32, #tpu.memory_space<vmem>>, vector<144x4xf32>
    %78 = arith.truncf %77 : vector<144x4xf32> to vector<144x4xbf16>
    %79 = vector.extract_strided_slice %63 {offsets = [2, 0, 0], sizes = [1, 4, 4], strides = [1, 1, 1]} : vector<9x4x4xbf16> to vector<1x4x4xbf16>
    %80 = vector.shape_cast %79 : vector<1x4x4xbf16> to vector<4x4xbf16>
    %cst_36 = arith.constant dense<0.000000e+00> : vector<144x4xf32>
    %81 = tpu.matmul %78, %80, %cst_36 {dimension_numbers = #tpu.dot_dimension_numbers<[1], [0], [0], [1], [0, 0, 1, 1], [], []>} : vector<144x4xbf16>, vector<4x4xbf16>, vector<144x4xf32> -> vector<144x4xf32>
    %82 = arith.addf %76, %81 : vector<144x4xf32>
    %c18 = arith.constant 18 : index
    %c0_37 = arith.constant 0 : index
    %83 = tpu.strided_load %arg8[%c18, %c0_37] {strides = array<i32: 2, 1>} : memref<328x4xf32, #tpu.memory_space<vmem>>, vector<144x4xf32>
    %84 = arith.truncf %83 : vector<144x4xf32> to vector<144x4xbf16>
    %85 = vector.extract_strided_slice %63 {offsets = [3, 0, 0], sizes = [1, 4, 4], strides = [1, 1, 1]} : vector<9x4x4xbf16> to vector<1x4x4xbf16>
    %86 = vector.shape_cast %85 : vector<1x4x4xbf16> to vector<4x4xbf16>
    %cst_38 = arith.constant dense<0.000000e+00> : vector<144x4xf32>
    %87 = tpu.matmul %84, %86, %cst_38 {dimension_numbers = #tpu.dot_dimension_numbers<[1], [0], [0], [1], [0, 0, 1, 1], [], []>} : vector<144x4xbf16>, vector<4x4xbf16>, vector<144x4xf32> -> vector<144x4xf32>
    %88 = arith.addf %82, %87 : vector<144x4xf32>
    %c19_39 = arith.constant 19 : index
    %c0_40 = arith.constant 0 : index
    %89 = tpu.strided_load %arg8[%c19_39, %c0_40] {strides = array<i32: 2, 1>} : memref<328x4xf32, #tpu.memory_space<vmem>>, vector<144x4xf32>
    %90 = arith.truncf %89 : vector<144x4xf32> to vector<144x4xbf16>
    %91 = vector.extract_strided_slice %63 {offsets = [4, 0, 0], sizes = [1, 4, 4], strides = [1, 1, 1]} : vector<9x4x4xbf16> to vector<1x4x4xbf16>
    %92 = vector.shape_cast %91 : vector<1x4x4xbf16> to vector<4x4xbf16>
    %cst_41 = arith.constant dense<0.000000e+00> : vector<144x4xf32>
    %93 = tpu.matmul %90, %92, %cst_41 {dimension_numbers = #tpu.dot_dimension_numbers<[1], [0], [0], [1], [0, 0, 1, 1], [], []>} : vector<144x4xbf16>, vector<4x4xbf16>, vector<144x4xf32> -> vector<144x4xf32>
    %94 = arith.addf %88, %93 : vector<144x4xf32>
    %c20 = arith.constant 20 : index
    %c0_42 = arith.constant 0 : index
    %95 = tpu.strided_load %arg8[%c20, %c0_42] {strides = array<i32: 2, 1>} : memref<328x4xf32, #tpu.memory_space<vmem>>, vector<144x4xf32>
    %96 = arith.truncf %95 : vector<144x4xf32> to vector<144x4xbf16>
    %97 = vector.extract_strided_slice %63 {offsets = [5, 0, 0], sizes = [1, 4, 4], strides = [1, 1, 1]} : vector<9x4x4xbf16> to vector<1x4x4xbf16>
    %98 = vector.shape_cast %97 : vector<1x4x4xbf16> to vector<4x4xbf16>
    %cst_43 = arith.constant dense<0.000000e+00> : vector<144x4xf32>
    %99 = tpu.matmul %96, %98, %cst_43 {dimension_numbers = #tpu.dot_dimension_numbers<[1], [0], [0], [1], [0, 0, 1, 1], [], []>} : vector<144x4xbf16>, vector<4x4xbf16>, vector<144x4xf32> -> vector<144x4xf32>
    %100 = arith.addf %94, %99 : vector<144x4xf32>
    %c36 = arith.constant 36 : index
    %c0_44 = arith.constant 0 : index
    %101 = tpu.strided_load %arg8[%c36, %c0_44] {strides = array<i32: 2, 1>} : memref<328x4xf32, #tpu.memory_space<vmem>>, vector<144x4xf32>
    %102 = arith.truncf %101 : vector<144x4xf32> to vector<144x4xbf16>
    %103 = vector.extract_strided_slice %63 {offsets = [6, 0, 0], sizes = [1, 4, 4], strides = [1, 1, 1]} : vector<9x4x4xbf16> to vector<1x4x4xbf16>
    %104 = vector.shape_cast %103 : vector<1x4x4xbf16> to vector<4x4xbf16>
    %cst_45 = arith.constant dense<0.000000e+00> : vector<144x4xf32>
    %105 = tpu.matmul %102, %104, %cst_45 {dimension_numbers = #tpu.dot_dimension_numbers<[1], [0], [0], [1], [0, 0, 1, 1], [], []>} : vector<144x4xbf16>, vector<4x4xbf16>, vector<144x4xf32> -> vector<144x4xf32>
    %106 = arith.addf %100, %105 : vector<144x4xf32>
    %c37_46 = arith.constant 37 : index
    %c0_47 = arith.constant 0 : index
    %107 = tpu.strided_load %arg8[%c37_46, %c0_47] {strides = array<i32: 2, 1>} : memref<328x4xf32, #tpu.memory_space<vmem>>, vector<144x4xf32>
    %108 = arith.truncf %107 : vector<144x4xf32> to vector<144x4xbf16>
    %109 = vector.extract_strided_slice %63 {offsets = [7, 0, 0], sizes = [1, 4, 4], strides = [1, 1, 1]} : vector<9x4x4xbf16> to vector<1x4x4xbf16>
    %110 = vector.shape_cast %109 : vector<1x4x4xbf16> to vector<4x4xbf16>
    %cst_48 = arith.constant dense<0.000000e+00> : vector<144x4xf32>
    %111 = tpu.matmul %108, %110, %cst_48 {dimension_numbers = #tpu.dot_dimension_numbers<[1], [0], [0], [1], [0, 0, 1, 1], [], []>} : vector<144x4xbf16>, vector<4x4xbf16>, vector<144x4xf32> -> vector<144x4xf32>
    %112 = arith.addf %106, %111 : vector<144x4xf32>
    %c38 = arith.constant 38 : index
    %c0_49 = arith.constant 0 : index
    %113 = tpu.strided_load %arg8[%c38, %c0_49] {strides = array<i32: 2, 1>} : memref<328x4xf32, #tpu.memory_space<vmem>>, vector<144x4xf32>
    %114 = arith.truncf %113 : vector<144x4xf32> to vector<144x4xbf16>
    %115 = vector.extract_strided_slice %63 {offsets = [8, 0, 0], sizes = [1, 4, 4], strides = [1, 1, 1]} : vector<9x4x4xbf16> to vector<1x4x4xbf16>
    %116 = vector.shape_cast %115 : vector<1x4x4xbf16> to vector<4x4xbf16>
    %cst_50 = arith.constant dense<0.000000e+00> : vector<144x4xf32>
    %117 = tpu.matmul %114, %116, %cst_50 {dimension_numbers = #tpu.dot_dimension_numbers<[1], [0], [0], [1], [0, 0, 1, 1], [], []>} : vector<144x4xbf16>, vector<4x4xbf16>, vector<144x4xf32> -> vector<144x4xf32>
    %118 = arith.addf %112, %117 : vector<144x4xf32>
    %cst_51 = arith.constant 0.000000e+00 : f32
    %119 = vector.broadcast %cst_51 : f32 to vector<4xf32>
    %cst_52 = arith.constant 0.000000e+00 : f32
    %120 = vector.broadcast %cst_52 : f32 to vector<4xf32>
    %121 = vector.extract_strided_slice %118 {offsets = [0, 0], sizes = [8, 4], strides = [1, 1]} : vector<144x4xf32> to vector<8x4xf32>
    %cst_53 = arith.constant dense<0.000000e+00> : vector<4xf32>
    %122 = vector.multi_reduction <add>, %121, %cst_53 [0] : vector<8x4xf32> to vector<4xf32>
    %123 = arith.addf %119, %122 : vector<4xf32>
    %124 = arith.mulf %121, %121 : vector<8x4xf32>
    %cst_54 = arith.constant dense<0.000000e+00> : vector<4xf32>
    %125 = vector.multi_reduction <add>, %124, %cst_54 [0] : vector<8x4xf32> to vector<4xf32>
    %126 = arith.addf %120, %125 : vector<4xf32>
    %127 = vector.shape_cast %121 : vector<8x4xf32> to vector<1x1x8x4xf32>
    %128 = arith.truncf %127 : vector<1x1x8x4xf32> to vector<1x1x8x4xbf16>
    %c0_55 = arith.constant 0 : index
    %c0_56 = arith.constant 0 : index
    %c0_57 = arith.constant 0 : index
    %c0_58 = arith.constant 0 : index
    %129 = vector.load %arg5[%c0_55, %c0_56, %c0_57, %c0_58] : memref<1x8x8x4xbf16, #tpu.memory_space<vmem>>, vector<1x1x8x4xbf16>
    tpu.vector_store %arg5[%c0_55, %c0_56, %c0_57, %c0_58], %128 {strides = array<i32>} : memref<1x8x8x4xbf16, #tpu.memory_space<vmem>>, vector<1x1x8x4xbf16>,
    %130 = vector.extract_strided_slice %118 {offsets = [18, 0], sizes = [8, 4], strides = [1, 1]} : vector<144x4xf32> to vector<8x4xf32>
    %cst_59 = arith.constant dense<0.000000e+00> : vector<4xf32>
    %131 = vector.multi_reduction <add>, %130, %cst_59 [0] : vector<8x4xf32> to vector<4xf32>
    %132 = arith.addf %123, %131 : vector<4xf32>
    %133 = arith.mulf %130, %130 : vector<8x4xf32>
    %cst_60 = arith.constant dense<0.000000e+00> : vector<4xf32>
    %134 = vector.multi_reduction <add>, %133, %cst_60 [0] : vector<8x4xf32> to vector<4xf32>
    %135 = arith.addf %126, %134 : vector<4xf32>
    %136 = vector.shape_cast %130 : vector<8x4xf32> to vector<1x1x8x4xf32>
    %137 = arith.truncf %136 : vector<1x1x8x4xf32> to vector<1x1x8x4xbf16>
    %c0_61 = arith.constant 0 : index
    %c1_62 = arith.constant 1 : index
    %c0_63 = arith.constant 0 : index
    %c0_64 = arith.constant 0 : index
    %138 = vector.load %arg5[%c0_61, %c1_62, %c0_63, %c0_64] : memref<1x8x8x4xbf16, #tpu.memory_space<vmem>>, vector<1x1x8x4xbf16>
    tpu.vector_store %arg5[%c0_61, %c1_62, %c0_63, %c0_64], %137 {strides = array<i32>} : memref<1x8x8x4xbf16, #tpu.memory_space<vmem>>, vector<1x1x8x4xbf16>,
    %139 = vector.extract_strided_slice %118 {offsets = [36, 0], sizes = [8, 4], strides = [1, 1]} : vector<144x4xf32> to vector<8x4xf32>
    %cst_65 = arith.constant dense<0.000000e+00> : vector<4xf32>
    %140 = vector.multi_reduction <add>, %139, %cst_65 [0] : vector<8x4xf32> to vector<4xf32>
    %141 = arith.addf %132, %140 : vector<4xf32>
    %142 = arith.mulf %139, %139 : vector<8x4xf32>
    %cst_66 = arith.constant dense<0.000000e+00> : vector<4xf32>
    %143 = vector.multi_reduction <add>, %142, %cst_66 [0] : vector<8x4xf32> to vector<4xf32>
    %144 = arith.addf %135, %143 : vector<4xf32>
    %145 = vector.shape_cast %139 : vector<8x4xf32> to vector<1x1x8x4xf32>
    %146 = arith.truncf %145 : vector<1x1x8x4xf32> to vector<1x1x8x4xbf16>
    %c0_67 = arith.constant 0 : index
    %c2_68 = arith.constant 2 : index
    %c0_69 = arith.constant 0 : index
    %c0_70 = arith.constant 0 : index
    %147 = vector.load %arg5[%c0_67, %c2_68, %c0_69, %c0_70] : memref<1x8x8x4xbf16, #tpu.memory_space<vmem>>, vector<1x1x8x4xbf16>
    tpu.vector_store %arg5[%c0_67, %c2_68, %c0_69, %c0_70], %146 {strides = array<i32>} : memref<1x8x8x4xbf16, #tpu.memory_space<vmem>>, vector<1x1x8x4xbf16>,
    %148 = vector.extract_strided_slice %118 {offsets = [54, 0], sizes = [8, 4], strides = [1, 1]} : vector<144x4xf32> to vector<8x4xf32>
    %cst_71 = arith.constant dense<0.000000e+00> : vector<4xf32>
    %149 = vector.multi_reduction <add>, %148, %cst_71 [0] : vector<8x4xf32> to vector<4xf32>
    %150 = arith.addf %141, %149 : vector<4xf32>
    %151 = arith.mulf %148, %148 : vector<8x4xf32>
    %cst_72 = arith.constant dense<0.000000e+00> : vector<4xf32>
    %152 = vector.multi_reduction <add>, %151, %cst_72 [0] : vector<8x4xf32> to vector<4xf32>
    %153 = arith.addf %144, %152 : vector<4xf32>
    %154 = vector.shape_cast %148 : vector<8x4xf32> to vector<1x1x8x4xf32>
    %155 = arith.truncf %154 : vector<1x1x8x4xf32> to vector<1x1x8x4xbf16>
    %c0_73 = arith.constant 0 : index
    %c3 = arith.constant 3 : index
    %c0_74 = arith.constant 0 : index
    %c0_75 = arith.constant 0 : index
    %156 = vector.load %arg5[%c0_73, %c3, %c0_74, %c0_75] : memref<1x8x8x4xbf16, #tpu.memory_space<vmem>>, vector<1x1x8x4xbf16>
    tpu.vector_store %arg5[%c0_73, %c3, %c0_74, %c0_75], %155 {strides = array<i32>} : memref<1x8x8x4xbf16, #tpu.memory_space<vmem>>, vector<1x1x8x4xbf16>,
    %157 = vector.extract_strided_slice %118 {offsets = [72, 0], sizes = [8, 4], strides = [1, 1]} : vector<144x4xf32> to vector<8x4xf32>
    %cst_76 = arith.constant dense<0.000000e+00> : vector<4xf32>
    %158 = vector.multi_reduction <add>, %157, %cst_76 [0] : vector<8x4xf32> to vector<4xf32>
    %159 = arith.addf %150, %158 : vector<4xf32>
    %160 = arith.mulf %157, %157 : vector<8x4xf32>
    %cst_77 = arith.constant dense<0.000000e+00> : vector<4xf32>
    %161 = vector.multi_reduction <add>, %160, %cst_77 [0] : vector<8x4xf32> to vector<4xf32>
    %162 = arith.addf %153, %161 : vector<4xf32>
    %163 = vector.shape_cast %157 : vector<8x4xf32> to vector<1x1x8x4xf32>
    %164 = arith.truncf %163 : vector<1x1x8x4xf32> to vector<1x1x8x4xbf16>
    %c0_78 = arith.constant 0 : index
    %c4 = arith.constant 4 : index
    %c0_79 = arith.constant 0 : index
    %c0_80 = arith.constant 0 : index
    %165 = vector.load %arg5[%c0_78, %c4, %c0_79, %c0_80] : memref<1x8x8x4xbf16, #tpu.memory_space<vmem>>, vector<1x1x8x4xbf16>
    tpu.vector_store %arg5[%c0_78, %c4, %c0_79, %c0_80], %164 {strides = array<i32>} : memref<1x8x8x4xbf16, #tpu.memory_space<vmem>>, vector<1x1x8x4xbf16>,
    %166 = vector.extract_strided_slice %118 {offsets = [90, 0], sizes = [8, 4], strides = [1, 1]} : vector<144x4xf32> to vector<8x4xf32>
    %cst_81 = arith.constant dense<0.000000e+00> : vector<4xf32>
    %167 = vector.multi_reduction <add>, %166, %cst_81 [0] : vector<8x4xf32> to vector<4xf32>
    %168 = arith.addf %159, %167 : vector<4xf32>
    %169 = arith.mulf %166, %166 : vector<8x4xf32>
    %cst_82 = arith.constant dense<0.000000e+00> : vector<4xf32>
    %170 = vector.multi_reduction <add>, %169, %cst_82 [0] : vector<8x4xf32> to vector<4xf32>
    %171 = arith.addf %162, %170 : vector<4xf32>
    %172 = vector.shape_cast %166 : vector<8x4xf32> to vector<1x1x8x4xf32>
    %173 = arith.truncf %172 : vector<1x1x8x4xf32> to vector<1x1x8x4xbf16>
    %c0_83 = arith.constant 0 : index
    %c5 = arith.constant 5 : index
    %c0_84 = arith.constant 0 : index
    %c0_85 = arith.constant 0 : index
    %174 = vector.load %arg5[%c0_83, %c5, %c0_84, %c0_85] : memref<1x8x8x4xbf16, #tpu.memory_space<vmem>>, vector<1x1x8x4xbf16>
    tpu.vector_store %arg5[%c0_83, %c5, %c0_84, %c0_85], %173 {strides = array<i32>} : memref<1x8x8x4xbf16, #tpu.memory_space<vmem>>, vector<1x1x8x4xbf16>,
    %175 = vector.extract_strided_slice %118 {offsets = [108, 0], sizes = [8, 4], strides = [1, 1]} : vector<144x4xf32> to vector<8x4xf32>
    %cst_86 = arith.constant dense<0.000000e+00> : vector<4xf32>
    %176 = vector.multi_reduction <add>, %175, %cst_86 [0] : vector<8x4xf32> to vector<4xf32>
    %177 = arith.addf %168, %176 : vector<4xf32>
    %178 = arith.mulf %175, %175 : vector<8x4xf32>
    %cst_87 = arith.constant dense<0.000000e+00> : vector<4xf32>
    %179 = vector.multi_reduction <add>, %178, %cst_87 [0] : vector<8x4xf32> to vector<4xf32>
    %180 = arith.addf %171, %179 : vector<4xf32>
    %181 = vector.shape_cast %175 : vector<8x4xf32> to vector<1x1x8x4xf32>
    %182 = arith.truncf %181 : vector<1x1x8x4xf32> to vector<1x1x8x4xbf16>
    %c0_88 = arith.constant 0 : index
    %c6 = arith.constant 6 : index
    %c0_89 = arith.constant 0 : index
    %c0_90 = arith.constant 0 : index
    %183 = vector.load %arg5[%c0_88, %c6, %c0_89, %c0_90] : memref<1x8x8x4xbf16, #tpu.memory_space<vmem>>, vector<1x1x8x4xbf16>
    tpu.vector_store %arg5[%c0_88, %c6, %c0_89, %c0_90], %182 {strides = array<i32>} : memref<1x8x8x4xbf16, #tpu.memory_space<vmem>>, vector<1x1x8x4xbf16>,
    %184 = vector.extract_strided_slice %118 {offsets = [126, 0], sizes = [8, 4], strides = [1, 1]} : vector<144x4xf32> to vector<8x4xf32>
    %cst_91 = arith.constant dense<0.000000e+00> : vector<4xf32>
    %185 = vector.multi_reduction <add>, %184, %cst_91 [0] : vector<8x4xf32> to vector<4xf32>
    %186 = arith.addf %177, %185 : vector<4xf32>
    %187 = arith.mulf %184, %184 : vector<8x4xf32>
    %cst_92 = arith.constant dense<0.000000e+00> : vector<4xf32>
    %188 = vector.multi_reduction <add>, %187, %cst_92 [0] : vector<8x4xf32> to vector<4xf32>
    %189 = arith.addf %180, %188 : vector<4xf32>
    %190 = vector.shape_cast %184 : vector<8x4xf32> to vector<1x1x8x4xf32>
    %191 = arith.truncf %190 : vector<1x1x8x4xf32> to vector<1x1x8x4xbf16>
    %c0_93 = arith.constant 0 : index
    %c7 = arith.constant 7 : index
    %c0_94 = arith.constant 0 : index
    %c0_95 = arith.constant 0 : index
    %192 = vector.load %arg5[%c0_93, %c7, %c0_94, %c0_95] : memref<1x8x8x4xbf16, #tpu.memory_space<vmem>>, vector<1x1x8x4xbf16>
    tpu.vector_store %arg5[%c0_93, %c7, %c0_94, %c0_95], %191 {strides = array<i32>} : memref<1x8x8x4xbf16, #tpu.memory_space<vmem>>, vector<1x1x8x4xbf16>,
    %193 = vector.shape_cast %186 : vector<4xf32> to vector<1x1x4xf32>
    %c0_96 = arith.constant 0 : index
    %c0_97 = arith.constant 0 : index
    %c0_98 = arith.constant 0 : index
    %194 = vector.load %arg6[%c0_96, %c0_97, %c0_98] : memref<1x1x4xf32, #tpu.memory_space<vmem>>, vector<1x1x4xf32>
    tpu.vector_store %arg6[%c0_96, %c0_97, %c0_98], %193 {strides = array<i32>} : memref<1x1x4xf32, #tpu.memory_space<vmem>>, vector<1x1x4xf32>,
    %195 = vector.shape_cast %189 : vector<4xf32> to vector<1x1x4xf32>
    %c0_99 = arith.constant 0 : index
    %c0_100 = arith.constant 0 : index
    %c0_101 = arith.constant 0 : index
    %196 = vector.load %arg7[%c0_99, %c0_100, %c0_101] : memref<1x1x4xf32, #tpu.memory_space<vmem>>, vector<1x1x4xf32>
    tpu.vector_store %arg7[%c0_99, %c0_100, %c0_101], %195 {strides = array<i32>} : memref<1x1x4xf32, #tpu.memory_space<vmem>>, vector<1x1x4xf32>,
    return
  }
  func.func @transform_0(%arg0: i32) -> (i32, i32, i32, i32) {
    %c0_i32 = arith.constant 0 : i32
    %c0_i32_0 = arith.constant 0 : i32
    %c0_i32_1 = arith.constant 0 : i32
    %c0_i32_2 = arith.constant 0 : i32
    return %arg0, %c0_i32, %c0_i32_0, %c0_i32_1 : i32, i32, i32, i32
  }
  func.func @transform_1(%arg0: i32) -> (i32, i32) {
    %c0_i32 = arith.constant 0 : i32
    %c0_i32_0 = arith.constant 0 : i32
    %c0_i32_1 = arith.constant 0 : i32
    return %c0_i32, %c0_i32_0 : i32, i32
  }
  func.func @transform_2(%arg0: i32) -> (i32, i32) {
    %c0_i32 = arith.constant 0 : i32
    %c0_i32_0 = arith.constant 0 : i32
    %c0_i32_1 = arith.constant 0 : i32
    return %c0_i32, %c0_i32_0 : i32, i32
  }
  func.func @transform_3(%arg0: i32) -> (i32, i32, i32) {
    %c0_i32 = arith.constant 0 : i32
    %c0_i32_0 = arith.constant 0 : i32
    %c0_i32_1 = arith.constant 0 : i32
    %c0_i32_2 = arith.constant 0 : i32
    return %c0_i32, %c0_i32_0, %c0_i32_1 : i32, i32, i32
  }
  func.func @transform_4(%arg0: i32) -> (i32, i32, i32, i32) {
    %c0_i32 = arith.constant 0 : i32
    %c0_i32_0 = arith.constant 0 : i32
    %c0_i32_1 = arith.constant 0 : i32
    %c0_i32_2 = arith.constant 0 : i32
    return %arg0, %c0_i32, %c0_i32_0, %c0_i32_1 : i32, i32, i32, i32
  }
  func.func @transform_5(%arg0: i32) -> (i32, i32, i32) {
    %c0_i32 = arith.constant 0 : i32
    %c0_i32_0 = arith.constant 0 : i32
    %c0_i32_1 = arith.constant 0 : i32
    return %arg0, %c0_i32, %c0_i32_0 : i32, i32, i32
  }
  func.func @transform_6(%arg0: i32) -> (i32, i32, i32) {
    %c0_i32 = arith.constant 0 : i32
    %c0_i32_0 = arith.constant 0 : i32
    %c0_i32_1 = arith.constant 0 : i32
    return %arg0, %c0_i32, %c0_i32_0 : i32, i32, i32
  }
}

module attributes {stable_mosaic.version = 11 : i64} {
  func.func @_matmul_stats_kernel(%arg0: i32, %arg1: memref<128x4xbf16, #tpu.memory_space<vmem>>, %arg2: memref<4x16xbf16, #tpu.memory_space<vmem>>, %arg3: memref<128x16xbf16, #tpu.memory_space<vmem>>, %arg4: memref<1x1x16xf32, #tpu.memory_space<vmem>>, %arg5: memref<1x1x16xf32, #tpu.memory_space<vmem>>) attributes {dimension_semantics = [#tpu.dimension_semantics<parallel>], iteration_bounds = array<i64: 1>, scalar_prefetch = 0 : i64, scratch_operands = 0 : i64, tpu.core_type = #tpu.core_type<tc>, window_params = [{transform_indices = @transform_0, window_bounds = array<i64: 128, 4>}, {pipeline_mode = #tpu.pipeline_mode<synchronous>, transform_indices = @transform_1, window_bounds = array<i64: 4, 16>}, {transform_indices = @transform_2, window_bounds = array<i64: 128, 16>}, {transform_indices = @transform_3, window_bounds = array<i64: 1, 1, 16>}, {transform_indices = @transform_4, window_bounds = array<i64: 1, 1, 16>}]} {
    %c0 = arith.constant 0 : index
    %c0_0 = arith.constant 0 : index
    %0 = vector.load %arg1[%c0, %c0_0] : memref<128x4xbf16, #tpu.memory_space<vmem>>, vector<128x4xbf16>
    %c0_1 = arith.constant 0 : index
    %c0_2 = arith.constant 0 : index
    %1 = vector.load %arg2[%c0_1, %c0_2] : memref<4x16xbf16, #tpu.memory_space<vmem>>, vector<4x16xbf16>
    %cst = arith.constant dense<0.000000e+00> : vector<128x16xf32>
    %2 = tpu.matmul %0, %1, %cst {dimension_numbers = #tpu.dot_dimension_numbers<[1], [0], [0], [1], [0, 0, 1, 1], [], []>} : vector<128x4xbf16>, vector<4x16xbf16>, vector<128x16xf32> -> vector<128x16xf32>
    %cst_3 = arith.constant dense<0.000000e+00> : vector<16xf32>
    %3 = vector.multi_reduction <add>, %2, %cst_3 [0] : vector<128x16xf32> to vector<16xf32>
    %4 = vector.shape_cast %3 : vector<16xf32> to vector<1x1x16xf32>
    %c0_4 = arith.constant 0 : index
    %c0_5 = arith.constant 0 : index
    %c0_6 = arith.constant 0 : index
    %5 = vector.load %arg4[%c0_4, %c0_5, %c0_6] : memref<1x1x16xf32, #tpu.memory_space<vmem>>, vector<1x1x16xf32>
    tpu.vector_store %arg4[%c0_4, %c0_5, %c0_6], %4 {strides = array<i32>} : memref<1x1x16xf32, #tpu.memory_space<vmem>>, vector<1x1x16xf32>,
    %6 = arith.mulf %2, %2 : vector<128x16xf32>
    %cst_7 = arith.constant dense<0.000000e+00> : vector<16xf32>
    %7 = vector.multi_reduction <add>, %6, %cst_7 [0] : vector<128x16xf32> to vector<16xf32>
    %8 = vector.shape_cast %7 : vector<16xf32> to vector<1x1x16xf32>
    %c0_8 = arith.constant 0 : index
    %c0_9 = arith.constant 0 : index
    %c0_10 = arith.constant 0 : index
    %9 = vector.load %arg5[%c0_8, %c0_9, %c0_10] : memref<1x1x16xf32, #tpu.memory_space<vmem>>, vector<1x1x16xf32>
    tpu.vector_store %arg5[%c0_8, %c0_9, %c0_10], %8 {strides = array<i32>} : memref<1x1x16xf32, #tpu.memory_space<vmem>>, vector<1x1x16xf32>,
    %10 = arith.truncf %2 : vector<128x16xf32> to vector<128x16xbf16>
    %c0_11 = arith.constant 0 : index
    %c0_12 = arith.constant 0 : index
    %11 = vector.load %arg3[%c0_11, %c0_12] : memref<128x16xbf16, #tpu.memory_space<vmem>>, vector<128x16xbf16>
    tpu.vector_store %arg3[%c0_11, %c0_12], %10 {strides = array<i32>} : memref<128x16xbf16, #tpu.memory_space<vmem>>, vector<128x16xbf16>,
    return
  }
  func.func @transform_0(%arg0: i32) -> (i32, i32) {
    %c0_i32 = arith.constant 0 : i32
    %c0_i32_0 = arith.constant 0 : i32
    return %arg0, %c0_i32 : i32, i32
  }
  func.func @transform_1(%arg0: i32) -> (i32, i32) {
    %c0_i32 = arith.constant 0 : i32
    %c0_i32_0 = arith.constant 0 : i32
    %c0_i32_1 = arith.constant 0 : i32
    return %c0_i32, %c0_i32_0 : i32, i32
  }
  func.func @transform_2(%arg0: i32) -> (i32, i32) {
    %c0_i32 = arith.constant 0 : i32
    %c0_i32_0 = arith.constant 0 : i32
    return %arg0, %c0_i32 : i32, i32
  }
  func.func @transform_3(%arg0: i32) -> (i32, i32, i32) {
    %c0_i32 = arith.constant 0 : i32
    %c0_i32_0 = arith.constant 0 : i32
    %c0_i32_1 = arith.constant 0 : i32
    return %arg0, %c0_i32, %c0_i32_0 : i32, i32, i32
  }
  func.func @transform_4(%arg0: i32) -> (i32, i32, i32) {
    %c0_i32 = arith.constant 0 : i32
    %c0_i32_0 = arith.constant 0 : i32
    %c0_i32_1 = arith.constant 0 : i32
    return %arg0, %c0_i32, %c0_i32_0 : i32, i32, i32
  }
}

module attributes {stable_mosaic.version = 11 : i64} {
  func.func @_bn_add_relu_kernel(%arg0: i32, %arg1: memref<128x16xbf16, #tpu.memory_space<vmem>>, %arg2: memref<1x16xf32, #tpu.memory_space<vmem>>, %arg3: memref<1x16xf32, #tpu.memory_space<vmem>>, %arg4: memref<128x16xbf16, #tpu.memory_space<vmem>>, %arg5: memref<1x16xf32, #tpu.memory_space<vmem>>, %arg6: memref<1x16xf32, #tpu.memory_space<vmem>>, %arg7: memref<128x16xf32, #tpu.memory_space<vmem>>) attributes {dimension_semantics = [#tpu.dimension_semantics<parallel>], iteration_bounds = array<i64: 1>, scalar_prefetch = 0 : i64, scratch_operands = 0 : i64, tpu.core_type = #tpu.core_type<tc>, window_params = [{transform_indices = @transform_0, window_bounds = array<i64: 128, 16>}, {pipeline_mode = #tpu.pipeline_mode<synchronous>, transform_indices = @transform_1, window_bounds = array<i64: 1, 16>}, {pipeline_mode = #tpu.pipeline_mode<synchronous>, transform_indices = @transform_2, window_bounds = array<i64: 1, 16>}, {transform_indices = @transform_3, window_bounds = array<i64: 128, 16>}, {pipeline_mode = #tpu.pipeline_mode<synchronous>, transform_indices = @transform_4, window_bounds = array<i64: 1, 16>}, {pipeline_mode = #tpu.pipeline_mode<synchronous>, transform_indices = @transform_5, window_bounds = array<i64: 1, 16>}, {transform_indices = @transform_6, window_bounds = array<i64: 128, 16>}]} {
    %c0 = arith.constant 0 : index
    %c0_0 = arith.constant 0 : index
    %0 = vector.load %arg1[%c0, %c0_0] : memref<128x16xbf16, #tpu.memory_space<vmem>>, vector<128x16xbf16>
    %1 = arith.extf %0 : vector<128x16xbf16> to vector<128x16xf32>
    %c0_1 = arith.constant 0 : index
    %c0_2 = arith.constant 0 : index
    %2 = vector.load %arg2[%c0_1, %c0_2] : memref<1x16xf32, #tpu.memory_space<vmem>>, vector<1x16xf32>
    %3 = vector.broadcast %2 : vector<1x16xf32> to vector<128x16xf32>
    %4 = arith.mulf %1, %3 : vector<128x16xf32>
    %c0_3 = arith.constant 0 : index
    %c0_4 = arith.constant 0 : index
    %5 = vector.load %arg3[%c0_3, %c0_4] : memref<1x16xf32, #tpu.memory_space<vmem>>, vector<1x16xf32>
    %6 = vector.broadcast %5 : vector<1x16xf32> to vector<128x16xf32>
    %7 = arith.addf %4, %6 : vector<128x16xf32>
    %c0_5 = arith.constant 0 : index
    %c0_6 = arith.constant 0 : index
    %8 = vector.load %arg4[%c0_5, %c0_6] : memref<128x16xbf16, #tpu.memory_space<vmem>>, vector<128x16xbf16>
    %9 = arith.extf %8 : vector<128x16xbf16> to vector<128x16xf32>
    %c0_7 = arith.constant 0 : index
    %c0_8 = arith.constant 0 : index
    %10 = vector.load %arg5[%c0_7, %c0_8] : memref<1x16xf32, #tpu.memory_space<vmem>>, vector<1x16xf32>
    %11 = vector.broadcast %10 : vector<1x16xf32> to vector<128x16xf32>
    %12 = arith.mulf %9, %11 : vector<128x16xf32>
    %c0_9 = arith.constant 0 : index
    %c0_10 = arith.constant 0 : index
    %13 = vector.load %arg6[%c0_9, %c0_10] : memref<1x16xf32, #tpu.memory_space<vmem>>, vector<1x16xf32>
    %14 = vector.broadcast %13 : vector<1x16xf32> to vector<128x16xf32>
    %15 = arith.addf %12, %14 : vector<128x16xf32>
    %16 = arith.addf %7, %15 : vector<128x16xf32>
    %cst = arith.constant 0.000000e+00 : f32
    %17 = vector.broadcast %cst : f32 to vector<128x16xf32>
    %18 = arith.maximumf %16, %17 : vector<128x16xf32>
    %c0_11 = arith.constant 0 : index
    %c0_12 = arith.constant 0 : index
    %19 = vector.load %arg7[%c0_11, %c0_12] : memref<128x16xf32, #tpu.memory_space<vmem>>, vector<128x16xf32>
    tpu.vector_store %arg7[%c0_11, %c0_12], %18 {strides = array<i32>} : memref<128x16xf32, #tpu.memory_space<vmem>>, vector<128x16xf32>,
    return
  }
  func.func @transform_0(%arg0: i32) -> (i32, i32) {
    %c0_i32 = arith.constant 0 : i32
    %c0_i32_0 = arith.constant 0 : i32
    return %arg0, %c0_i32 : i32, i32
  }
  func.func @transform_1(%arg0: i32) -> (i32, i32) {
    %c0_i32 = arith.constant 0 : i32
    %c0_i32_0 = arith.constant 0 : i32
    %c0_i32_1 = arith.constant 0 : i32
    return %c0_i32, %c0_i32_0 : i32, i32
  }
  func.func @transform_2(%arg0: i32) -> (i32, i32) {
    %c0_i32 = arith.constant 0 : i32
    %c0_i32_0 = arith.constant 0 : i32
    %c0_i32_1 = arith.constant 0 : i32
    return %c0_i32, %c0_i32_0 : i32, i32
  }
  func.func @transform_3(%arg0: i32) -> (i32, i32) {
    %c0_i32 = arith.constant 0 : i32
    %c0_i32_0 = arith.constant 0 : i32
    return %arg0, %c0_i32 : i32, i32
  }
  func.func @transform_4(%arg0: i32) -> (i32, i32) {
    %c0_i32 = arith.constant 0 : i32
    %c0_i32_0 = arith.constant 0 : i32
    %c0_i32_1 = arith.constant 0 : i32
    return %c0_i32, %c0_i32_0 : i32, i32
  }
  func.func @transform_5(%arg0: i32) -> (i32, i32) {
    %c0_i32 = arith.constant 0 : i32
    %c0_i32_0 = arith.constant 0 : i32
    %c0_i32_1 = arith.constant 0 : i32
    return %c0_i32, %c0_i32_0 : i32, i32
  }
  func.func @transform_6(%arg0: i32) -> (i32, i32) {
    %c0_i32 = arith.constant 0 : i32
    %c0_i32_0 = arith.constant 0 : i32
    return %arg0, %c0_i32 : i32, i32
  }
}

</mosaic_0001>

<bundles_post_ra>
// kernel: bottleneck_forward.5
= control target key start
LH: loop header
LB: loop body
LE: loop exit
PB: predicated region body
PF: predicated region fallthrough
CT: control target
= control target key end

     0   :  { %s821_s15 = smov 0   ;;  %s954_s0 = inlined_call_operand.vmem [shape: bf16[512,4], index: 0, kind: input, shape index: {}]   ;;  %s955_s1 = inlined_call_operand.vmem [shape: bf16[4,4], index: 1, kind: input, shape index: {}]   ;;  %s956_s2 = inlined_call_operand.vmem [shape: bf16[512,4], index: 2, kind: output, shape index: {0}]   ;;  %s957_s3 = inlined_call_operand.vmem [shape: f32[4,1,4], index: 3, kind: output, shape index: {1}]   ;;  %s958_s4 = inlined_call_operand.vmem [shape: f32[4,1,4], index: 4, kind: output, shape index: {2}]  }
   0x1 LB: > { %s827_s16 = sadd.s32 4294967295, %s794_s15   ;;  %p686_p0 = scmp.ge.s32.totalorder %s794_s15, 1  ;;  %s794_s15 = sphi %s821_s15, %s15_s15  }
   0x2   : > { %p168_p1 = scmp.lt.s32.totalorder %s794_s15, 5 }
   0x4   : > { %p169_p2 = pnand %p686_p0, %p168_p1 }
   0x5   : > { %s687_s19 = sshll.u32 (!%p169_p2), %s827_s16, 4  ;;  %p212_p4 = scmp.lt.s32.totalorder (!%p169_p2), %s827_s16, 3 }
   0x6   : > { %172 = sbr.rel (%p169_p2) target bundleno = 261 (0x105), region = 28  ;;  %p201_p3 = scmp.lt.s32.totalorder (!%p169_p2), %s687_s19, 63 }
   0xb   : > { %v235_v0 = vld [vmem:[%s955_s1] sm:$0x3]  ;;  %vm301_vm0 = vcmask 1041408   ;;  %s960_s19 = smov (!%p201_p3, %s687_s19), 63  ;;  %vm276_vm1 = vcmask 31744   ;;  %vm559_vm2 = vcmask 27648  }
   0xc   : > { %770 = vmatprep.subr.msk.bf16.mxu0 %vm301_vm0, %v235_v0  ;;  %v303_v1 = vsel %vm301_vm0, %v235_v0, 0  ;;  %771 = vmatprep.subr.msk.bf16.mxu1 %vm301_vm0, %v235_v0  ;;  %s688_s20 = sshll.u32 %s960_s19, 2  ;;  %s962_s16 = smov (!%p212_p4, %s827_s16), 3  ;;  %vm439_vm3 = vcmask 24576  }
   0xd   : > { %751 = vmatpush3.bf16.msra.mxu0 %v303_v1  ;;  %769 = vmatpush3.bf16.msra.mxu1 %v303_v1  ;;  %s204_s23 = scalar_lea.vmem %s954_s0, %s688_s20  ;;  %s849_s26 = scalar_lea.vmem %s956_s2, %s688_s20 }
   0xe   : > { %v780_v2 = vld [vmem:[%s204_s23] sm:$0xff]   ;;  %v781_v3 = vld [vmem:[%s204_s23 + $0x8] sm:$0xff]   ;;  %v782_v4 = vld [vmem:[%s204_s23 + $0x10] sm:$0xff]   ;;  %s214_s29 = scalar_lea.vmem %s957_s3, %s962_s16  ;;  %s217_s6 = scalar_lea.vmem %s958_s4, %s962_s16 }
   0xf   : > { %752 = vmatprep.mubr.msk.bf16.mxu0 %vm276_vm1, %v780_v2  ;;  %v784_v5 = vld [vmem:[%s204_s23 + $0x20] sm:$0xff]   ;;  %v785_v6 = vld [vmem:[%s204_s23 + $0x28] sm:$0xff]   ;;  %v786_v7 = vld [vmem:[%s204_s23 + $0x30] sm:$0xff]  }
  0x10   : > { %753 = vmatmul.mubr.msk.bf16.vlgmr.msra.gmra.mxu0 %vm276_vm1, %v781_v3  ;;  %760 = vmatprep.mubr.msk.bf16.mxu1 %vm276_vm1, %v784_v5  ;;  %v783_v8 = vld [vmem:[%s204_s23 + $0x18] sm:$0xff]  }
  0x11   : > { %756 = vmatprep.mubr.msk.bf16.mxu0 %vm276_vm1, %v782_v4  ;;  %761 = vmatmul.mubr.msk.bf16.vlgmr.msra.gmra.mxu1 %vm276_vm1, %v785_v6  ;;  %v787_v9 = vld [vmem:[%s204_s23 + $0x38] sm:$0xff]  }
  0x12   : > { %764 = vmatprep.mubr.msk.bf16.mxu1 %vm276_vm1, %v786_v7 }
  0x18   : > { %757 = vmatmul.mubr.msk.bf16.gmra.mxu0 %vm276_vm1, %v783_v8 }
  0x19   : > { %765 = vmatmul.mubr.msk.bf16.gmra.mxu1 %vm276_vm1, %v787_v9 }
  0xd0   : > { %v754_v10 = vpop.f32.mrf.mxu0 }
  0xd1   : > { %v727_v11 = vpack.c.bf16 %v754_v10, %v754_v10  ;;  %v853_v15 = vpop.f32.mrf.mxu1  ;;  %v443_v18 = vmul.f32 %v754_v10, %v754_v10  ;;  %v405_v26 = vsel %vm276_vm1, %v754_v10, 0.0 }
  0xd2   : > { %v339_v12 = vpop.f32.mrf.mxu0  ;;  %v735_v20 = vpack.c.bf16 %v853_v15, %v853_v15 }
  0xd3   : > { %562 = vst.msk [vmem:[%s849_s26 + $0x8] sm:$0xf] %vm559_vm2, %v727_v11  ;;  %v725_v13 = vpack.c.bf16 %v339_v12, %v339_v12  ;;  %v441_v16 = vmul.f32 %v339_v12, %v339_v12  ;;  %v859_v21 = vpop.f32.mrf.mxu1  ;;  %v402_v22 = vsel %vm276_vm1, %v339_v12, 0.0  ;;  %v460_v39 = vsel %vm276_vm1, %v443_v18, 0.0 }
  0xd4   : > { %v755_v14 = vpop.f32.mrf.mxu0  ;;  %570 = vst.msk [vmem:[%s849_s26 + $0x28] sm:$0xf] %vm559_vm2, %v735_v20  ;;  %v733_v37 = vpack.c.bf16 %v859_v21, %v859_v21  ;;  %v449_v8 = vmul.f32 %v859_v21, %v859_v21 }
  0xd5   : > { %560 = vst.msk [vmem:[%s849_s26] sm:$0xf] %vm559_vm2, %v725_v13  ;;  %v728_v17 = vpack.c.bf16 %v755_v14, %v755_v14  ;;  %v868_v29 = vpop.f32.mrf.mxu1  ;;  %v457_v30 = vsel %vm276_vm1, %v441_v16, 0.0  ;;  %v444_v31 = vmul.f32 %v755_v14, %v755_v14  ;;  %v407_v40 = vsel %vm276_vm1, %v755_v14, 0.0 }
  0xd6   : > { %v342_v19 = vpop.f32.mrf.mxu0  ;;  %568 = vst.msk [vmem:[%s849_s26 + $0x20] sm:$0xf] %vm559_vm2, %v733_v37  ;;  %v736_v54 = vpack.c.bf16 %v868_v29, %v868_v29  ;;  %v417_v14 = vsel %vm276_vm1, %v859_v21, 0.0  ;;  %v421_v21 = vsel %vm276_vm1, %v853_v15, 0.0 }
  0xd7   : > { %563 = vst.msk [vmem:[%s849_s26 + $0xc] sm:$0xf] %vm559_vm2, %v728_v17  ;;  %v403_v23 = vsel %vm276_vm1, %v342_v19, 0.0  ;;  %v442_v24 = vmul.f32 %v342_v19, %v342_v19  ;;  %v726_v25 = vpack.c.bf16 %v342_v19, %v342_v19  ;;  %v374_v38 = vpop.f32.mrf.mxu1  ;;  %v462_v47 = vsel %vm276_vm1, %v444_v31, 0.0 }
  0xd8   : > { %v404_v27 = vadd.f32 %v403_v23, %v402_v22  ;;  %v758_v28 = vpop.f32.mrf.mxu0  ;;  %571 = vst.msk [vmem:[%s849_s26 + $0x2c] sm:$0xf] %vm559_vm2, %v736_v54  ;;  %v734_v2 = vpack.c.bf16 %v374_v38, %v374_v38  ;;  %v450_v16 = vmul.f32 %v374_v38, %v374_v38  ;;  %v451_v22 = vmul.f32 %v853_v15, %v853_v15 }
  0xd9   : > { %v458_v32 = vsel %vm276_vm1, %v442_v24, 0.0  ;;  %561 = vst.msk [vmem:[%s849_s26 + $0x4] sm:$0xf] %vm559_vm2, %v726_v25  ;;  %v731_v33 = vpack.c.bf16 %v758_v28, %v758_v28  ;;  %v882_v46 = vpop.f32.mrf.mxu1  ;;  %v447_v50 = vmul.f32 %v758_v28, %v758_v28  ;;  %v413_v63 = vsel %vm276_vm1, %v758_v28, 0.0 }
  0xda   : > { %v406_v34 = vadd.f32 %v405_v26, %v404_v27  ;;  %v459_v35 = vadd.f32 %v458_v32, %v457_v30  ;;  %v355_v36 = vpop.f32.mrf.mxu0  ;;  %v739_v5 = vpack.c.bf16 %v882_v46, %v882_v46  ;;  %569 = vst.msk [vmem:[%s849_s26 + $0x24] sm:$0xf] %vm559_vm2, %v734_v2  ;;  %v472_v23 = vsel %vm276_vm1, %v449_v8, 0.0 }
  0xdb   : > { %566 = vst.msk [vmem:[%s849_s26 + $0x18] sm:$0xf] %vm559_vm2, %v731_v33  ;;  %v445_v41 = vmul.f32 %v355_v36, %v355_v36  ;;  %v729_v42 = vpack.c.bf16 %v355_v36, %v355_v36  ;;  %v409_v48 = vsel %vm276_vm1, %v355_v36, 0.0  ;;  %v387_v55 = vpop.f32.mrf.mxu1  ;;  %v468_v6 = vsel %vm276_vm1, %v447_v50, 0.0 }
  0xdc   : > { %v461_v43 = vadd.f32 %v460_v39, %v459_v35  ;;  %v408_v44 = vadd.f32 %v407_v40, %v406_v34  ;;  %v759_v45 = vpop.f32.mrf.mxu0  ;;  %v737_v9 = vpack.c.bf16 %v387_v55, %v387_v55  ;;  %574 = vst.msk [vmem:[%s849_s26 + $0x38] sm:$0xf] %vm559_vm2, %v739_v5  ;;  %v419_v24 = vsel %vm276_vm1, %v374_v38, 0.0 }
  0xdd   : > { %564 = vst.msk [vmem:[%s849_s26 + $0x10] sm:$0xf] %vm559_vm2, %v729_v42  ;;  %v732_v49 = vpack.c.bf16 %v759_v45, %v759_v45  ;;  %v464_v56 = vsel %vm276_vm1, %v445_v41, 0.0  ;;  %v767_v62 = vpop.f32.mrf.mxu1  ;;  %v448_v0 = vmul.f32 %v759_v45, %v759_v45  ;;  %v415_v7 = vsel %vm276_vm1, %v759_v45, 0.0 }
  0xde   : > { %v410_v51 = vadd.f32 %v409_v48, %v408_v44  ;;  %v463_v52 = vadd.f32 %v462_v47, %v461_v43  ;;  %v358_v53 = vpop.f32.mrf.mxu0  ;;  %572 = vst.msk [vmem:[%s849_s26 + $0x30] sm:$0xf] %vm559_vm2, %v737_v9  ;;  %v740_v17 = vpack.c.bf16 %v767_v62, %v767_v62  ;;  %v452_v27 = vmul.f32 %v868_v29, %v868_v29 }
  0xdf   : > { %567 = vst.msk [vmem:[%s849_s26 + $0x1c] sm:$0xf] %vm559_vm2, %v732_v49  ;;  %v411_v57 = vsel %vm276_vm1, %v358_v53, 0.0  ;;  %v446_v58 = vmul.f32 %v358_v53, %v358_v53  ;;  %v730_v59 = vpack.c.bf16 %v358_v53, %v358_v53  ;;  %v390_v10 = vpop.f32.mrf.mxu1  ;;  %v470_v13 = vsel %vm276_vm1, %v448_v0, 0.0 }
  0xe0   : > { %v465_v60 = vadd.f32 %v464_v56, %v463_v52  ;;  %v412_v61 = vadd.f32 %v411_v57, %v410_v51  ;;  %v738_v20 = vpack.c.bf16 %v390_v10, %v390_v10  ;;  %575 = vst.msk [vmem:[%s849_s26 + $0x3c] sm:$0xf] %vm559_vm2, %v740_v17  ;;  %v474_v28 = vsel %vm276_vm1, %v450_v16, 0.0 }
  0xe1   : > { %v466_v1 = vsel %vm276_vm1, %v446_v58, 0.0  ;;  %565 = vst.msk [vmem:[%s849_s26 + $0x14] sm:$0xf] %vm559_vm2, %v730_v59  ;;  %v476_v32 = vsel %vm276_vm1, %v451_v22, 0.0  ;;  %v423_v33 = vsel %vm276_vm1, %v868_v29, 0.0  ;;  %v453_v34 = vmul.f32 %v387_v55, %v387_v55 }
  0xe2   : > { %v414_v3 = vadd.f32 %v413_v63, %v412_v61  ;;  %v467_v4 = vadd.f32 %v466_v1, %v465_v60  ;;  %573 = vst.msk [vmem:[%s849_s26 + $0x34] sm:$0xf] %vm559_vm2, %v738_v20  ;;  %v478_v37 = vsel %vm276_vm1, %v452_v27, 0.0  ;;  %v425_v38 = vsel %vm276_vm1, %v387_v55, 0.0 }
  0xe3   : > { %v454_v15 = vmul.f32 %v390_v10, %v390_v10  ;;  %v455_v41 = vmul.f32 %v882_v46, %v882_v46  ;;  %v480_v42 = vsel %vm276_vm1, %v453_v34, 0.0  ;;  %v427_v43 = vsel %vm276_vm1, %v390_v10, 0.0 }
  0xe4   : > { %v416_v11 = vadd.f32 %v415_v7, %v414_v3  ;;  %v469_v12 = vadd.f32 %v468_v6, %v467_v4  ;;  %v429_v45 = vsel %vm276_vm1, %v882_v46, 0.0  ;;  %v456_v47 = vmul.f32 %v767_v62, %v767_v62 }
  0xe5   : > { %v482_v48 = vsel %vm276_vm1, %v454_v15, 0.0  ;;  %v484_v51 = vsel %vm276_vm1, %v455_v41, 0.0  ;;  %v431_v52 = vsel %vm276_vm1, %v767_v62, 0.0 }
  0xe6   : > { %v471_v18 = vadd.f32 %v470_v13, %v469_v12  ;;  %v418_v19 = vadd.f32 %v417_v14, %v416_v11  ;;  %v486_v55 = vsel %vm276_vm1, %v456_v47, 0.0 }
  0xe8   : > { %v420_v25 = vadd.f32 %v419_v24, %v418_v19  ;;  %v473_v26 = vadd.f32 %v472_v23, %v471_v18 }
  0xea   : > { %v422_v30 = vadd.f32 %v421_v21, %v420_v25  ;;  %v475_v31 = vadd.f32 %v474_v28, %v473_v26 }
  0xec   : > { %v477_v35 = vadd.f32 %v476_v32, %v475_v31  ;;  %v424_v36 = vadd.f32 %v423_v33, %v422_v30 }
  0xee   : > { %v426_v39 = vadd.f32 %v425_v38, %v424_v36  ;;  %v479_v40 = vadd.f32 %v478_v37, %v477_v35 }
  0xf0   : > { %v481_v44 = vadd.f32 %v480_v42, %v479_v40  ;;  %v428_v29 = vadd.f32 %v427_v43, %v426_v39 }
  0xf2   : > { %v430_v49 = vadd.f32 %v429_v45, %v428_v29  ;;  %v483_v50 = vadd.f32 %v482_v48, %v481_v44 }
  0xf4   : > { %v432_v53 = vadd.f32 %v431_v52, %v430_v49  ;;  %v485_v54 = vadd.f32 %v484_v51, %v483_v50 }
  0xf6   : > { %v433_v56 = vrot.slane %v432_v53, 4  ;;  %v487_v57 = vadd.f32 %v486_v55, %v485_v54 }
  0xf8   : > { %v434_v58 = vadd.f32 %v433_v56, %v432_v53  ;;  %v488_v59 = vrot.slane %v487_v57, 4 }
  0xfa   : > { %v435_v46 = vrot.slane %v434_v58, 2  ;;  %v489_v60 = vadd.f32 %v488_v59, %v487_v57 }
  0xfc   : > { %v436_v61 = vadd.f32 %v435_v46, %v434_v58  ;;  %v490_v63 = vrot.slane %v489_v60, 2 }
  0xfe   : > { %v437_v0 = vrot.slane %v436_v61, 1  ;;  %v491_v1 = vadd.f32 %v490_v63, %v489_v60 }
 0x100   : > { %v438_v62 = vadd.f32 %v437_v0, %v436_v61  ;;  %v492_v2 = vrot.slane %v491_v1, 1 }
 0x102   : > { %440 = vst.msk [vmem:[%s214_s29] sm:$0x1] %vm439_vm3, %v438_v62  ;;  %v493_v3 = vadd.f32 %v492_v2, %v491_v1 }
 0x104   : > { %494 = vst.msk [vmem:[%s217_s6] sm:$0x1] %vm439_vm3, %v493_v3 }
 0x105 PF: > { %s15_s15 = sadd.s32 1, %s794_s15  }
 0x106   : > { %p12_p5 = scmp.ge.s32.totalorder %s15_s15, 6  }
 0x108   :  { %14 = sbr.rel (!%p12_p5) target bundleno = 1 (0x1), region = 82 }

// kernel: bottleneck_forward.7
= control target key start
LH: loop header
LB: loop body
LE: loop exit
PB: predicated region body
PF: predicated region fallthrough
CT: control target
= control target key end

     0   :  { %vm149_vm0 = vcmask 1041408   ;;  %vm124_vm1 = vcmask 31744   ;;  %vm408_vm2 = vcmask 125952   ;;  %vm250_vm3 = vcmask 130048   ;;  %s770_s3 = inlined_call_operand.vmem [shape: bf16[4,16], index: 3, kind: input, shape index: {}]   ;;  %s771_s0 = inlined_call_operand.vmem [shape: bf16[128,4], index: 0, kind: input, shape index: {}]   ;;  %s772_s1 = inlined_call_operand.vmem [shape: f32[1,4], index: 1, kind: input, shape index: {}]   ;;  %s773_s2 = inlined_call_operand.vmem [shape: f32[1,4], index: 2, kind: input, shape index: {}]   ;;  %s774_s4 = inlined_call_operand.vmem [shape: bf16[128,16], index: 4, kind: output, shape index: {0}]   ;;  %s775_s5 = inlined_call_operand.vmem [shape: f32[1,1,16], index: 5, kind: output, shape index: {1}]   ;;  %s776_s6 = inlined_call_operand.vmem [shape: f32[1,1,16], index: 6, kind: output, shape index: {2}]  }
   0x1   :  { %v123_v0 = vld [vmem:[%s770_s3] sm:$0x3]  ;;  %v511_v6 = vld [vmem:[%s771_s0 + $0x8] sm:$0xff]   ;;  %v512_v7 = vld [vmem:[%s771_s0 + $0x10] sm:$0xff]   ;;  %vm288_vm4 = vcmask 122880  }
   0x2   :  { %v480_v1 = vld [vmem:[%s771_s0] sm:$0xff]   ;;  %547 = vmatprep.subr.msk.bf16.mxu0 %vm149_vm0, %v123_v0  ;;  %v151_v3 = vsel %vm149_vm0, %v123_v0, 0  ;;  %548 = vmatprep.subr.msk.bf16.mxu1 %vm149_vm0, %v123_v0  ;;  %v485_v9 = vunpack.c.l.bf16 %v511_v6  ;;  %v486_v10 = vunpack.c.h.bf16 %v511_v6  ;;  %v489_v11 = vunpack.c.l.bf16 %v512_v7  ;;  %v513_v13 = vld [vmem:[%s771_s0 + $0x18] sm:$0xff]   ;;  %v515_v35 = vld [vmem:[%s771_s0 + $0x28] sm:$0xff]  }
   0x3   :  { %v593_v2 = vld [vmem:[%s772_s1] ss:$0 sm:$0xff]  ;;  %v481_v4 = vunpack.c.l.bf16 %v480_v1  ;;  %v482_v5 = vunpack.c.h.bf16 %v480_v1  ;;  %528 = vmatpush3.bf16.msra.mxu0 %v151_v3  ;;  %546 = vmatpush3.bf16.msra.mxu1 %v151_v3  ;;  %v490_v12 = vunpack.c.h.bf16 %v512_v7  ;;  %v493_v16 = vunpack.c.l.bf16 %v513_v13  ;;  %v516_v40 = vld [vmem:[%s771_s0 + $0x30] sm:$0xff]   ;;  %v517_v44 = vld [vmem:[%s771_s0 + $0x38] sm:$0xff]  }
   0x4   :  { %v604_v8 = vld [vmem:[%s773_s2] ss:$0 sm:$0xff]  ;;  %v494_v17 = vunpack.c.h.bf16 %v513_v13  ;;  %v62_v18 = vmul.f32 %v485_v9, %v593_v2  ;;  %v63_v19 = vmul.f32 %v486_v10, %v593_v2  ;;  %v64_v20 = vmul.f32 %v489_v11, %v593_v2 }
   0x5   :  { %v60_v14 = vmul.f32 %v481_v4, %v593_v2  ;;  %v61_v15 = vmul.f32 %v482_v5, %v593_v2  ;;  %v65_v21 = vmul.f32 %v490_v12, %v593_v2  ;;  %v66_v24 = vmul.f32 %v493_v16, %v593_v2  ;;  %v514_v30 = vld [vmem:[%s771_s0 + $0x20] sm:$0xff]  }
   0x6   :  { %v67_v25 = vmul.f32 %v494_v17, %v593_v2  ;;  %v85_v26 = vadd.f32 %v604_v8, %v62_v18  ;;  %v86_v27 = vadd.f32 %v604_v8, %v63_v19  ;;  %v87_v28 = vadd.f32 %v604_v8, %v64_v20 }
   0x7   :  { %v83_v22 = vadd.f32 %v604_v8, %v60_v14  ;;  %v84_v23 = vadd.f32 %v604_v8, %v61_v15  ;;  %v88_v29 = vadd.f32 %v604_v8, %v65_v21  ;;  %v89_v33 = vadd.f32 %v604_v8, %v66_v24 }
   0x8   :  { %v90_v34 = vadd.f32 %v604_v8, %v67_v25  ;;  %v101_v36 = vmax.f32 %v85_v26, 0.0  ;;  %v102_v37 = vmax.f32 %v86_v27, 0.0  ;;  %v103_v38 = vmax.f32 %v87_v28, 0.0 }
   0x9   :  { %v99_v31 = vmax.f32 %v83_v22, 0.0  ;;  %v100_v32 = vmax.f32 %v84_v23, 0.0  ;;  %v104_v39 = vmax.f32 %v88_v29, 0.0  ;;  %v105_v42 = vmax.f32 %v89_v33, 0.0 }
   0xa   :  { %v497_v43 = vunpack.c.l.bf16 %v514_v30  ;;  %v116_v45 = vpack.c.bf16 %v102_v37, %v101_v36  ;;  %v498_v47 = vunpack.c.h.bf16 %v514_v30  ;;  %v501_v48 = vunpack.c.l.bf16 %v515_v35 }
   0xb   :  { %v115_v41 = vpack.c.bf16 %v100_v32, %v99_v31  ;;  %v117_v46 = vpack.c.bf16 %v104_v39, %v103_v38  ;;  %v106_v49 = vmax.f32 %v90_v34, 0.0  ;;  %v502_v51 = vunpack.c.h.bf16 %v515_v35 }
   0xc   :  { %v68_v50 = vmul.f32 %v497_v43, %v593_v2  ;;  %v505_v52 = vunpack.c.l.bf16 %v516_v40  ;;  %v69_v53 = vmul.f32 %v498_v47, %v593_v2  ;;  %v70_v54 = vmul.f32 %v501_v48, %v593_v2 }
   0xd   :  { %529 = vmatprep.mubr.msk.bf16.mxu0 %vm124_vm1, %v115_v41  ;;  %v506_v55 = vunpack.c.h.bf16 %v516_v40  ;;  %v509_v56 = vunpack.c.l.bf16 %v517_v44  ;;  %v71_v58 = vmul.f32 %v502_v51, %v593_v2  ;;  %v510_v60 = vunpack.c.h.bf16 %v517_v44 }
   0xe   :  { %530 = vmatmul.mubr.msk.bf16.vlgmr.msra.gmra.mxu0 %vm124_vm1, %v116_v45  ;;  %v91_v57 = vadd.f32 %v604_v8, %v68_v50  ;;  %v72_v59 = vmul.f32 %v505_v52, %v593_v2  ;;  %v92_v61 = vadd.f32 %v604_v8, %v69_v53  ;;  %v93_v62 = vadd.f32 %v604_v8, %v70_v54 }
   0xf   :  { %533 = vmatprep.mubr.msk.bf16.mxu0 %vm124_vm1, %v117_v46  ;;  %v73_v63 = vmul.f32 %v506_v55, %v593_v2  ;;  %v74_v0 = vmul.f32 %v509_v56, %v593_v2  ;;  %v94_v3 = vadd.f32 %v604_v8, %v71_v58  ;;  %v75_v5 = vmul.f32 %v510_v60, %v593_v2 }
  0x10   :  { %v107_v1 = vmax.f32 %v91_v57, 0.0  ;;  %v95_v4 = vadd.f32 %v604_v8, %v72_v59  ;;  %v118_v6 = vpack.c.bf16 %v106_v49, %v105_v42  ;;  %v108_v7 = vmax.f32 %v92_v61, 0.0 }
  0x11   :  { %v109_v9 = vmax.f32 %v93_v62, 0.0  ;;  %v96_v10 = vadd.f32 %v604_v8, %v73_v63  ;;  %v110_v11 = vmax.f32 %v94_v3, 0.0  ;;  %v97_v13 = vadd.f32 %v604_v8, %v74_v0 }
  0x12   :  { %v111_v12 = vmax.f32 %v95_v4, 0.0  ;;  %v98_v14 = vadd.f32 %v604_v8, %v75_v5  ;;  %v119_v15 = vpack.c.bf16 %v108_v7, %v107_v1 }
  0x13   :  { %v112_v16 = vmax.f32 %v96_v10, 0.0  ;;  %v120_v17 = vpack.c.bf16 %v110_v11, %v109_v9  ;;  %v113_v2 = vmax.f32 %v97_v13, 0.0 }
  0x14   :  { %537 = vmatprep.mubr.msk.bf16.mxu1 %vm124_vm1, %v119_v15  ;;  %v114_v19 = vmax.f32 %v98_v14, 0.0 }
  0x15   :  { %v121_v18 = vpack.c.bf16 %v112_v16, %v111_v12  ;;  %538 = vmatmul.mubr.msk.bf16.vlgmr.msra.gmra.mxu1 %vm124_vm1, %v120_v17 }
  0x16   :  { %534 = vmatmul.mubr.msk.bf16.gmra.mxu0 %vm124_vm1, %v118_v6  ;;  %v122_v20 = vpack.c.bf16 %v114_v19, %v113_v2 }
  0x17   :  { %541 = vmatprep.mubr.msk.bf16.mxu1 %vm124_vm1, %v121_v18 }
  0x1d   :  { %542 = vmatmul.mubr.msk.bf16.gmra.mxu1 %vm124_vm1, %v122_v20 }
  0xce   :  { %v531_v21 = vpop.f32.mrf.mxu0 }
  0xcf   :  { %v465_v8 = vpack.c.bf16 %v531_v21, %v531_v21  ;;  %v292_v27 = vmul.f32 %v531_v21, %v531_v21  ;;  %v254_v33 = vsel %vm250_vm3, %v531_v21, 0.0 }
  0xd0   :  { %v187_v22 = vpop.f32.mrf.mxu0 }
  0xd1   :  { %411 = vst.msk [vmem:[%s774_s4 + $0x8] sm:$0xf] %vm408_vm2, %v465_v8  ;;  %v463_v23 = vpack.c.bf16 %v187_v22, %v187_v22  ;;  %v290_v25 = vmul.f32 %v187_v22, %v187_v22  ;;  %v251_v29 = vsel %vm250_vm3, %v187_v22, 0.0  ;;  %v309_v44 = vsel %vm250_vm3, %v292_v27, 0.0 }
  0xd2   :  { %v532_v24 = vpop.f32.mrf.mxu0 }
  0xd3   :  { %409 = vst.msk [vmem:[%s774_s4] sm:$0xf] %vm408_vm2, %v463_v23  ;;  %v466_v26 = vpack.c.bf16 %v532_v24, %v532_v24  ;;  %v306_v36 = vsel %vm250_vm3, %v290_v25, 0.0  ;;  %v293_v37 = vmul.f32 %v532_v24, %v532_v24  ;;  %v256_v45 = vsel %vm250_vm3, %v532_v24, 0.0 }
  0xd4   :  { %v190_v28 = vpop.f32.mrf.mxu0 }
  0xd5   :  { %412 = vst.msk [vmem:[%s774_s4 + $0xc] sm:$0xf] %vm408_vm2, %v466_v26  ;;  %v252_v30 = vsel %vm250_vm3, %v190_v28, 0.0  ;;  %v291_v31 = vmul.f32 %v190_v28, %v190_v28  ;;  %v464_v32 = vpack.c.bf16 %v190_v28, %v190_v28  ;;  %v682_v40 = vpop.f32.mrf.mxu1  ;;  %v311_v53 = vsel %vm250_vm3, %v293_v37, 0.0 }
  0xd6   :  { %v253_v34 = vadd.f32 %v252_v30, %v251_v29  ;;  %v535_v35 = vpop.f32.mrf.mxu0  ;;  %v473_v51 = vpack.c.bf16 %v682_v40, %v682_v40  ;;  %v300_v27 = vmul.f32 %v682_v40, %v682_v40 }
  0xd7   :  { %v307_v38 = vsel %vm250_vm3, %v291_v31, 0.0  ;;  %410 = vst.msk [vmem:[%s774_s4 + $0x4] sm:$0xf] %vm408_vm2, %v464_v32  ;;  %v469_v39 = vpack.c.bf16 %v535_v35, %v535_v35  ;;  %v219_v48 = vpop.f32.mrf.mxu1  ;;  %v296_v57 = vmul.f32 %v535_v35, %v535_v35  ;;  %v262_v6 = vsel %vm250_vm3, %v535_v35, 0.0 }
  0xd8   :  { %v255_v41 = vadd.f32 %v254_v33, %v253_v34  ;;  %v308_v42 = vadd.f32 %v307_v38, %v306_v36  ;;  %v203_v43 = vpop.f32.mrf.mxu0  ;;  %419 = vst.msk [vmem:[%s774_s4 + $0x28] sm:$0xf] %vm408_vm2, %v473_v51  ;;  %v471_v62 = vpack.c.bf16 %v219_v48, %v219_v48  ;;  %v298_v16 = vmul.f32 %v219_v48, %v219_v48 }
  0xd9   :  { %415 = vst.msk [vmem:[%s774_s4 + $0x18] sm:$0xf] %vm408_vm2, %v469_v39  ;;  %v294_v46 = vmul.f32 %v203_v43, %v203_v43  ;;  %v467_v47 = vpack.c.bf16 %v203_v43, %v203_v43  ;;  %v258_v54 = vsel %vm250_vm3, %v203_v43, 0.0  ;;  %v540_v56 = vpop.f32.mrf.mxu1  ;;  %v317_v14 = vsel %vm250_vm3, %v296_v57, 0.0 }
  0xda   :  { %v310_v49 = vadd.f32 %v309_v44, %v308_v42  ;;  %v257_v50 = vadd.f32 %v256_v45, %v255_v41  ;;  %v536_v52 = vpop.f32.mrf.mxu0  ;;  %417 = vst.msk [vmem:[%s774_s4 + $0x20] sm:$0xf] %vm408_vm2, %v471_v62  ;;  %v474_v10 = vpack.c.bf16 %v540_v56, %v540_v56  ;;  %v266_v8 = vsel %vm250_vm3, %v219_v48, 0.0 }
  0xdb   :  { %413 = vst.msk [vmem:[%s774_s4 + $0x10] sm:$0xf] %vm408_vm2, %v467_v47  ;;  %v470_v55 = vpack.c.bf16 %v536_v52, %v536_v52  ;;  %v313_v61 = vsel %vm250_vm3, %v294_v46, 0.0  ;;  %v222_v1 = vpop.f32.mrf.mxu1  ;;  %v297_v7 = vmul.f32 %v536_v52, %v536_v52  ;;  %v264_v15 = vsel %vm250_vm3, %v536_v52, 0.0 }
  0xdc   :  { %v259_v58 = vadd.f32 %v258_v54, %v257_v50  ;;  %v312_v59 = vadd.f32 %v311_v53, %v310_v49  ;;  %v206_v60 = vpop.f32.mrf.mxu0  ;;  %420 = vst.msk [vmem:[%s774_s4 + $0x2c] sm:$0xf] %vm408_vm2, %v474_v10  ;;  %v472_v17 = vpack.c.bf16 %v222_v1, %v222_v1  ;;  %v299_v22 = vmul.f32 %v222_v1, %v222_v1 }
  0xdd   :  { %416 = vst.msk [vmem:[%s774_s4 + $0x1c] sm:$0xf] %vm408_vm2, %v470_v55  ;;  %v260_v63 = vsel %vm250_vm3, %v206_v60, 0.0  ;;  %v295_v0 = vmul.f32 %v206_v60, %v206_v60  ;;  %v468_v5 = vpack.c.bf16 %v206_v60, %v206_v60  ;;  %v543_v11 = vpop.f32.mrf.mxu1  ;;  %v319_v21 = vsel %vm250_vm3, %v297_v7, 0.0 }
  0xde   :  { %v314_v3 = vadd.f32 %v313_v61, %v312_v59  ;;  %v261_v4 = vadd.f32 %v260_v63, %v259_v58  ;;  %v477_v20 = vpack.c.bf16 %v543_v11, %v543_v11  ;;  %418 = vst.msk [vmem:[%s774_s4 + $0x24] sm:$0xf] %vm408_vm2, %v472_v17  ;;  %v321_v28 = vsel %vm250_vm3, %v298_v16, 0.0 }
  0xdf   :  { %v315_v9 = vsel %vm250_vm3, %v295_v0, 0.0  ;;  %414 = vst.msk [vmem:[%s774_s4 + $0x14] sm:$0xf] %vm408_vm2, %v468_v5  ;;  %v235_v18 = vpop.f32.mrf.mxu1  ;;  %v268_v29 = vsel %vm250_vm3, %v222_v1, 0.0  ;;  %v270_v34 = vsel %vm250_vm3, %v682_v40, 0.0  ;;  %v301_v35 = vmul.f32 %v540_v56, %v540_v56 }
  0xe0   :  { %v263_v12 = vadd.f32 %v262_v6, %v261_v4  ;;  %v316_v13 = vadd.f32 %v315_v9, %v314_v3  ;;  %v475_v23 = vpack.c.bf16 %v235_v18, %v235_v18  ;;  %423 = vst.msk [vmem:[%s774_s4 + $0x38] sm:$0xf] %vm408_vm2, %v477_v20  ;;  %v323_v36 = vsel %vm250_vm3, %v299_v22, 0.0 }
  0xe1   :  { %v544_v24 = vpop.f32.mrf.mxu1  ;;  %v325_v41 = vsel %vm250_vm3, %v300_v27, 0.0  ;;  %v272_v42 = vsel %vm250_vm3, %v540_v56, 0.0  ;;  %v302_v43 = vmul.f32 %v235_v18, %v235_v18  ;;  %v327_v45 = vsel %vm250_vm3, %v301_v35, 0.0 }
  0xe2   :  { %v265_v2 = vadd.f32 %v264_v15, %v263_v12  ;;  %v318_v19 = vadd.f32 %v317_v14, %v316_v13  ;;  %421 = vst.msk [vmem:[%s774_s4 + $0x30] sm:$0xf] %vm408_vm2, %v475_v23  ;;  %v478_v30 = vpack.c.bf16 %v544_v24, %v544_v24  ;;  %v274_v46 = vsel %vm250_vm3, %v235_v18, 0.0 }
  0xe3   :  { %v238_v31 = vpop.f32.mrf.mxu1  ;;  %v304_v50 = vmul.f32 %v543_v11, %v543_v11  ;;  %v329_v51 = vsel %vm250_vm3, %v302_v43, 0.0  ;;  %v278_v55 = vsel %vm250_vm3, %v543_v11, 0.0  ;;  %v305_v56 = vmul.f32 %v544_v24, %v544_v24 }
  0xe4   :  { %v320_v25 = vadd.f32 %v319_v21, %v318_v19  ;;  %v267_v26 = vadd.f32 %v266_v8, %v265_v2  ;;  %424 = vst.msk [vmem:[%s774_s4 + $0x3c] sm:$0xf] %vm408_vm2, %v478_v30  ;;  %v476_v37 = vpack.c.bf16 %v238_v31, %v238_v31  ;;  %v303_v47 = vmul.f32 %v238_v31, %v238_v31 }
  0xe5   :  { %v276_v52 = vsel %vm250_vm3, %v238_v31, 0.0  ;;  %v333_v60 = vsel %vm250_vm3, %v304_v50, 0.0  ;;  %v280_v61 = vsel %vm250_vm3, %v544_v24, 0.0  ;;  %v335_v0 = vsel %vm250_vm3, %v305_v56, 0.0 }
  0xe6   :  { %v269_v32 = vadd.f32 %v268_v29, %v267_v26  ;;  %v322_v33 = vadd.f32 %v321_v28, %v320_v25  ;;  %422 = vst.msk [vmem:[%s774_s4 + $0x34] sm:$0xf] %vm408_vm2, %v476_v37  ;;  %v331_v57 = vsel %vm250_vm3, %v303_v47, 0.0 }
  0xe8   :  { %v271_v38 = vadd.f32 %v270_v34, %v269_v32  ;;  %v324_v39 = vadd.f32 %v323_v36, %v322_v33 }
  0xea   :  { %v326_v40 = vadd.f32 %v325_v41, %v324_v39  ;;  %v273_v44 = vadd.f32 %v272_v42, %v271_v38 }
  0xec   :  { %v275_v48 = vadd.f32 %v274_v46, %v273_v44  ;;  %v328_v49 = vadd.f32 %v327_v45, %v326_v40 }
  0xee   :  { %v330_v53 = vadd.f32 %v329_v51, %v328_v49  ;;  %v277_v54 = vadd.f32 %v276_v52, %v275_v48 }
  0xf0   :  { %v279_v58 = vadd.f32 %v278_v55, %v277_v54  ;;  %v332_v59 = vadd.f32 %v331_v57, %v330_v53 }
  0xf2   :  { %v281_v62 = vadd.f32 %v280_v61, %v279_v58  ;;  %v334_v63 = vadd.f32 %v333_v60, %v332_v59 }
  0xf4   :  { %v282_v1 = vrot.slane %v281_v62, 4  ;;  %v336_v3 = vadd.f32 %v335_v0, %v334_v63 }
  0xf6   :  { %v283_v4 = vadd.f32 %v282_v1, %v281_v62  ;;  %v337_v5 = vrot.slane %v336_v3, 4 }
  0xf8   :  { %v284_v6 = vrot.slane %v283_v4, 2  ;;  %v338_v7 = vadd.f32 %v337_v5, %v336_v3 }
  0xfa   :  { %v285_v9 = vadd.f32 %v284_v6, %v283_v4  ;;  %v339_v10 = vrot.slane %v338_v7, 2 }
  0xfc   :  { %v286_v11 = vrot.slane %v285_v9, 1  ;;  %v340_v12 = vadd.f32 %v339_v10, %v338_v7 }
  0xfe   :  { %v287_v13 = vadd.f32 %v286_v11, %v285_v9  ;;  %v341_v14 = vrot.slane %v340_v12, 1 }
 0x100   :  { %289 = vst.msk [vmem:[%s775_s5] sm:$0x1] %vm288_vm4, %v287_v13  ;;  %v342_v15 = vadd.f32 %v341_v14, %v340_v12 }
 0x102   :  { %343 = vst.msk [vmem:[%s776_s6] sm:$0x1] %vm288_vm4, %v342_v15 }

// kernel: bottleneck_forward.8
= control target key start
LH: loop header
LB: loop body
LE: loop exit
PB: predicated region body
PF: predicated region fallthrough
CT: control target
= control target key end

     0   :  { %vm97_vm0 = vcmask 1041408   ;;  %vm72_vm1 = vcmask 31744   ;;  %vm356_vm2 = vcmask 125952   ;;  %vm198_vm3 = vcmask 130048   ;;  %s662_s1 = inlined_call_operand.vmem [shape: bf16[4,16], index: 1, kind: input, shape index: {}]   ;;  %s663_s0 = inlined_call_operand.vmem [shape: bf16[128,4], index: 0, kind: input, shape index: {}]   ;;  %s664_s2 = inlined_call_operand.vmem [shape: bf16[128,16], index: 2, kind: output, shape index: {0}]   ;;  %s665_s3 = inlined_call_operand.vmem [shape: f32[1,1,16], index: 3, kind: output, shape index: {1}]   ;;  %s666_s4 = inlined_call_operand.vmem [shape: f32[1,1,16], index: 4, kind: output, shape index: {2}]  }
   0x1   :  { %v31_v0 = vld [vmem:[%s662_s1] sm:$0x3]  ;;  %v465_v3 = vld [vmem:[%s663_s0 + $0x8] sm:$0xff]   ;;  %v466_v4 = vld [vmem:[%s663_s0 + $0x10] sm:$0xff]   ;;  %vm236_vm4 = vcmask 122880  }
   0x2   :  { %462 = vmatprep.subr.msk.bf16.mxu0 %vm97_vm0, %v31_v0  ;;  %v99_v1 = vsel %vm97_vm0, %v31_v0, 0  ;;  %v464_v2 = vld [vmem:[%s663_s0] sm:$0xff]   ;;  %463 = vmatprep.subr.msk.bf16.mxu1 %vm97_vm0, %v31_v0  ;;  %v469_v6 = vld [vmem:[%s663_s0 + $0x28] sm:$0xff]   ;;  %v470_v7 = vld [vmem:[%s663_s0 + $0x30] sm:$0xff]  }
   0x3   :  { %443 = vmatpush3.bf16.msra.mxu0 %v99_v1  ;;  %461 = vmatpush3.bf16.msra.mxu1 %v99_v1  ;;  %v468_v5 = vld [vmem:[%s663_s0 + $0x20] sm:$0xff]   ;;  %v467_v8 = vld [vmem:[%s663_s0 + $0x18] sm:$0xff]  }
   0x4   :  { %444 = vmatprep.mubr.msk.bf16.mxu0 %vm72_vm1, %v464_v2  ;;  %452 = vmatprep.mubr.msk.bf16.mxu1 %vm72_vm1, %v468_v5  ;;  %v471_v9 = vld [vmem:[%s663_s0 + $0x38] sm:$0xff]  }
   0x6   :  { %445 = vmatmul.mubr.msk.bf16.vlgmr.msra.gmra.mxu0 %vm72_vm1, %v465_v3  ;;  %453 = vmatmul.mubr.msk.bf16.vlgmr.msra.gmra.mxu1 %vm72_vm1, %v469_v6 }
   0x7   :  { %448 = vmatprep.mubr.msk.bf16.mxu0 %vm72_vm1, %v466_v4  ;;  %456 = vmatprep.mubr.msk.bf16.mxu1 %vm72_vm1, %v470_v7 }
   0xe   :  { %449 = vmatmul.mubr.msk.bf16.gmra.mxu0 %vm72_vm1, %v467_v8  ;;  %457 = vmatmul.mubr.msk.bf16.gmra.mxu1 %vm72_vm1, %v471_v9 }
  0xc6   :  { %v446_v10 = vpop.f32.mrf.mxu0  ;;  %v536_v14 = vpop.f32.mrf.mxu1 }
  0xc7   :  { %v419_v11 = vpack.c.bf16 %v446_v10, %v446_v10  ;;  %v427_v16 = vpack.c.bf16 %v536_v14, %v536_v14  ;;  %v240_v20 = vmul.f32 %v446_v10, %v446_v10  ;;  %v202_v28 = vsel %vm198_vm3, %v446_v10, 0.0 }
  0xc8   :  { %v135_v12 = vpop.f32.mrf.mxu0  ;;  %v544_v19 = vpop.f32.mrf.mxu1 }
  0xc9   :  { %359 = vst.msk [vmem:[%s664_s2 + $0x8] sm:$0xf] %vm356_vm2, %v419_v11  ;;  %v417_v13 = vpack.c.bf16 %v135_v12, %v135_v12  ;;  %v238_v17 = vmul.f32 %v135_v12, %v135_v12  ;;  %367 = vst.msk [vmem:[%s664_s2 + $0x28] sm:$0xf] %vm356_vm2, %v427_v16  ;;  %v425_v22 = vpack.c.bf16 %v544_v19, %v544_v19  ;;  %v199_v23 = vsel %vm198_vm3, %v135_v12, 0.0 }
  0xca   :  { %v447_v15 = vpop.f32.mrf.mxu0  ;;  %v558_v27 = vpop.f32.mrf.mxu1  ;;  %v257_v40 = vsel %vm198_vm3, %v240_v20, 0.0  ;;  %v246_v10 = vmul.f32 %v544_v19, %v544_v19  ;;  %v214_v16 = vsel %vm198_vm3, %v544_v19, 0.0 }
  0xcb   :  { %357 = vst.msk [vmem:[%s664_s2] sm:$0xf] %vm356_vm2, %v417_v13  ;;  %v420_v18 = vpack.c.bf16 %v447_v15, %v447_v15  ;;  %365 = vst.msk [vmem:[%s664_s2 + $0x20] sm:$0xf] %vm356_vm2, %v425_v22  ;;  %v254_v31 = vsel %vm198_vm3, %v238_v17, 0.0  ;;  %v241_v32 = vmul.f32 %v447_v15, %v447_v15  ;;  %v428_v39 = vpack.c.bf16 %v558_v27, %v558_v27 }
  0xcc   :  { %v138_v21 = vpop.f32.mrf.mxu0  ;;  %v170_v35 = vpop.f32.mrf.mxu1  ;;  %v204_v41 = vsel %vm198_vm3, %v447_v15, 0.0  ;;  %v248_v22 = vmul.f32 %v536_v14, %v536_v14 }
  0xcd   :  { %360 = vst.msk [vmem:[%s664_s2 + $0xc] sm:$0xf] %vm356_vm2, %v420_v18  ;;  %v200_v24 = vsel %vm198_vm3, %v138_v21, 0.0  ;;  %v239_v25 = vmul.f32 %v138_v21, %v138_v21  ;;  %v418_v26 = vpack.c.bf16 %v138_v21, %v138_v21  ;;  %368 = vst.msk [vmem:[%s664_s2 + $0x2c] sm:$0xf] %vm356_vm2, %v428_v39  ;;  %v259_v48 = vsel %vm198_vm3, %v241_v32, 0.0 }
  0xce   :  { %v201_v29 = vadd.f32 %v200_v24, %v199_v23  ;;  %v450_v30 = vpop.f32.mrf.mxu0  ;;  %v579_v44 = vpop.f32.mrf.mxu1  ;;  %v426_v56 = vpack.c.bf16 %v170_v35, %v170_v35  ;;  %v247_v17 = vmul.f32 %v170_v35, %v170_v35  ;;  %v269_v23 = vsel %vm198_vm3, %v246_v10, 0.0 }
  0xcf   :  { %v255_v33 = vsel %vm198_vm3, %v239_v25, 0.0  ;;  %358 = vst.msk [vmem:[%s664_s2 + $0x4] sm:$0xf] %vm356_vm2, %v418_v26  ;;  %v423_v34 = vpack.c.bf16 %v450_v30, %v450_v30  ;;  %v244_v52 = vmul.f32 %v450_v30, %v450_v30  ;;  %v210_v0 = vsel %vm198_vm3, %v450_v30, 0.0 }
  0xd0   :  { %v203_v36 = vadd.f32 %v202_v28, %v201_v29  ;;  %v256_v37 = vadd.f32 %v255_v33, %v254_v31  ;;  %v151_v38 = vpop.f32.mrf.mxu0  ;;  %v183_v51 = vpop.f32.mrf.mxu1  ;;  %366 = vst.msk [vmem:[%s664_s2 + $0x24] sm:$0xf] %vm356_vm2, %v426_v56  ;;  %v431_v3 = vpack.c.bf16 %v579_v44, %v579_v44  ;;  %v216_v24 = vsel %vm198_vm3, %v170_v35, 0.0 }
  0xd1   :  { %363 = vst.msk [vmem:[%s664_s2 + $0x18] sm:$0xf] %vm356_vm2, %v423_v34  ;;  %v242_v42 = vmul.f32 %v151_v38, %v151_v38  ;;  %v421_v43 = vpack.c.bf16 %v151_v38, %v151_v38  ;;  %v206_v49 = vsel %vm198_vm3, %v151_v38, 0.0  ;;  %v429_v6 = vpack.c.bf16 %v183_v51, %v183_v51 }
  0xd2   :  { %v258_v45 = vadd.f32 %v257_v40, %v256_v37  ;;  %v205_v46 = vadd.f32 %v204_v41, %v203_v36  ;;  %v451_v47 = vpop.f32.mrf.mxu0  ;;  %v459_v61 = vpop.f32.mrf.mxu1  ;;  %v265_v8 = vsel %vm198_vm3, %v244_v52, 0.0  ;;  %371 = vst.msk [vmem:[%s664_s2 + $0x38] sm:$0xf] %vm356_vm2, %v431_v3  ;;  %v218_v26 = vsel %vm198_vm3, %v536_v14, 0.0 }
  0xd3   :  { %361 = vst.msk [vmem:[%s664_s2 + $0x10] sm:$0xf] %vm356_vm2, %v421_v43  ;;  %v424_v50 = vpack.c.bf16 %v451_v47, %v451_v47  ;;  %v261_v57 = vsel %vm198_vm3, %v242_v42, 0.0  ;;  %v245_v1 = vmul.f32 %v451_v47, %v451_v47  ;;  %v212_v9 = vsel %vm198_vm3, %v451_v47, 0.0  ;;  %369 = vst.msk [vmem:[%s664_s2 + $0x30] sm:$0xf] %vm356_vm2, %v429_v6 }
  0xd4   :  { %v207_v53 = vadd.f32 %v206_v49, %v205_v46  ;;  %v260_v54 = vadd.f32 %v259_v48, %v258_v45  ;;  %v154_v55 = vpop.f32.mrf.mxu0  ;;  %v186_v7 = vpop.f32.mrf.mxu1  ;;  %v432_v11 = vpack.c.bf16 %v459_v61, %v459_v61  ;;  %v249_v28 = vmul.f32 %v558_v27, %v558_v27 }
  0xd5   :  { %364 = vst.msk [vmem:[%s664_s2 + $0x1c] sm:$0xf] %vm356_vm2, %v424_v50  ;;  %v208_v58 = vsel %vm198_vm3, %v154_v55, 0.0  ;;  %v243_v59 = vmul.f32 %v154_v55, %v154_v55  ;;  %v422_v60 = vpack.c.bf16 %v154_v55, %v154_v55  ;;  %v267_v15 = vsel %vm198_vm3, %v245_v1, 0.0 }
  0xd6   :  { %v262_v62 = vadd.f32 %v261_v57, %v260_v54  ;;  %v209_v63 = vadd.f32 %v208_v58, %v207_v53  ;;  %372 = vst.msk [vmem:[%s664_s2 + $0x3c] sm:$0xf] %vm356_vm2, %v432_v11  ;;  %v430_v18 = vpack.c.bf16 %v186_v7, %v186_v7  ;;  %v271_v29 = vsel %vm198_vm3, %v247_v17, 0.0 }
  0xd7   :  { %v263_v2 = vsel %vm198_vm3, %v243_v59, 0.0  ;;  %362 = vst.msk [vmem:[%s664_s2 + $0x14] sm:$0xf] %vm356_vm2, %v422_v60  ;;  %v273_v32 = vsel %vm198_vm3, %v248_v22, 0.0  ;;  %v220_v33 = vsel %vm198_vm3, %v558_v27, 0.0  ;;  %v250_v34 = vmul.f32 %v183_v51, %v183_v51 }
  0xd8   :  { %v211_v4 = vadd.f32 %v210_v0, %v209_v63  ;;  %v264_v5 = vadd.f32 %v263_v2, %v262_v62  ;;  %370 = vst.msk [vmem:[%s664_s2 + $0x34] sm:$0xf] %vm356_vm2, %v430_v18  ;;  %v275_v37 = vsel %vm198_vm3, %v249_v28, 0.0  ;;  %v222_v38 = vsel %vm198_vm3, %v183_v51, 0.0 }
  0xd9   :  { %v251_v14 = vmul.f32 %v186_v7, %v186_v7  ;;  %v252_v41 = vmul.f32 %v579_v44, %v579_v44  ;;  %v277_v42 = vsel %vm198_vm3, %v250_v34, 0.0  ;;  %v224_v43 = vsel %vm198_vm3, %v186_v7, 0.0 }
  0xda   :  { %v213_v12 = vadd.f32 %v212_v9, %v211_v4  ;;  %v266_v13 = vadd.f32 %v265_v8, %v264_v5  ;;  %v226_v27 = vsel %vm198_vm3, %v579_v44, 0.0  ;;  %v253_v47 = vmul.f32 %v459_v61, %v459_v61 }
  0xdb   :  { %v279_v48 = vsel %vm198_vm3, %v251_v14, 0.0  ;;  %v281_v51 = vsel %vm198_vm3, %v252_v41, 0.0  ;;  %v228_v52 = vsel %vm198_vm3, %v459_v61, 0.0 }
  0xdc   :  { %v268_v20 = vadd.f32 %v267_v15, %v266_v13  ;;  %v215_v21 = vadd.f32 %v214_v16, %v213_v12  ;;  %v283_v55 = vsel %vm198_vm3, %v253_v47, 0.0 }
  0xde   :  { %v217_v19 = vadd.f32 %v216_v24, %v215_v21  ;;  %v270_v25 = vadd.f32 %v269_v23, %v268_v20 }
  0xe0   :  { %v219_v30 = vadd.f32 %v218_v26, %v217_v19  ;;  %v272_v31 = vadd.f32 %v271_v29, %v270_v25 }
  0xe2   :  { %v274_v35 = vadd.f32 %v273_v32, %v272_v31  ;;  %v221_v36 = vadd.f32 %v220_v33, %v219_v30 }
  0xe4   :  { %v223_v39 = vadd.f32 %v222_v38, %v221_v36  ;;  %v276_v40 = vadd.f32 %v275_v37, %v274_v35 }
  0xe6   :  { %v278_v45 = vadd.f32 %v277_v42, %v276_v40  ;;  %v225_v46 = vadd.f32 %v224_v43, %v223_v39 }
  0xe8   :  { %v227_v49 = vadd.f32 %v226_v27, %v225_v46  ;;  %v280_v50 = vadd.f32 %v279_v48, %v278_v45 }
  0xea   :  { %v229_v53 = vadd.f32 %v228_v52, %v227_v49  ;;  %v282_v54 = vadd.f32 %v281_v51, %v280_v50 }
  0xec   :  { %v230_v56 = vrot.slane %v229_v53, 4  ;;  %v284_v57 = vadd.f32 %v283_v55, %v282_v54 }
  0xee   :  { %v231_v58 = vadd.f32 %v230_v56, %v229_v53  ;;  %v285_v59 = vrot.slane %v284_v57, 4 }
  0xf0   :  { %v232_v60 = vrot.slane %v231_v58, 2  ;;  %v286_v62 = vadd.f32 %v285_v59, %v284_v57 }
  0xf2   :  { %v233_v44 = vadd.f32 %v232_v60, %v231_v58  ;;  %v287_v63 = vrot.slane %v286_v62, 2 }
  0xf4   :  { %v234_v0 = vrot.slane %v233_v44, 1  ;;  %v288_v1 = vadd.f32 %v287_v63, %v286_v62 }
  0xf6   :  { %v235_v2 = vadd.f32 %v234_v0, %v233_v44  ;;  %v289_v3 = vrot.slane %v288_v1, 1 }
  0xf8   :  { %237 = vst.msk [vmem:[%s665_s3] sm:$0x1] %vm236_vm4, %v235_v2  ;;  %v290_v61 = vadd.f32 %v289_v3, %v288_v1 }
  0xfa   :  { %291 = vst.msk [vmem:[%s666_s4] sm:$0x1] %vm236_vm4, %v290_v61 }

// kernel: bottleneck_forward.9
= control target key start
LH: loop header
LB: loop body
LE: loop exit
PB: predicated region body
PF: predicated region fallthrough
CT: control target
= control target key end

     0   :  { %vm212_vm0 = vcmask 130048   ;;  %s541_s0 = inlined_call_operand.vmem [shape: bf16[128,16], index: 0, kind: input, shape index: {}]   ;;  %s542_s1 = inlined_call_operand.vmem [shape: f32[1,16], index: 1, kind: input, shape index: {}]   ;;  %s543_s2 = inlined_call_operand.vmem [shape: f32[1,16], index: 2, kind: input, shape index: {}]   ;;  %s544_s3 = inlined_call_operand.vmem [shape: bf16[128,16], index: 3, kind: input, shape index: {}]   ;;  %s545_s4 = inlined_call_operand.vmem [shape: f32[1,16], index: 4, kind: input, shape index: {}]   ;;  %s546_s5 = inlined_call_operand.vmem [shape: f32[1,16], index: 5, kind: input, shape index: {}]   ;;  %s547_s6 = inlined_call_operand.hbm [shape: f32[128,16], index: 6, kind: output, shape index: {}]  }
   0x1   :  { %v250_v0 = vld [vmem:[%s541_s0] sm:$0xff]   ;;  %v313_v9 = vld [vmem:[%s541_s0 + $0x8] sm:$0xff]   ;;  %v314_v20 = vld [vmem:[%s541_s0 + $0x10] sm:$0xff]  }
   0x2   :  { %v396_v1 = vld [vmem:[%s542_s1] ss:$0 sm:$0xff]  ;;  %v251_v2 = vunpack.c.l.bf16 %v250_v0  ;;  %v252_v5 = vunpack.c.h.bf16 %v250_v0  ;;  %v320_v10 = vld [vmem:[%s544_s3 + $0x8] sm:$0xff]   ;;  %v255_v14 = vunpack.c.l.bf16 %v313_v9  ;;  %v256_v18 = vunpack.c.h.bf16 %v313_v9  ;;  %v321_v21 = vld [vmem:[%s544_s3 + $0x10] sm:$0xff]  }
   0x3   :  { %v282_v3 = vld [vmem:[%s544_s3] sm:$0xff]   ;;  %v287_v15 = vunpack.c.l.bf16 %v320_v10  ;;  %v288_v19 = vunpack.c.h.bf16 %v320_v10 }
   0x4   :  { %v404_v4 = vld [vmem:[%s545_s4] ss:$0 sm:$0xff]  ;;  %v283_v7 = vunpack.c.l.bf16 %v282_v3  ;;  %v284_v8 = vunpack.c.h.bf16 %v282_v3  ;;  %v63_v11 = vmul.f32 %v251_v2, %v396_v1  ;;  %v64_v13 = vmul.f32 %v252_v5, %v396_v1 }
   0x5   :  { %v409_v6 = vld [vmem:[%s543_s2] ss:$0 sm:$0xff]  ;;  %v65_v24 = vmul.f32 %v255_v14, %v396_v1  ;;  %v143_v25 = vmul.f32 %v287_v15, %v404_v4  ;;  %v66_v28 = vmul.f32 %v256_v18, %v396_v1  ;;  %v144_v29 = vmul.f32 %v288_v19, %v404_v4 }
   0x6   :  { %v421_v12 = vld [vmem:[%s546_s5] ss:$0 sm:$0xff]  ;;  %v141_v16 = vmul.f32 %v283_v7, %v404_v4  ;;  %v142_v17 = vmul.f32 %v284_v8, %v404_v4  ;;  %v86_v22 = vadd.f32 %v409_v6, %v63_v11  ;;  %v87_v23 = vadd.f32 %v409_v6, %v64_v13 }
   0x8   :  { %v164_v26 = vadd.f32 %v421_v12, %v141_v16  ;;  %v165_v27 = vadd.f32 %v421_v12, %v142_v17 }
   0x9   :  { %11 = vsyncpa [#allocation3], 0  ;;  %v88_v30 = vadd.f32 %v409_v6, %v65_v24  ;;  %v166_v31 = vadd.f32 %v421_v12, %v143_v25  ;;  %v259_v32 = vunpack.c.l.bf16 %v314_v20  ;;  %v291_v33 = vunpack.c.l.bf16 %v321_v21  ;;  %v315_v42 = vld [vmem:[%s541_s0 + $0x18] sm:$0xff]   ;;  %v316_v52 = vld [vmem:[%s541_s0 + $0x20] sm:$0xff]  }
   0xa   :  { %v180_v34 = vadd.f32 %v164_v26, %v86_v22  ;;  %v181_v35 = vadd.f32 %v165_v27, %v87_v23  ;;  %v89_v36 = vadd.f32 %v409_v6, %v66_v28  ;;  %v167_v37 = vadd.f32 %v421_v12, %v144_v29  ;;  %v322_v43 = vld [vmem:[%s544_s3 + $0x18] sm:$0xff]   ;;  %v323_v57 = vld [vmem:[%s544_s3 + $0x20] sm:$0xff]   ;;  %v317_v14 = vld [vmem:[%s541_s0 + $0x28] sm:$0xff]  }
   0xb   :  { %v182_v38 = vadd.f32 %v166_v31, %v88_v30  ;;  %v67_v39 = vmul.f32 %v259_v32, %v396_v1  ;;  %v145_v40 = vmul.f32 %v291_v33, %v404_v4  ;;  %v260_v41 = vunpack.c.h.bf16 %v314_v20  ;;  %v324_v19 = vld [vmem:[%s544_s3 + $0x28] sm:$0xff]   ;;  %v318_v32 = vld [vmem:[%s541_s0 + $0x30] sm:$0xff]  }
   0xc   :  { %v196_v44 = vmax.f32 %v180_v34, 0.0  ;;  %v197_v45 = vmax.f32 %v181_v35, 0.0  ;;  %v183_v46 = vadd.f32 %v167_v37, %v89_v36  ;;  %v292_v47 = vunpack.c.h.bf16 %v321_v21  ;;  %v325_v33 = vld [vmem:[%s544_s3 + $0x30] sm:$0xff]  }
   0xd   :  { %v198_v48 = vmax.f32 %v182_v38, 0.0  ;;  %v90_v49 = vadd.f32 %v409_v6, %v67_v39  ;;  %v168_v50 = vadd.f32 %v421_v12, %v145_v40  ;;  %v68_v51 = vmul.f32 %v260_v41, %v396_v1 }
   0xe   :  { %213 = vst.msk [vmem:[#allocation2] sm:$0xff] %vm212_vm0, %v196_v44  ;;  %214 = vst.msk [vmem:[#allocation2 + $0x8] sm:$0xff] %vm212_vm0, %v197_v45  ;;  %v199_v53 = vmax.f32 %v183_v46, 0.0  ;;  %v146_v54 = vmul.f32 %v292_v47, %v404_v4  ;;  %v263_v55 = vunpack.c.l.bf16 %v315_v42  ;;  %v295_v56 = vunpack.c.l.bf16 %v322_v43  ;;  %v319_v46 = vld [vmem:[%s541_s0 + $0x38] sm:$0xff]   ;;  %s352_s0 = smov [#allocation2]  }
   0xf   :  { %215 = vst.msk [vmem:[#allocation2 + $0x10] sm:$0xff] %vm212_vm0, %v198_v48  ;;  %v184_v58 = vadd.f32 %v168_v50, %v90_v49  ;;  %v91_v59 = vadd.f32 %v409_v6, %v68_v51  ;;  %v264_v60 = vunpack.c.h.bf16 %v315_v42  ;;  %v296_v61 = vunpack.c.h.bf16 %v322_v43 }
  0x10   :  { %216 = vst.msk [vmem:[#allocation2 + $0x18] sm:$0xff] %vm212_vm0, %v199_v53  ;;  %v169_v62 = vadd.f32 %v421_v12, %v146_v54  ;;  %v69_v63 = vmul.f32 %v263_v55, %v396_v1  ;;  %v147_v0 = vmul.f32 %v295_v56, %v404_v4  ;;  %v267_v2 = vunpack.c.l.bf16 %v316_v52  ;;  %v326_v55 = vld [vmem:[%s544_s3 + $0x38] sm:$0xff]   ;;  %s234_s3 = sshll.u32 %s352_s0, 4  ;;  %s235_s3 = int_to_ptr.vmem [resolvable:$true] %s234_s3 }
  0x11   :  { %v200_v3 = vmax.f32 %v184_v58, 0.0  ;;  %v70_v5 = vmul.f32 %v264_v60, %v396_v1  ;;  %v148_v7 = vmul.f32 %v296_v61, %v404_v4  ;;  %v299_v8 = vunpack.c.l.bf16 %v323_v57  ;;  %s330_s8 = scalar_lea.vmem %s235_s3, 2048  ;;  %p335_p1 = scmp.lt.s32.totalorder %s235_s3, %s235_s3 }
  0x12   :  { %v185_v9 = vadd.f32 %v169_v62, %v91_v59  ;;  %v92_v10 = vadd.f32 %v409_v6, %v69_v63  ;;  %v170_v11 = vadd.f32 %v421_v12, %v147_v0  ;;  %v71_v13 = vmul.f32 %v267_v2, %v396_v1  ;;  %p331_p0 = scmp.ne.s32.totalorder %s235_s3, %s330_s8  ;;  %p336_p2 = scmp.lt.s32.totalorder %s330_s8, %s330_s8 }
  0x13   :  { %217 = vst.msk [vmem:[#allocation2 + $0x20] sm:$0xff] %vm212_vm0, %v200_v3  ;;  %v93_v15 = vadd.f32 %v409_v6, %v70_v5  ;;  %v171_v16 = vadd.f32 %v421_v12, %v148_v7  ;;  %v149_v17 = vmul.f32 %v299_v8, %v404_v4  ;;  %v268_v18 = vunpack.c.h.bf16 %v316_v52 }
  0x14   :  { %v201_v20 = vmax.f32 %v185_v9, 0.0  ;;  %v186_v21 = vadd.f32 %v170_v11, %v92_v10  ;;  %v94_v22 = vadd.f32 %v409_v6, %v71_v13  ;;  %v300_v23 = vunpack.c.h.bf16 %v323_v57  ;;  %p337_p3 = por %p336_p2, %p335_p1 }
  0x15   :  { %v187_v24 = vadd.f32 %v171_v16, %v93_v15  ;;  %v172_v25 = vadd.f32 %v421_v12, %v149_v17  ;;  %v72_v26 = vmul.f32 %v268_v18, %v396_v1  ;;  %v271_v27 = vunpack.c.l.bf16 %v317_v14 }
  0x16   :  { %218 = vst.msk [vmem:[#allocation2 + $0x28] sm:$0xff] %vm212_vm0, %v201_v20  ;;  %v202_v28 = vmax.f32 %v186_v21, 0.0  ;;  %v150_v29 = vmul.f32 %v300_v23, %v404_v4  ;;  %v303_v30 = vunpack.c.l.bf16 %v324_v19  ;;  %v272_v31 = vunpack.c.h.bf16 %v317_v14  ;;  %p338_p4 = pnand %p337_p3, %p331_p0 }
  0x17   :  { %v203_v34 = vmax.f32 %v187_v24, 0.0  ;;  %v188_v35 = vadd.f32 %v172_v25, %v94_v22  ;;  %v95_v36 = vadd.f32 %v409_v6, %v72_v26  ;;  %v73_v37 = vmul.f32 %v271_v27, %v396_v1 }
  0x18   :  { %219 = vst.msk [vmem:[#allocation2 + $0x30] sm:$0xff] %vm212_vm0, %v202_v28  ;;  %v173_v38 = vadd.f32 %v421_v12, %v150_v29  ;;  %v151_v39 = vmul.f32 %v303_v30, %v404_v4  ;;  %v74_v40 = vmul.f32 %v272_v31, %v396_v1  ;;  %v304_v41 = vunpack.c.h.bf16 %v324_v19 }
  0x19   :  { %220 = vst.msk [vmem:[#allocation2 + $0x38] sm:$0xff] %vm212_vm0, %v203_v34  ;;  %v204_v42 = vmax.f32 %v188_v35, 0.0  ;;  %v96_v43 = vadd.f32 %v409_v6, %v73_v37  ;;  %v275_v44 = vunpack.c.l.bf16 %v318_v32  ;;  %v307_v45 = vunpack.c.l.bf16 %v325_v33 }
  0x1a   :  { %v189_v47 = vadd.f32 %v173_v38, %v95_v36  ;;  %v174_v48 = vadd.f32 %v421_v12, %v151_v39  ;;  %v97_v49 = vadd.f32 %v409_v6, %v74_v40  ;;  %v152_v50 = vmul.f32 %v304_v41, %v404_v4 }
  0x1b   :  { %221 = vst.msk [vmem:[#allocation2 + $0x40] sm:$0xff] %vm212_vm0, %v204_v42  ;;  %v75_v51 = vmul.f32 %v275_v44, %v396_v1  ;;  %v153_v52 = vmul.f32 %v307_v45, %v404_v4  ;;  %v276_v53 = vunpack.c.h.bf16 %v318_v32  ;;  %v308_v54 = vunpack.c.h.bf16 %v325_v33 }
  0x1c   :  { %v205_v56 = vmax.f32 %v189_v47, 0.0  ;;  %v190_v57 = vadd.f32 %v174_v48, %v96_v43  ;;  %v175_v58 = vadd.f32 %v421_v12, %v152_v50  ;;  %v279_v59 = vunpack.c.l.bf16 %v319_v46 }
  0x1d   :  { %v98_v60 = vadd.f32 %v409_v6, %v75_v51  ;;  %v176_v61 = vadd.f32 %v421_v12, %v153_v52  ;;  %v76_v62 = vmul.f32 %v276_v53, %v396_v1  ;;  %v154_v63 = vmul.f32 %v308_v54, %v404_v4 }
  0x1e   :  { %222 = vst.msk [vmem:[#allocation2 + $0x48] sm:$0xff] %vm212_vm0, %v205_v56  ;;  %v206_v0 = vmax.f32 %v190_v57, 0.0  ;;  %v191_v2 = vadd.f32 %v175_v58, %v97_v49  ;;  %v77_v3 = vmul.f32 %v279_v59, %v396_v1  ;;  %v311_v5 = vunpack.c.l.bf16 %v326_v55 }
  0x1f   :  { %v192_v7 = vadd.f32 %v176_v61, %v98_v60  ;;  %v99_v8 = vadd.f32 %v409_v6, %v76_v62  ;;  %v177_v9 = vadd.f32 %v421_v12, %v154_v63  ;;  %v280_v10 = vunpack.c.h.bf16 %v319_v46 }
  0x20   :  { %223 = vst.msk [vmem:[#allocation2 + $0x50] sm:$0xff] %vm212_vm0, %v206_v0  ;;  %v207_v11 = vmax.f32 %v191_v2, 0.0  ;;  %v100_v13 = vadd.f32 %v409_v6, %v77_v3  ;;  %v155_v14 = vmul.f32 %v311_v5, %v404_v4  ;;  %v312_v15 = vunpack.c.h.bf16 %v326_v55 }
  0x21   :  { %v208_v16 = vmax.f32 %v192_v7, 0.0  ;;  %v193_v17 = vadd.f32 %v177_v9, %v99_v8  ;;  %v78_v18 = vmul.f32 %v280_v10, %v396_v1 }
  0x22   :  { %224 = vst.msk [vmem:[#allocation2 + $0x58] sm:$0xff] %vm212_vm0, %v207_v11  ;;  %v178_v19 = vadd.f32 %v421_v12, %v155_v14  ;;  %v156_v20 = vmul.f32 %v312_v15, %v404_v4 }
  0x23   :  { %225 = vst.msk [vmem:[#allocation2 + $0x60] sm:$0xff] %vm212_vm0, %v208_v16  ;;  %v209_v21 = vmax.f32 %v193_v17, 0.0  ;;  %v101_v22 = vadd.f32 %v409_v6, %v78_v18 }
  0x24   :  { %v194_v23 = vadd.f32 %v178_v19, %v100_v13  ;;  %v179_v24 = vadd.f32 %v421_v12, %v156_v20 }
  0x25   :  { %226 = vst.msk [vmem:[#allocation2 + $0x68] sm:$0xff] %vm212_vm0, %v209_v21 }
  0x26   :  { %v210_v25 = vmax.f32 %v194_v23, 0.0  ;;  %v195_v1 = vadd.f32 %v179_v24, %v101_v22 }
  0x28   :  { %227 = vst.msk [vmem:[#allocation2 + $0x70] sm:$0xff] %vm212_vm0, %v210_v25  ;;  %v211_v26 = vmax.f32 %v195_v1, 0.0 }
  0x2a   :  { %228 = vst.msk [vmem:[#allocation2 + $0x78] sm:$0xff] %vm212_vm0, %v211_v26 }
  0x2b   :  { %341 = shalt.err (!%p338_p4)
}
  0x2c   :  { %s353_s9 = smov 128   ;;  %s354_s4 = smov 8  }
  0x2d   :  { %240 = dma.vmem_to_hbm [thread:$0]  %s235_s3, 2048, %s547_s6, [#allocation3], %s353_s9, %s353_s9, %s354_s4  }
  0x2e   :  { %350 = dma.done.wait [#allocation3], 2048  }
  0x2f   :  { %351 = vsyncadd [#allocation3], 4294965248 }
  0x30   :  { %244 = vsyncpa [#allocation3], 1 }

// kernel: bottleneck_forward.6
= control target key start
LH: loop header
LB: loop body
LE: loop exit
PB: predicated region body
PF: predicated region fallthrough
CT: control target
= control target key end

     0   :  { %s3293_s21 = smov 0   ;;  %s4083_s0 = inlined_call_operand.vmem [shape: bf16[2,16,16,4], index: 0, kind: input, shape index: {}]   ;;  %s4084_s1 = inlined_call_operand.vmem [shape: f32[1,4], index: 1, kind: input, shape index: {}]   ;;  %s4085_s2 = inlined_call_operand.vmem [shape: f32[1,4], index: 2, kind: input, shape index: {}]   ;;  %s4086_s3 = inlined_call_operand.vmem [shape: bf16[9,4,4], index: 3, kind: input, shape index: {}]   ;;  %s4087_s4 = inlined_call_operand.vmem [shape: bf16[2,8,8,4], index: 4, kind: output, shape index: {0}]   ;;  %s4088_s5 = inlined_call_operand.vmem [shape: f32[2,1,4], index: 5, kind: output, shape index: {1}]   ;;  %s4089_s6 = inlined_call_operand.vmem [shape: f32[2,1,4], index: 6, kind: output, shape index: {2}]  }
   0x1 LB: > { %s2592_s22 = sadd.s32 4294967295, %s3254_s21   ;;  %p2596_p0 = scmp.ge.s32.totalorder %s3254_s21, 1  ;;  %s3254_s21 = sphi %s3293_s21, %s17_s21  }
   0x2   : > { %p217_p1 = scmp.lt.s32.totalorder %s3254_s21, 3 }
   0x4   : > { %p218_p2 = pnand %p2596_p0, %p217_p1 }
   0x5   : > { %p253_p3 = scmp.lt.s32.totalorder (!%p218_p2), %s2592_s22, 1 }
   0x6   : > { %221 = sbr.rel (%p218_p2) target bundleno = 580 (0x244), region = 36 }
   0xb   : > { %v519_v0 = vld [vmem:[%s4086_s3 + $0x2] sm:$0x3]  ;;  %vm643_vm0 = vcmask 1041408   ;;  %v3256_v1 = vmov 0.0   ;;  %vm444_vm1 = vcmask 31744   ;;  %s4097_s22 = smov (!%p253_p3, %s2592_s22), 1 }
   0xc   : > { %2894 = vmatprep.subr.bf16.mxu0 %v3256_v1  ;;  %3236 = vmatprep.subr.bf16.mxu1 %v3256_v1  ;;  %v645_v2 = vsel %vm643_vm0, %v519_v0, 0  ;;  %445 = vst.msk [vmem:[#allocation2] sm:$0xff] %vm444_vm1, %v3256_v1  ;;  %446 = vst.msk [vmem:[#allocation2 + $0x8] sm:$0xff] %vm444_vm1, %v3256_v1  ;;  %vm3257_vm2 = vmmov 0   ;;  %v520_v3 = vld [vmem:[%s4086_s3 + $0x4] sm:$0x3]  ;;  %s265_s9 = scalar_lea.vmem %s4088_s5, %s4097_s22  ;;  %s268_s12 = scalar_lea.vmem %s4089_s6, %s4097_s22 }
   0xd   : > { %2895 = vmatpush3.bf16.msra.mxu0 %v645_v2  ;;  %3237 = vmatpush3.bf16.msra.mxu1 %v645_v2  ;;  %447 = vst.msk [vmem:[#allocation2 + $0x10] sm:$0xff] %vm444_vm1, %v3256_v1  ;;  %448 = vst.msk [vmem:[#allocation2 + $0x18] sm:$0xff] %vm444_vm1, %v3256_v1  ;;  %v518_v4 = vld [vmem:[%s4086_s3] sm:$0x3]  ;;  %s2711_s29 = sshll.u32 %s4097_s22, 7  ;;  %v3418_v9 = vsel %vm643_vm0, %v520_v3, 0 }
   0xe   : > { %449 = vst.msk [vmem:[#allocation2 + $0x20] sm:$0xff] %vm444_vm1, %v3256_v1  ;;  %450 = vst.msk [vmem:[#allocation2 + $0x28] sm:$0xff] %vm444_vm1, %v3256_v1  ;;  %2896 = vmatprep.mubr.msk.bf16.mxu0 %vm3257_vm2, %v3256_v1  ;;  %2916 = vmatprep.mubr.msk.bf16.mxu1 %vm3257_vm2, %v3256_v1  ;;  %s3407_s8 = scalar_lea.vmem %s4083_s0, %s2711_s29  ;;  %v3412_v5 = vld [vmem:[%s4084_s1] ss:$0 sm:$0xff]  ;;  %v3421_v10 = vsel %vm643_vm0, %v518_v4, 0  ;;  %s2712_s27 = sshll.u32 %s4097_s22, 5 }
   0xf   : > { %451 = vst.msk [vmem:[#allocation2 + $0x30] sm:$0xff] %vm444_vm1, %v3256_v1  ;;  %452 = vst.msk [vmem:[#allocation2 + $0x38] sm:$0xff] %vm444_vm1, %v3256_v1  ;;  %2970 = vmatprep.subr.bf16.mxu0 %v3256_v1  ;;  %2932 = vmatprep.subr.bf16.mxu1 %v3256_v1  ;;  %v2726_v6 = vld [vmem:[%s3407_s8] sm:$0xff]   ;;  %v2797_v8 = vld [vmem:[%s3407_s8 + $0x48] sm:$0xff]   ;;  %s3979_s30 = scalar_lea.vmem %s4087_s4, %s2712_s27  ;;  %vm2193_vm3 = vcmask 27648   ;;  %vm2232_vm4 = vcmask 1042432  }
  0x10   : > { %453 = vst.msk [vmem:[#allocation2 + $0x40] sm:$0xff] %vm444_vm1, %v3256_v1  ;;  %454 = vst.msk [vmem:[#allocation2 + $0x48] sm:$0xff] %vm444_vm1, %v3256_v1  ;;  %v2796_v7 = vld [vmem:[%s3407_s8 + $0x40] sm:$0xff]   ;;  %v2727_v11 = vunpack.c.l.bf16 %v2726_v6  ;;  %v2728_v12 = vunpack.c.h.bf16 %v2726_v6  ;;  %v2789_v15 = vld [vmem:[%s3407_s8 + $0x8] sm:$0xff]   ;;  %v2763_v18 = vunpack.c.l.bf16 %v2797_v8  ;;  %v2764_v19 = vunpack.c.h.bf16 %v2797_v8 }
  0x11   : > { %455 = vst.msk [vmem:[#allocation2 + $0x50] sm:$0xff] %vm444_vm1, %v3256_v1  ;;  %456 = vst.msk [vmem:[#allocation2 + $0x58] sm:$0xff] %vm444_vm1, %v3256_v1  ;;  %v2759_v13 = vunpack.c.l.bf16 %v2796_v7  ;;  %v2760_v14 = vunpack.c.h.bf16 %v2796_v7  ;;  %v2790_v16 = vld [vmem:[%s3407_s8 + $0x10] sm:$0xff]   ;;  %v3428_v17 = vld [vmem:[%s4085_s2] ss:$0 sm:$0xff]  ;;  %v2731_v20 = vunpack.c.l.bf16 %v2789_v15  ;;  %v2732_v21 = vunpack.c.h.bf16 %v2789_v15 }
  0x12   : > { %457 = vst.msk [vmem:[#allocation2 + $0x60] sm:$0xff] %vm444_vm1, %v3256_v1  ;;  %458 = vst.msk [vmem:[#allocation2 + $0x68] sm:$0xff] %vm444_vm1, %v3256_v1  ;;  %v341_v22 = vmul.f32 %v2727_v11, %v3412_v5  ;;  %v342_v23 = vmul.f32 %v2728_v12, %v3412_v5  ;;  %v359_v26 = vmul.f32 %v2763_v18, %v3412_v5  ;;  %v2735_v28 = vunpack.c.l.bf16 %v2790_v16  ;;  %v2798_v38 = vld [vmem:[%s3407_s8 + $0x50] sm:$0xff]   ;;  %v2799_v43 = vld [vmem:[%s3407_s8 + $0x58] sm:$0xff]  }
  0x13   : > { %459 = vst.msk [vmem:[#allocation2 + $0x70] sm:$0xff] %vm444_vm1, %v3256_v1  ;;  %460 = vst.msk [vmem:[#allocation2 + $0x78] sm:$0xff] %vm444_vm1, %v3256_v1  ;;  %v357_v24 = vmul.f32 %v2759_v13, %v3412_v5  ;;  %v358_v25 = vmul.f32 %v2760_v14, %v3412_v5  ;;  %v360_v27 = vmul.f32 %v2764_v19, %v3412_v5  ;;  %v2736_v29 = vunpack.c.h.bf16 %v2790_v16  ;;  %v2791_v44 = vld [vmem:[%s3407_s8 + $0x18] sm:$0xff]   ;;  %v3460_v57 = vld [vmem:[%s3407_s8 + $0x20] sm:$0xff]  }
  0x14   : > { %461 = vst.msk [vmem:[#allocation2 + $0x80] sm:$0xff] %vm444_vm1, %v3256_v1  ;;  %462 = vst.msk [vmem:[#allocation2 + $0x88] sm:$0xff] %vm444_vm1, %v3256_v1  ;;  %v380_v30 = vadd.f32 %v3428_v17, %v341_v22  ;;  %v381_v31 = vadd.f32 %v3428_v17, %v342_v23  ;;  %v398_v34 = vadd.f32 %v3428_v17, %v359_v26  ;;  %v2767_v51 = vunpack.c.l.bf16 %v2798_v38  ;;  %v2800_v62 = vld [vmem:[%s3407_s8 + $0x60] sm:$0xff]   ;;  %v3473_v11 = vld [vmem:[%s3407_s8 + $0x68] sm:$0xff]  }
  0x15   : > { %463 = vst.msk [vmem:[#allocation2 + $0x90] sm:$0xff] %vm444_vm1, %v3256_v1  ;;  %464 = vst.msk [vmem:[#allocation2 + $0x98] sm:$0xff] %vm444_vm1, %v3256_v1  ;;  %v396_v32 = vadd.f32 %v3428_v17, %v357_v24  ;;  %v397_v33 = vadd.f32 %v3428_v17, %v358_v25  ;;  %v399_v35 = vadd.f32 %v3428_v17, %v360_v27  ;;  %v2768_v52 = vunpack.c.h.bf16 %v2798_v38  ;;  %v572_v12 = vld [vmem:[#allocation2 + $0x1] ss:$2 sm:$0xff]  ;;  %v3492_v38 = vld [vmem:[%s3407_s8 + $0x30] sm:$0xff]  }
  0x16   : > { %465 = vst.msk [vmem:[#allocation2 + $0xa0] sm:$0xff] %vm444_vm1, %v3256_v1  ;;  %466 = vst.msk [vmem:[#allocation2 + $0xa8] sm:$0xff] %vm444_vm1, %v3256_v1  ;;  %v343_v36 = vmul.f32 %v2731_v20, %v3412_v5  ;;  %v344_v37 = vmul.f32 %v2732_v21, %v3412_v5  ;;  %v412_v39 = vmax.f32 %v380_v30, 0.0  ;;  %v413_v40 = vmax.f32 %v381_v31, 0.0 }
  0x17   : > { %467 = vst.msk [vmem:[#allocation2 + $0xb0] sm:$0xff] %vm444_vm1, %v3256_v1  ;;  %468 = vst.msk [vmem:[#allocation2 + $0xb8] sm:$0xff] %vm444_vm1, %v3256_v1  ;;  %v428_v41 = vmax.f32 %v396_v32, 0.0  ;;  %v429_v42 = vmax.f32 %v397_v33, 0.0  ;;  %v430_v45 = vmax.f32 %v398_v34, 0.0  ;;  %v431_v46 = vmax.f32 %v399_v35, 0.0 }
  0x18   : > { %469 = vst.msk [vmem:[#allocation2 + $0xc0] sm:$0xff] %vm444_vm1, %v3256_v1  ;;  %470 = vst.msk [vmem:[#allocation2 + $0xc8] sm:$0xff] %vm444_vm1, %v3256_v1  ;;  %v345_v47 = vmul.f32 %v2735_v28, %v3412_v5  ;;  %v346_v48 = vmul.f32 %v2736_v29, %v3412_v5  ;;  %v382_v49 = vadd.f32 %v3428_v17, %v343_v36  ;;  %v2771_v55 = vunpack.c.l.bf16 %v2799_v43  ;;  %v2793_v33 = vld [vmem:[%s3407_s8 + $0x28] sm:$0xff]  }
  0x19   : > { %471 = vst.msk [vmem:[#allocation2 + $0xd0] sm:$0xff] %vm444_vm1, %v3256_v1  ;;  %472 = vst.msk [vmem:[#allocation2 + $0xd8] sm:$0xff] %vm444_vm1, %v3256_v1  ;;  %v383_v50 = vadd.f32 %v3428_v17, %v344_v37  ;;  %v2739_v56 = vunpack.c.l.bf16 %v2791_v44  ;;  %v361_v60 = vmul.f32 %v2767_v51, %v3412_v5  ;;  %v362_v61 = vmul.f32 %v2768_v52, %v3412_v5  ;;  %v2802_v52 = vld [vmem:[%s3407_s8 + $0x70] sm:$0xff]  }
  0x1a   : > { %473 = vst.msk [vmem:[#allocation2 + $0xe0] sm:$0xff] %vm444_vm1, %v3256_v1  ;;  %474 = vst.msk [vmem:[#allocation2 + $0xe8] sm:$0xff] %vm444_vm1, %v3256_v1  ;;  %v384_v53 = vadd.f32 %v3428_v17, %v345_v47  ;;  %v385_v54 = vadd.f32 %v3428_v17, %v346_v48  ;;  %v414_v58 = vmax.f32 %v382_v49, 0.0  ;;  %v363_v2 = vmul.f32 %v2771_v55, %v3412_v5 }
  0x1b   : > { %475 = vst.msk [vmem:[#allocation2 + $0xf0] sm:$0xff] %vm444_vm1, %v3256_v1  ;;  %476 = vst.msk [vmem:[#allocation2 + $0xf8] sm:$0xff] %vm444_vm1, %v3256_v1  ;;  %v415_v59 = vmax.f32 %v383_v50, 0.0  ;;  %v2740_v3 = vunpack.c.h.bf16 %v2791_v44  ;;  %v400_v4 = vadd.f32 %v3428_v17, %v361_v60  ;;  %v401_v6 = vadd.f32 %v3428_v17, %v362_v61 }
  0x1c   : > { %477 = vst.msk [vmem:[#allocation2 + $0x100] sm:$0xff] %vm444_vm1, %v3256_v1  ;;  %478 = vst.msk [vmem:[#allocation2 + $0x108] sm:$0xff] %vm444_vm1, %v3256_v1  ;;  %v416_v63 = vmax.f32 %v384_v53, 0.0  ;;  %v417_v0 = vmax.f32 %v385_v54, 0.0  ;;  %v2743_v7 = vunpack.c.l.bf16 %v3460_v57  ;;  %v347_v8 = vmul.f32 %v2739_v56, %v3412_v5 }
  0x1d   : > { %479 = vst.msk [vmem:[#allocation2 + $0x110] sm:$0xff] %vm444_vm1, %v3256_v1  ;;  %480 = vst.msk [vmem:[#allocation2 + $0x118] sm:$0xff] %vm444_vm1, %v3256_v1  ;;  %v402_v13 = vadd.f32 %v3428_v17, %v363_v2  ;;  %v348_v14 = vmul.f32 %v2740_v3, %v3412_v5  ;;  %v2772_v15 = vunpack.c.h.bf16 %v2799_v43  ;;  %v2775_v16 = vunpack.c.l.bf16 %v2800_v62  ;;  %v2795_v2 = vld [vmem:[%s3407_s8 + $0x38] sm:$0xff]  }
  0x1e   : > { %481 = vst.msk [vmem:[#allocation2 + $0x120] sm:$0xff] %vm444_vm1, %v3256_v1  ;;  %482 = vst.msk [vmem:[#allocation2 + $0x128] sm:$0xff] %vm444_vm1, %v3256_v1  ;;  %v432_v18 = vmax.f32 %v400_v4, 0.0  ;;  %v433_v19 = vmax.f32 %v401_v6, 0.0  ;;  %v349_v20 = vmul.f32 %v2743_v7, %v3412_v5  ;;  %v386_v21 = vadd.f32 %v3428_v17, %v347_v8 }
  0x1f   : > { %483 = vst.msk [vmem:[#allocation2 + $0x130] sm:$0xff] %vm444_vm1, %v3256_v1  ;;  %484 = vst.msk [vmem:[#allocation2 + $0x138] sm:$0xff] %vm444_vm1, %v3256_v1  ;;  %v434_v24 = vmax.f32 %v402_v13, 0.0  ;;  %v387_v25 = vadd.f32 %v3428_v17, %v348_v14  ;;  %v2776_v26 = vunpack.c.h.bf16 %v2800_v62  ;;  %v2779_v27 = vunpack.c.l.bf16 %v3473_v11 }
  0x20   : > { %485 = vst.msk [vmem:[#allocation2 + $0x140] sm:$0xff] %vm444_vm1, %v3256_v1  ;;  %486 = vst.msk [vmem:[#allocation2 + $0x13] sm:$0xff] %vm444_vm1, %v412_v39  ;;  %v388_v30 = vadd.f32 %v3428_v17, %v349_v20  ;;  %v418_v31 = vmax.f32 %v386_v21, 0.0  ;;  %v364_v32 = vmul.f32 %v2772_v15, %v3412_v5  ;;  %v365_v36 = vmul.f32 %v2775_v16, %v3412_v5 }
  0x21   : > { %487 = vst.msk [vmem:[#allocation2 + $0x1b] sm:$0xff] %vm444_vm1, %v413_v40  ;;  %502 = vst.msk [vmem:[#allocation2 + $0xa3] sm:$0xff] %vm444_vm1, %v428_v41  ;;  %v419_v35 = vmax.f32 %v387_v25, 0.0  ;;  %v366_v37 = vmul.f32 %v2776_v26, %v3412_v5  ;;  %v367_v40 = vmul.f32 %v2779_v27, %v3412_v5  ;;  %v2748_v47 = vunpack.c.h.bf16 %v2793_v33 }
  0x22   : > { %503 = vst.msk [vmem:[#allocation2 + $0xab] sm:$0xff] %vm444_vm1, %v429_v42  ;;  %504 = vst.msk [vmem:[#allocation2 + $0xb5] sm:$0xff] %vm444_vm1, %v430_v45  ;;  %v420_v39 = vmax.f32 %v388_v30, 0.0  ;;  %v403_v41 = vadd.f32 %v3428_v17, %v364_v32  ;;  %v2744_v42 = vunpack.c.h.bf16 %v3460_v57  ;;  %v404_v44 = vadd.f32 %v3428_v17, %v365_v36 }
  0x23   : > { %505 = vst.msk [vmem:[#allocation2 + $0xbd] sm:$0xff] %vm444_vm1, %v431_v46  ;;  %488 = vst.msk [vmem:[#allocation2 + $0x25] sm:$0xff] %vm444_vm1, %v414_v58  ;;  %v405_v45 = vadd.f32 %v3428_v17, %v366_v37  ;;  %v2747_v46 = vunpack.c.l.bf16 %v2793_v33  ;;  %v406_v49 = vadd.f32 %v3428_v17, %v367_v40  ;;  %v2751_v50 = vunpack.c.l.bf16 %v3492_v38 }
  0x24   : > { %489 = vst.msk [vmem:[#allocation2 + $0x2d] sm:$0xff] %vm444_vm1, %v415_v59  ;;  %490 = vst.msk [vmem:[#allocation2 + $0x37] sm:$0xff] %vm444_vm1, %v416_v63  ;;  %v350_v51 = vmul.f32 %v2744_v42, %v3412_v5  ;;  %v436_v54 = vmax.f32 %v404_v44, 0.0  ;;  %v352_v57 = vmul.f32 %v2748_v47, %v3412_v5  ;;  %v2780_v62 = vunpack.c.h.bf16 %v3473_v11 }
  0x25   : > { %491 = vst.msk [vmem:[#allocation2 + $0x3f] sm:$0xff] %vm444_vm1, %v417_v0  ;;  %506 = vst.msk [vmem:[#allocation2 + $0xc7] sm:$0xff] %vm444_vm1, %v432_v18  ;;  %v351_v55 = vmul.f32 %v2747_v46, %v3412_v5  ;;  %v438_v56 = vmax.f32 %v406_v49, 0.0  ;;  %v353_v58 = vmul.f32 %v2751_v50, %v3412_v5  ;;  %v2783_v63 = vunpack.c.l.bf16 %v2802_v52 }
  0x26   : > { %507 = vst.msk [vmem:[#allocation2 + $0xcf] sm:$0xff] %vm444_vm1, %v433_v19  ;;  %508 = vst.msk [vmem:[#allocation2 + $0xd9] sm:$0xff] %vm444_vm1, %v434_v24  ;;  %v389_v59 = vadd.f32 %v3428_v17, %v350_v51  ;;  %v2784_v0 = vunpack.c.h.bf16 %v2802_v52  ;;  %v391_v4 = vadd.f32 %v3428_v17, %v352_v57  ;;  %v2752_v8 = vunpack.c.h.bf16 %v3492_v38  ;;  %v521_v52 = vld [vmem:[%s4086_s3 + $0x6] sm:$0x3] }
  0x27   : > { %492 = vst.msk [vmem:[#allocation2 + $0x49] sm:$0xff] %vm444_vm1, %v418_v31  ;;  %493 = vst.msk [vmem:[#allocation2 + $0x51] sm:$0xff] %vm444_vm1, %v419_v35  ;;  %v390_v61 = vadd.f32 %v3428_v17, %v351_v55  ;;  %v392_v6 = vadd.f32 %v3428_v17, %v353_v58  ;;  %v368_v14 = vmul.f32 %v2780_v62, %v3412_v5  ;;  %v2755_v19 = vunpack.c.l.bf16 %v2795_v2 }
  0x28   : > { %v574_v22 = vld [vmem:[#allocation2 + $0x11] ss:$2 sm:$0xff]  ;;  %494 = vst.msk [vmem:[#allocation2 + $0x5b] sm:$0xff] %vm444_vm1, %v420_v39  ;;  %510 = vst.msk [vmem:[#allocation2 + $0xeb] sm:$0xff] %vm444_vm1, %v436_v54  ;;  %v421_v7 = vmax.f32 %v389_v59, 0.0  ;;  %v369_v15 = vmul.f32 %v2783_v63, %v3412_v5  ;;  %v423_v11 = vmax.f32 %v391_v4, 0.0  ;;  %v370_v18 = vmul.f32 %v2784_v0, %v3412_v5 }
  0x29   : > { %v592_v23 = vld [vmem:[#allocation2 + $0xa1] ss:$2 sm:$0xff]  ;;  %v607_v28 = vpack.c.bf16 %v574_v22, %v572_v12  ;;  %512 = vst.msk [vmem:[#allocation2 + $0xfd] sm:$0xff] %vm444_vm1, %v438_v56  ;;  %v422_v13 = vmax.f32 %v390_v61, 0.0  ;;  %v424_v16 = vmax.f32 %v392_v6, 0.0  ;;  %v407_v22 = vadd.f32 %v3428_v17, %v368_v14 }
  0x2a   : > { %v594_v29 = vld [vmem:[#allocation2 + $0xb1] ss:$2 sm:$0xff]  ;;  %495 = vst.msk [vmem:[#allocation2 + $0x63] sm:$0xff] %vm444_vm1, %v421_v7  ;;  %v2756_v24 = vunpack.c.h.bf16 %v2795_v2  ;;  %v354_v25 = vmul.f32 %v2752_v8, %v3412_v5  ;;  %497 = vst.msk [vmem:[#allocation2 + $0x75] sm:$0xff] %vm444_vm1, %v423_v11  ;;  %v409_v26 = vadd.f32 %v3428_v17, %v370_v18  ;;  %v355_v27 = vmul.f32 %v2755_v19, %v3412_v5  ;;  %v529_v50 = vld [vmem:[#allocation2 + $0x10] ss:$2 sm:$0xff] }
  0x2b   : > { %v612_v34 = vpack.c.bf16 %v594_v29, %v592_v23  ;;  %2897 = vmatmul.mubr.msk.bf16.vlgmr.msra.gmra.mxu0 %vm444_vm1, %v607_v28  ;;  %v576_v43 = vld [vmem:[#allocation2 + $0x21] ss:$2 sm:$0xff]  ;;  %496 = vst.msk [vmem:[#allocation2 + $0x6d] sm:$0xff] %vm444_vm1, %v422_v13  ;;  %v408_v23 = vadd.f32 %v3428_v17, %v369_v15  ;;  %498 = vst.msk [vmem:[#allocation2 + $0x7f] sm:$0xff] %vm444_vm1, %v424_v16  ;;  %v439_v28 = vmax.f32 %v407_v22, 0.0  ;;  %v1125_v56 = vsel %vm643_vm0, %v521_v52, 0 }
  0x2c   : > { %2971 = vmatpush3.bf16.msra.mxu0 %v3418_v9  ;;  %2900 = vmatprep.mubr.msk.bf16.mxu0 %vm3257_vm2, %v3256_v1  ;;  %v578_v48 = vld [vmem:[#allocation2 + $0x31] ss:$2 sm:$0xff]  ;;  %v435_v9 = vmax.f32 %v403_v41, 0.0  ;;  %v356_v30 = vmul.f32 %v2756_v24, %v3412_v5  ;;  %v393_v31 = vadd.f32 %v3428_v17, %v354_v25  ;;  %v394_v35 = vadd.f32 %v3428_v17, %v355_v27  ;;  %v880_v59 = vld [vmem:[#allocation2 + $0x2] ss:$2 sm:$0xff] }
  0x2d   : > { %2917 = vmatmul.mubr.msk.bf16.vlgmr.msra.gmra.mxu1 %vm444_vm1, %v612_v34  ;;  %v608_v53 = vpack.c.bf16 %v578_v48, %v576_v43  ;;  %3046 = vmatprep.subr.bf16.mxu0 %v3256_v1  ;;  %v596_v60 = vld [vmem:[#allocation2 + $0xc1] ss:$2 sm:$0xff]  ;;  %v598_v3 = vld [vmem:[#allocation2 + $0xd1] ss:$2 sm:$0xff]  ;;  %v440_v29 = vmax.f32 %v408_v23, 0.0  ;;  %v441_v34 = vmax.f32 %v409_v26, 0.0 }
  0x2e   : > { %2933 = vmatpush3.bf16.msra.mxu1 %v3421_v10  ;;  %2920 = vmatprep.mubr.msk.bf16.mxu1 %vm3257_vm2, %v3256_v1  ;;  %v437_v10 = vmax.f32 %v405_v45, 0.0  ;;  %509 = vst.msk [vmem:[#allocation2 + $0xe1] sm:$0xff] %vm444_vm1, %v435_v9  ;;  %v613_v12 = vpack.c.bf16 %v598_v3, %v596_v60  ;;  %v580_v20 = vld [vmem:[#allocation2 + $0x41] ss:$2 sm:$0xff]  ;;  %513 = vst.msk [vmem:[#allocation2 + $0x105] sm:$0xff] %vm444_vm1, %v439_v28  ;;  %v395_v37 = vadd.f32 %v3428_v17, %v356_v30  ;;  %vm2233_vm5 = vcmask 1046532  }
  0x2f   : > { %3008 = vmatprep.subr.bf16.mxu1 %v3256_v1  ;;  %v582_v21 = vld [vmem:[#allocation2 + $0x51] ss:$2 sm:$0xff]  ;;  %514 = vst.msk [vmem:[#allocation2 + $0x10f] sm:$0xff] %vm444_vm1, %v440_v29  ;;  %v425_v38 = vmax.f32 %v393_v31, 0.0  ;;  %515 = vst.msk [vmem:[#allocation2 + $0x117] sm:$0xff] %vm444_vm1, %v441_v34  ;;  %v426_v40 = vmax.f32 %v394_v35, 0.0 }
  0x30   : > { %511 = vst.msk [vmem:[#allocation2 + $0xf3] sm:$0xff] %vm444_vm1, %v437_v10  ;;  %v609_v32 = vpack.c.bf16 %v582_v21, %v580_v20  ;;  %v427_v41 = vmax.f32 %v395_v37, 0.0  ;;  %v527_v9 = vld [vmem:[#allocation2] ss:$2 sm:$0xff]  ;;  %v533_v0 = vld [vmem:[#allocation2 + $0x30] ss:$2 sm:$0xff]  ;;  %vm3988_vm7 = vmor %vm2232_vm4, %vm2233_vm5 }
  0x31   : > { %499 = vst.msk [vmem:[#allocation2 + $0x87] sm:$0xff] %vm444_vm1, %v425_v38  ;;  %500 = vst.msk [vmem:[#allocation2 + $0x91] sm:$0xff] %vm444_vm1, %v426_v40  ;;  %v562_v54 = vpack.c.bf16 %v529_v50, %v527_v9  ;;  %v882_v60 = vld [vmem:[#allocation2 + $0x12] ss:$2 sm:$0xff]  ;;  %v884_v7 = vld [vmem:[#allocation2 + $0x22] ss:$2 sm:$0xff] }
  0x32   : > { %v584_v42 = vld [vmem:[#allocation2 + $0x61] ss:$2 sm:$0xff]  ;;  %v586_v43 = vld [vmem:[#allocation2 + $0x71] ss:$2 sm:$0xff]  ;;  %501 = vst.msk [vmem:[#allocation2 + $0x99] sm:$0xff] %vm444_vm1, %v427_v41  ;;  %v915_v4 = vpack.c.bf16 %v882_v60, %v880_v59  ;;  %vm2197_vm6 = vcmask 1045504  }
  0x33   : > { %2901 = vmatmul.mubr.msk.bf16.gmra.mxu0 %vm444_vm1, %v608_v53  ;;  %v610_v44 = vpack.c.bf16 %v586_v43, %v584_v42  ;;  %v2803_v53 = vld [vmem:[%s3407_s8 + $0x78] sm:$0xff]   ;;  %v531_v63 = vld [vmem:[#allocation2 + $0x20] ss:$2 sm:$0xff]  ;;  %v1245_v59 = vld [vmem:[#allocation2 + $0x23] ss:$2 sm:$0xff]  ;;  %vm2244_vm8 = vcmask 1043456  }
  0x34   : > { %2904 = vmatprep.mubr.msk.bf16.mxu0 %vm3257_vm2, %v3256_v1  ;;  %v2787_v10 = vunpack.c.l.bf16 %v2803_v53  ;;  %v2788_v55 = vunpack.c.h.bf16 %v2803_v53  ;;  %v563_v6 = vpack.c.bf16 %v533_v0, %v531_v63  ;;  %v886_v8 = vld [vmem:[#allocation2 + $0x32] ss:$2 sm:$0xff]  ;;  %v888_v11 = vld [vmem:[#allocation2 + $0x42] ss:$2 sm:$0xff]  ;;  %vm2280_vm9 = vcmask 1045508  }
  0x35   : > { %2921 = vmatmul.mubr.msk.bf16.gmra.mxu1 %vm444_vm1, %v613_v12  ;;  %v600_v33 = vld [vmem:[#allocation2 + $0xe1] ss:$2 sm:$0xff]  ;;  %v535_v12 = vld [vmem:[#allocation2 + $0x40] ss:$2 sm:$0xff]  ;;  %v537_v13 = vld [vmem:[#allocation2 + $0x50] ss:$2 sm:$0xff]  ;;  %v916_v14 = vpack.c.bf16 %v886_v8, %v884_v7 }
  0x36   : > { %2924 = vmatprep.mubr.msk.bf16.mxu1 %vm3257_vm2, %v3256_v1  ;;  %v604_v45 = vld [vmem:[#allocation2 + $0x101] ss:$2 sm:$0xff]  ;;  %v606_v46 = vld [vmem:[#allocation2 + $0x111] ss:$2 sm:$0xff]  ;;  %v371_v57 = vmul.f32 %v2787_v10, %v3412_v5  ;;  %v372_v58 = vmul.f32 %v2788_v55, %v3412_v5  ;;  %v564_v15 = vpack.c.bf16 %v537_v13, %v535_v12  ;;  %v890_v16 = vld [vmem:[#allocation2 + $0x52] ss:$2 sm:$0xff] }
  0x37   : > { %v602_v36 = vld [vmem:[#allocation2 + $0xf1] ss:$2 sm:$0xff]  ;;  %v615_v47 = vpack.c.bf16 %v606_v46, %v604_v45  ;;  %v522_v5 = vld [vmem:[%s4086_s3 + $0x8] sm:$0x3]  ;;  %v541_v19 = vld [vmem:[#allocation2 + $0x70] ss:$2 sm:$0xff]  ;;  %v917_v20 = vpack.c.bf16 %v890_v16, %v888_v11 }
  0x38   : > { %v614_v39 = vpack.c.bf16 %v602_v36, %v600_v33  ;;  %v588_v48 = vld [vmem:[#allocation2 + $0x81] ss:$2 sm:$0xff]  ;;  %v410_v61 = vadd.f32 %v3428_v17, %v371_v57  ;;  %v411_v62 = vadd.f32 %v3428_v17, %v372_v58  ;;  %v1315_v17 = vsel %vm643_vm0, %v522_v5, 0  ;;  %v539_v18 = vld [vmem:[#allocation2 + $0x60] ss:$2 sm:$0xff]  ;;  %vm4005_vm11 = vmor %vm643_vm0, %vm2280_vm9 }
  0x39   : > { %v590_v49 = vld [vmem:[#allocation2 + $0x91] ss:$2 sm:$0xff]  ;;  %v565_v21 = vpack.c.bf16 %v541_v19, %v539_v18  ;;  %v892_v22 = vld [vmem:[#allocation2 + $0x62] ss:$2 sm:$0xff]  ;;  %v894_v23 = vld [vmem:[#allocation2 + $0x72] ss:$2 sm:$0xff] }
  0x3a   : > { %v611_v51 = vpack.c.bf16 %v590_v49, %v588_v48  ;;  %v442_v2 = vmax.f32 %v410_v61, 0.0  ;;  %v443_v3 = vmax.f32 %v411_v62, 0.0  ;;  %v543_v24 = vld [vmem:[#allocation2 + $0x80] ss:$2 sm:$0xff]  ;;  %v545_v25 = vld [vmem:[#allocation2 + $0x90] ss:$2 sm:$0xff]  ;;  %v918_v26 = vpack.c.bf16 %v894_v23, %v892_v22 }
  0x3b   : > { %2905 = vmatmul.mubr.msk.bf16.gmra.mxu0 %vm444_vm1, %v609_v32  ;;  %v566_v27 = vpack.c.bf16 %v545_v25, %v543_v24  ;;  %v896_v28 = vld [vmem:[#allocation2 + $0x82] ss:$2 sm:$0xff]  ;;  %v898_v29 = vld [vmem:[#allocation2 + $0x92] ss:$2 sm:$0xff]  ;;  %v1243_v58 = vld [vmem:[#allocation2 + $0x13] ss:$2 sm:$0xff] }
  0x3c   : > { %2908 = vmatprep.mubr.msk.bf16.mxu0 %vm3257_vm2, %v3256_v1  ;;  %516 = vst.msk [vmem:[#allocation2 + $0x121] sm:$0xff] %vm444_vm1, %v442_v2  ;;  %517 = vst.msk [vmem:[#allocation2 + $0x129] sm:$0xff] %vm444_vm1, %v443_v3  ;;  %v547_v30 = vld [vmem:[#allocation2 + $0xa0] ss:$2 sm:$0xff]  ;;  %v549_v31 = vld [vmem:[#allocation2 + $0xb0] ss:$2 sm:$0xff]  ;;  %v919_v32 = vpack.c.bf16 %v898_v29, %v896_v28  ;;  %v1278_v63 = vpack.c.bf16 %v1245_v59, %v1243_v58 }
  0x3d   : > { %2925 = vmatmul.mubr.msk.bf16.gmra.mxu1 %vm444_vm1, %v614_v39  ;;  %v567_v33 = vpack.c.bf16 %v549_v31, %v547_v30  ;;  %v900_v34 = vld [vmem:[#allocation2 + $0xa2] ss:$2 sm:$0xff]  ;;  %v902_v35 = vld [vmem:[#allocation2 + $0xb2] ss:$2 sm:$0xff]  ;;  %v1247_v2 = vld [vmem:[#allocation2 + $0x33] ss:$2 sm:$0xff] }
  0x3e   : > { %2928 = vmatprep.mubr.msk.bf16.mxu1 %vm3257_vm2, %v3256_v1  ;;  %v551_v36 = vld [vmem:[#allocation2 + $0xc0] ss:$2 sm:$0xff]  ;;  %v553_v37 = vld [vmem:[#allocation2 + $0xd0] ss:$2 sm:$0xff]  ;;  %v920_v38 = vpack.c.bf16 %v902_v35, %v900_v34  ;;  %v1249_v3 = vld [vmem:[#allocation2 + $0x43] ss:$2 sm:$0xff] }
  0x3f   : > { %v568_v39 = vpack.c.bf16 %v553_v37, %v551_v36  ;;  %v904_v40 = vld [vmem:[#allocation2 + $0xc2] ss:$2 sm:$0xff]  ;;  %v906_v41 = vld [vmem:[#allocation2 + $0xd2] ss:$2 sm:$0xff]  ;;  %v1251_v8 = vld [vmem:[#allocation2 + $0x53] ss:$2 sm:$0xff] }
  0x40   : > { %v555_v42 = vld [vmem:[#allocation2 + $0xe0] ss:$2 sm:$0xff]  ;;  %v557_v43 = vld [vmem:[#allocation2 + $0xf0] ss:$2 sm:$0xff]  ;;  %v1253_v12 = vld [vmem:[#allocation2 + $0x63] ss:$2 sm:$0xff] }
  0x41   : > { %v569_v45 = vpack.c.bf16 %v557_v43, %v555_v42  ;;  %v908_v46 = vld [vmem:[#allocation2 + $0xe2] ss:$2 sm:$0xff]  ;;  %v914_v52 = vld [vmem:[#allocation2 + $0x112] ss:$2 sm:$0xff]  ;;  %v1255_v16 = vld [vmem:[#allocation2 + $0x73] ss:$2 sm:$0xff] }
  0x42   : > { %v559_v48 = vld [vmem:[#allocation2 + $0x100] ss:$2 sm:$0xff]  ;;  %v561_v49 = vld [vmem:[#allocation2 + $0x110] ss:$2 sm:$0xff]  ;;  %v1257_v18 = vld [vmem:[#allocation2 + $0x83] ss:$2 sm:$0xff] }
  0x43   : > { %2909 = vmatmul.mubr.msk.bf16.gmra.mxu0 %vm444_vm1, %v610_v44  ;;  %v921_v44 = vpack.c.bf16 %v906_v41, %v904_v40  ;;  %v570_v50 = vpack.c.bf16 %v561_v49, %v559_v48  ;;  %v1069_v53 = vld [vmem:[#allocation2 + $0x12] ss:$2 sm:$0xff]  ;;  %v523_v55 = vld [vmem:[%s4086_s3 + $0xa] sm:$0x3]  ;;  %v524_v62 = vld [vmem:[%s4086_s3 + $0xc] sm:$0x3] }
  0x44   : > { %2912 = vmatprep.mubr.msk.bf16.mxu0 %vm3257_vm2, %v3256_v1  ;;  %v1505_v57 = vsel %vm643_vm0, %v523_v55, 0  ;;  %v1071_v60 = vld [vmem:[#allocation2 + $0x32] ss:$2 sm:$0xff]  ;;  %v1072_v61 = vld [vmem:[#allocation2 + $0x42] ss:$2 sm:$0xff]  ;;  %v1678_v5 = vsel %vm643_vm0, %v524_v62, 0 }
  0x45   : > { %2929 = vmatmul.mubr.msk.bf16.gmra.mxu1 %vm444_vm1, %v615_v47  ;;  %v910_v47 = vld [vmem:[#allocation2 + $0xf2] ss:$2 sm:$0xff]  ;;  %v1089_v0 = vpack.c.bf16 %v1072_v61, %v1071_v60  ;;  %v1259_v23 = vld [vmem:[#allocation2 + $0x93] ss:$2 sm:$0xff]  ;;  %v1261_v24 = vld [vmem:[#allocation2 + $0xa3] ss:$2 sm:$0xff] }
  0x46   : > { %2934 = vmatprep.mubr.msk.bf16.mxu1 %vm3257_vm2, %v3256_v1  ;;  %v922_v9 = vpack.c.bf16 %v910_v47, %v908_v46  ;;  %v1075_v13 = vld [vmem:[#allocation2 + $0x72] ss:$2 sm:$0xff]  ;;  %v1263_v29 = vld [vmem:[#allocation2 + $0xb3] ss:$2 sm:$0xff]  ;;  %v1265_v30 = vld [vmem:[#allocation2 + $0xc3] ss:$2 sm:$0xff] }
  0x47   : > { %v1077_v19 = vld [vmem:[#allocation2 + $0x92] ss:$2 sm:$0xff]  ;;  %v1267_v35 = vld [vmem:[#allocation2 + $0xd3] ss:$2 sm:$0xff]  ;;  %v1269_v36 = vld [vmem:[#allocation2 + $0xe3] ss:$2 sm:$0xff] }
  0x48   : > { %v1079_v25 = vld [vmem:[#allocation2 + $0xb2] ss:$2 sm:$0xff]  ;;  %v1271_v41 = vld [vmem:[#allocation2 + $0xf3] ss:$2 sm:$0xff]  ;;  %v1273_v42 = vld [vmem:[#allocation2 + $0x103] ss:$2 sm:$0xff] }
  0x49   : > { %v1081_v31 = vld [vmem:[#allocation2 + $0xd2] ss:$2 sm:$0xff]  ;;  %v1275_v47 = vld [vmem:[#allocation2 + $0x113] ss:$2 sm:$0xff]  ;;  %v1277_v48 = vld [vmem:[#allocation2 + $0x123] ss:$2 sm:$0xff] }
  0x4a   : > { %v1083_v37 = vld [vmem:[#allocation2 + $0xf2] ss:$2 sm:$0xff]  ;;  %vm2325_vm10 = vcmask 1040384   ;;  %vm2326_vm12 = vcmask 1044484   ;;  %vm2484_vm14 = vcmask 24576  }
  0x4b   : > { %2913 = vmatmul.mubr.msk.bf16.gmra.mxu0 %vm444_vm1, %v611_v51  ;;  %v912_v51 = vld [vmem:[#allocation2 + $0x102] ss:$2 sm:$0xff]  ;;  %v1085_v43 = vld [vmem:[#allocation2 + $0x112] ss:$2 sm:$0xff]  ;;  %vm4019_vm13 = vmor %vm2325_vm10, %vm2326_vm12 }
  0x4c   : > { %2972 = vmatprep.mubr.msk.bf16.mxu0 %vm3257_vm2, %v3256_v1  ;;  %v923_v10 = vpack.c.bf16 %v914_v52, %v912_v51  ;;  %v1433_v49 = vld [vmem:[#allocation2 + $0x14] ss:$2 sm:$0xff]  ;;  %v525_v51 = vld [vmem:[%s4086_s3 + $0xe] sm:$0x3] }
  0x4d   : > { %2935 = vmatmul.mubr.msk.bf16.vlgmr.msra.gmra.mxu1 %vm444_vm1, %v562_v54  ;;  %v1070_v54 = vld [vmem:[#allocation2 + $0x22] ss:$2 sm:$0xff] }
  0x4e   : > { %3009 = vmatpush3.bf16.msra.mxu1 %v1125_v56  ;;  %2938 = vmatprep.mubr.msk.bf16.mxu1 %vm3257_vm2, %v3256_v1  ;;  %v1088_v56 = vpack.c.bf16 %v1070_v54, %v1069_v53  ;;  %v1868_v53 = vsel %vm643_vm0, %v525_v51, 0  ;;  %v1622_v54 = vld [vmem:[#allocation2 + $0x24] ss:$2 sm:$0xff]  ;;  %v1437_v55 = vld [vmem:[#allocation2 + $0x34] ss:$2 sm:$0xff] }
  0x4f   : > { %3084 = vmatprep.subr.bf16.mxu1 %v3256_v1  ;;  %v1624_v61 = vld [vmem:[#allocation2 + $0x44] ss:$2 sm:$0xff]  ;;  %v1625_v62 = vld [vmem:[#allocation2 + $0x54] ss:$2 sm:$0xff] }
  0x53   : > { %2973 = vmatmul.mubr.msk.bf16.vlgmr.msra.gmra.mxu0 %vm444_vm1, %v915_v4  ;;  %v1073_v4 = vld [vmem:[#allocation2 + $0x52] ss:$2 sm:$0xff] }
  0x54   : > { %3047 = vmatpush3.bf16.msra.mxu0 %v1315_v17  ;;  %2976 = vmatprep.mubr.msk.bf16.mxu0 %vm3257_vm2, %v3256_v1  ;;  %v1279_v17 = vpack.c.bf16 %v1249_v3, %v1247_v2 }
  0x55   : > { %2939 = vmatmul.mubr.msk.bf16.gmra.mxu1 %vm444_vm1, %v563_v6  ;;  %3122 = vmatprep.subr.bf16.mxu0 %v3256_v1  ;;  %v1074_v6 = vld [vmem:[#allocation2 + $0x62] ss:$2 sm:$0xff] }
  0x56   : > { %2942 = vmatprep.mubr.msk.bf16.mxu1 %vm3257_vm2, %v3256_v1  ;;  %v1090_v7 = vpack.c.bf16 %v1074_v6, %v1073_v4  ;;  %v1626_v6 = vld [vmem:[#allocation2 + $0x64] ss:$2 sm:$0xff] }
  0x5b   : > { %2977 = vmatmul.mubr.msk.bf16.gmra.mxu0 %vm444_vm1, %v916_v14  ;;  %v1076_v14 = vld [vmem:[#allocation2 + $0x82] ss:$2 sm:$0xff] }
  0x5c   : > { %2980 = vmatprep.mubr.msk.bf16.mxu0 %vm3257_vm2, %v3256_v1  ;;  %v1091_v11 = vpack.c.bf16 %v1076_v14, %v1075_v13 }
  0x5d   : > { %2943 = vmatmul.mubr.msk.bf16.gmra.mxu1 %vm444_vm1, %v564_v15  ;;  %v1280_v15 = vpack.c.bf16 %v1253_v12, %v1251_v8  ;;  %v1445_v8 = vld [vmem:[#allocation2 + $0x74] ss:$2 sm:$0xff]  ;;  %v1447_v12 = vld [vmem:[#allocation2 + $0x84] ss:$2 sm:$0xff] }
  0x5e   : > { %2946 = vmatprep.mubr.msk.bf16.mxu1 %vm3257_vm2, %v3256_v1 }
  0x63   : > { %2981 = vmatmul.mubr.msk.bf16.gmra.mxu0 %vm444_vm1, %v917_v20  ;;  %v1078_v20 = vld [vmem:[#allocation2 + $0xa2] ss:$2 sm:$0xff] }
  0x64   : > { %2984 = vmatprep.mubr.msk.bf16.mxu0 %vm3257_vm2, %v3256_v1  ;;  %v1092_v22 = vpack.c.bf16 %v1078_v20, %v1077_v19 }
  0x65   : > { %2947 = vmatmul.mubr.msk.bf16.gmra.mxu1 %vm444_vm1, %v565_v21  ;;  %v1281_v21 = vpack.c.bf16 %v1257_v18, %v1255_v16  ;;  %v1471_v16 = vpack.c.bf16 %v1447_v12, %v1445_v8 }
  0x66   : > { %2950 = vmatprep.mubr.msk.bf16.mxu1 %vm3257_vm2, %v3256_v1 }
  0x6b   : > { %2985 = vmatmul.mubr.msk.bf16.gmra.mxu0 %vm444_vm1, %v918_v26  ;;  %v1080_v26 = vld [vmem:[#allocation2 + $0xc2] ss:$2 sm:$0xff] }
  0x6c   : > { %2988 = vmatprep.mubr.msk.bf16.mxu0 %vm3257_vm2, %v3256_v1  ;;  %v1093_v28 = vpack.c.bf16 %v1080_v26, %v1079_v25  ;;  %v1449_v25 = vld [vmem:[#allocation2 + $0x94] ss:$2 sm:$0xff]  ;;  %v1451_v26 = vld [vmem:[#allocation2 + $0xa4] ss:$2 sm:$0xff] }
  0x6d   : > { %2951 = vmatmul.mubr.msk.bf16.gmra.mxu1 %vm444_vm1, %v566_v27  ;;  %v1282_v27 = vpack.c.bf16 %v1261_v24, %v1259_v23  ;;  %v1629_v23 = vld [vmem:[#allocation2 + $0x94] ss:$2 sm:$0xff] }
  0x6e   : > { %2954 = vmatprep.mubr.msk.bf16.mxu1 %vm3257_vm2, %v3256_v1 }
  0x73   : > { %2989 = vmatmul.mubr.msk.bf16.gmra.mxu0 %vm444_vm1, %v919_v32  ;;  %v1082_v32 = vld [vmem:[#allocation2 + $0xe2] ss:$2 sm:$0xff] }
  0x74   : > { %2992 = vmatprep.mubr.msk.bf16.mxu0 %vm3257_vm2, %v3256_v1  ;;  %v1094_v34 = vpack.c.bf16 %v1082_v32, %v1081_v31  ;;  %v1472_v31 = vpack.c.bf16 %v1451_v26, %v1449_v25  ;;  %v1467_v25 = vld [vmem:[#allocation2 + $0x124] ss:$2 sm:$0xff] }
  0x75   : > { %2955 = vmatmul.mubr.msk.bf16.gmra.mxu1 %vm444_vm1, %v567_v33  ;;  %v1283_v33 = vpack.c.bf16 %v1265_v30, %v1263_v29 }
  0x76   : > { %2958 = vmatprep.mubr.msk.bf16.mxu1 %vm3257_vm2, %v3256_v1 }
  0x7b   : > { %2993 = vmatmul.mubr.msk.bf16.gmra.mxu0 %vm444_vm1, %v920_v38  ;;  %v1084_v38 = vld [vmem:[#allocation2 + $0x102] ss:$2 sm:$0xff] }
  0x7c   : > { %2996 = vmatprep.mubr.msk.bf16.mxu0 %vm3257_vm2, %v3256_v1  ;;  %v1095_v40 = vpack.c.bf16 %v1084_v38, %v1083_v37  ;;  %v1631_v37 = vld [vmem:[#allocation2 + $0xb4] ss:$2 sm:$0xff] }
  0x7d   : > { %2959 = vmatmul.mubr.msk.bf16.gmra.mxu1 %vm444_vm1, %v568_v39  ;;  %v1284_v39 = vpack.c.bf16 %v1269_v36, %v1267_v35  ;;  %v1630_v36 = vld [vmem:[#allocation2 + $0xa4] ss:$2 sm:$0xff] }
  0x7e   : > { %2962 = vmatprep.mubr.msk.bf16.mxu1 %vm3257_vm2, %v3256_v1 }
  0x83   : > { %2997 = vmatmul.mubr.msk.bf16.gmra.mxu0 %vm444_vm1, %v921_v44  ;;  %v1087_v44 = vld [vmem:[#allocation2 + $0x122] ss:$2 sm:$0xff] }
  0x84   : > { %3000 = vmatprep.mubr.msk.bf16.mxu0 %vm3257_vm2, %v3256_v1  ;;  %v1096_v46 = vpack.c.bf16 %v1087_v44, %v1085_v43  ;;  %v1645_v43 = vpack.c.bf16 %v1631_v37, %v1630_v36 }
  0x85   : > { %2963 = vmatmul.mubr.msk.bf16.gmra.mxu1 %vm444_vm1, %v569_v45  ;;  %v1285_v45 = vpack.c.bf16 %v1273_v42, %v1271_v41 }
  0x86   : > { %2966 = vmatprep.mubr.msk.bf16.mxu1 %vm3257_vm2, %v3256_v1 }
  0x8b   : > { %3001 = vmatmul.mubr.msk.bf16.gmra.mxu0 %vm444_vm1, %v922_v9  ;;  %v1435_v9 = vld [vmem:[#allocation2 + $0x24] ss:$2 sm:$0xff] }
  0x8c   : > { %3004 = vmatprep.mubr.msk.bf16.mxu0 %vm3257_vm2, %v3256_v1  ;;  %v1468_v52 = vpack.c.bf16 %v1435_v9, %v1433_v49  ;;  %v1632_v9 = vld [vmem:[#allocation2 + $0xc4] ss:$2 sm:$0xff] }
  0x8d   : > { %2967 = vmatmul.mubr.msk.bf16.gmra.mxu1 %vm444_vm1, %v570_v50  ;;  %v1286_v50 = vpack.c.bf16 %v1277_v48, %v1275_v47 }
  0x8e   : > { %3010 = vmatprep.mubr.msk.bf16.mxu1 %vm3257_vm2, %v3256_v1 }
  0x93   : > { %3005 = vmatmul.mubr.msk.bf16.gmra.mxu0 %vm444_vm1, %v923_v10  ;;  %v1623_v10 = vld [vmem:[#allocation2 + $0x34] ss:$2 sm:$0xff] }
  0x94   : > { %3048 = vmatprep.mubr.msk.bf16.mxu0 %vm3257_vm2, %v3256_v1  ;;  %v1641_v58 = vpack.c.bf16 %v1623_v10, %v1622_v54 }
  0x95   : > { %3011 = vmatmul.mubr.msk.bf16.vlgmr.msra.gmra.mxu1 %vm444_vm1, %v1088_v56  ;;  %v1439_v56 = vld [vmem:[#allocation2 + $0x44] ss:$2 sm:$0xff] }
  0x96   : > { %3085 = vmatpush3.bf16.msra.mxu1 %v1505_v57  ;;  %3014 = vmatprep.mubr.msk.bf16.mxu1 %vm3257_vm2, %v3256_v1  ;;  %v526_v57 = vld [vmem:[%s4086_s3 + $0x10] sm:$0x3]  ;;  %v1469_v59 = vpack.c.bf16 %v1439_v56, %v1437_v55 }
  0x97   : > { %3160 = vmatprep.subr.bf16.mxu1 %v3256_v1  ;;  %v2058_v60 = vsel %vm643_vm0, %v526_v57, 0 }
  0x9b   : > { %3049 = vmatmul.mubr.msk.bf16.vlgmr.msra.gmra.mxu0 %vm444_vm1, %v1278_v63  ;;  %v1441_v63 = vld [vmem:[#allocation2 + $0x54] ss:$2 sm:$0xff] }
  0x9c   : > { %3123 = vmatpush3.bf16.msra.mxu0 %v1678_v5  ;;  %3052 = vmatprep.mubr.msk.bf16.mxu0 %vm3257_vm2, %v3256_v1  ;;  %v1642_v5 = vpack.c.bf16 %v1625_v62, %v1624_v61  ;;  %v1634_v62 = vld [vmem:[#allocation2 + $0xe4] ss:$2 sm:$0xff] }
  0x9d   : > { %3015 = vmatmul.mubr.msk.bf16.gmra.mxu1 %vm444_vm1, %v1089_v0  ;;  %3198 = vmatprep.subr.bf16.mxu0 %v3256_v1  ;;  %v1443_v0 = vld [vmem:[#allocation2 + $0x64] ss:$2 sm:$0xff] }
  0x9e   : > { %3018 = vmatprep.mubr.msk.bf16.mxu1 %vm3257_vm2, %v3256_v1  ;;  %v1470_v2 = vpack.c.bf16 %v1443_v0, %v1441_v63  ;;  %v1635_v63 = vld [vmem:[#allocation2 + $0xf4] ss:$2 sm:$0xff] }
  0xa3   : > { %3053 = vmatmul.mubr.msk.bf16.gmra.mxu0 %vm444_vm1, %v1279_v17  ;;  %v1627_v17 = vld [vmem:[#allocation2 + $0x74] ss:$2 sm:$0xff] }
  0xa4   : > { %3056 = vmatprep.mubr.msk.bf16.mxu0 %vm3257_vm2, %v3256_v1 }
  0xa5   : > { %3019 = vmatmul.mubr.msk.bf16.gmra.mxu1 %vm444_vm1, %v1090_v7 }
  0xa6   : > { %3022 = vmatprep.mubr.msk.bf16.mxu1 %vm3257_vm2, %v3256_v1 }
  0xab   : > { %3057 = vmatmul.mubr.msk.bf16.gmra.mxu0 %vm444_vm1, %v1280_v15  ;;  %v1643_v15 = vpack.c.bf16 %v1627_v17, %v1626_v6 }
  0xac   : > { %3060 = vmatprep.mubr.msk.bf16.mxu0 %vm3257_vm2, %v3256_v1 }
  0xad   : > { %3023 = vmatmul.mubr.msk.bf16.gmra.mxu1 %vm444_vm1, %v1091_v11 }
  0xae   : > { %3026 = vmatprep.mubr.msk.bf16.mxu1 %vm3257_vm2, %v3256_v1 }
  0xb3   : > { %3061 = vmatmul.mubr.msk.bf16.gmra.mxu0 %vm444_vm1, %v1281_v21 }
  0xb4   : > { %3064 = vmatprep.mubr.msk.bf16.mxu0 %vm3257_vm2, %v3256_v1 }
  0xb5   : > { %3027 = vmatmul.mubr.msk.bf16.gmra.mxu1 %vm444_vm1, %v1092_v22  ;;  %v1628_v22 = vld [vmem:[#allocation2 + $0x84] ss:$2 sm:$0xff] }
  0xb6   : > { %3030 = vmatprep.mubr.msk.bf16.mxu1 %vm3257_vm2, %v3256_v1  ;;  %v1644_v29 = vpack.c.bf16 %v1629_v23, %v1628_v22 }
  0xbb   : > { %3065 = vmatmul.mubr.msk.bf16.gmra.mxu0 %vm444_vm1, %v1282_v27 }
  0xbc   : > { %3068 = vmatprep.mubr.msk.bf16.mxu0 %vm3257_vm2, %v3256_v1 }
  0xbd   : > { %3031 = vmatmul.mubr.msk.bf16.gmra.mxu1 %vm444_vm1, %v1093_v28 }
  0xbe   : > { %3034 = vmatprep.mubr.msk.bf16.mxu1 %vm3257_vm2, %v3256_v1 }
  0xc3   : > { %3069 = vmatmul.mubr.msk.bf16.gmra.mxu0 %vm444_vm1, %v1283_v33 }
  0xc4   : > { %3072 = vmatprep.mubr.msk.bf16.mxu0 %vm3257_vm2, %v3256_v1 }
  0xc5   : > { %3035 = vmatmul.mubr.msk.bf16.gmra.mxu1 %vm444_vm1, %v1094_v34 }
  0xc6   : > { %3038 = vmatprep.mubr.msk.bf16.mxu1 %vm3257_vm2, %v3256_v1 }
  0xcb   : > { %3073 = vmatmul.mubr.msk.bf16.gmra.mxu0 %vm444_vm1, %v1284_v39  ;;  %v1453_v39 = vld [vmem:[#allocation2 + $0xb4] ss:$2 sm:$0xff] }
  0xcc   : > { %3076 = vmatprep.mubr.msk.bf16.mxu0 %vm3257_vm2, %v3256_v1 }
  0xcd   : > { %3039 = vmatmul.mubr.msk.bf16.gmra.mxu1 %vm444_vm1, %v1095_v40  ;;  %v1455_v40 = vld [vmem:[#allocation2 + $0xc4] ss:$2 sm:$0xff] }
  0xce   : > { %3042 = vmatprep.mubr.msk.bf16.mxu1 %vm3257_vm2, %v3256_v1 }
  0xd3   : > { %3077 = vmatmul.mubr.msk.bf16.gmra.mxu0 %vm444_vm1, %v1285_v45  ;;  %v1473_v45 = vpack.c.bf16 %v1455_v40, %v1453_v39  ;;  %v1638_v40 = vld [vmem:[#allocation2 + $0x124] ss:$2 sm:$0xff] }
  0xd4   : > { %3080 = vmatprep.mubr.msk.bf16.mxu0 %vm3257_vm2, %v3256_v1 }
  0xd5   : > { %3043 = vmatmul.mubr.msk.bf16.gmra.mxu1 %vm444_vm1, %v1096_v46 }
  0xd6   : > { %3086 = vmatprep.mubr.msk.bf16.mxu1 %vm3257_vm2, %v3256_v1 }
  0xdb   : > { %3081 = vmatmul.mubr.msk.bf16.gmra.mxu0 %vm444_vm1, %v1286_v50  ;;  %v1633_v50 = vld [vmem:[#allocation2 + $0xd4] ss:$2 sm:$0xff] }
  0xdc   : > { %3124 = vmatprep.mubr.msk.bf16.mxu0 %vm3257_vm2, %v3256_v1  ;;  %v1646_v55 = vpack.c.bf16 %v1633_v50, %v1632_v9 }
  0xdd   : > { %3087 = vmatmul.mubr.msk.bf16.vlgmr.msra.gmra.mxu1 %vm444_vm1, %v1468_v52  ;;  %v1457_v52 = vld [vmem:[#allocation2 + $0xd4] ss:$2 sm:$0xff] }
  0xde   : > { %3161 = vmatpush3.bf16.msra.mxu1 %v1868_v53  ;;  %3090 = vmatprep.mubr.msk.bf16.mxu1 %vm3257_vm2, %v3256_v1  ;;  %v1459_v53 = vld [vmem:[#allocation2 + $0xe4] ss:$2 sm:$0xff] }
  0xdf   : > { %v1474_v57 = vpack.c.bf16 %v1459_v53, %v1457_v52 }
  0xe3   : > { %3125 = vmatmul.mubr.msk.bf16.vlgmr.msra.gmra.mxu0 %vm444_vm1, %v1641_v58 }
  0xe4   : > { %3199 = vmatpush3.bf16.msra.mxu0 %v2058_v60  ;;  %3128 = vmatprep.mubr.msk.bf16.mxu0 %vm3257_vm2, %v3256_v1 }
  0xe5   : > { %3091 = vmatmul.mubr.msk.bf16.gmra.mxu1 %vm444_vm1, %v1469_v59 }
  0xe6   : > { %3094 = vmatprep.mubr.msk.bf16.mxu1 %vm3257_vm2, %v3256_v1 }
  0xeb   : > { %v3725_v3 = vpop.f32.mrf.mxu0  ;;  %3129 = vmatmul.mubr.msk.bf16.gmra.mxu0 %vm444_vm1, %v1642_v5 }
  0xec   : > { %3132 = vmatprep.mubr.msk.bf16.mxu0 %vm3257_vm2, %v3256_v1 }
  0xed   : > { %v719_v4 = vpop.f32.mrf.mxu1  ;;  %3095 = vmatmul.mubr.msk.bf16.gmra.mxu1 %vm444_vm1, %v1470_v2  ;;  %v2898_v7 = vpop.f32.mrf.mxu0  ;;  %v1461_v2 = vld [vmem:[#allocation2 + $0xf4] ss:$2 sm:$0xff] }
  0xee   : > { %3098 = vmatprep.mubr.msk.bf16.mxu1 %vm3257_vm2, %v3256_v1  ;;  %v1463_v4 = vld [vmem:[#allocation2 + $0x104] ss:$2 sm:$0xff]  ;;  %v1647_v7 = vpack.c.bf16 %v1635_v63, %v1634_v62  ;;  %v1802_v63 = vld [vmem:[#allocation2 + $0x55] ss:$2 sm:$0xff] }
  0xef   : > { %v2918_v13 = vpop.f32.mrf.mxu1  ;;  %v684_v14 = vpop.f32.mrf.mxu0  ;;  %v1475_v12 = vpack.c.bf16 %v1463_v4, %v1461_v2 }
  0xf1   : > { %v3733_v11 = vpop.f32.mrf.mxu1  ;;  %v2899_v18 = vpop.f32.mrf.mxu0 }
  0xf3   : > { %v2919_v19 = vpop.f32.mrf.mxu1  ;;  %v3735_v20 = vpop.f32.mrf.mxu0  ;;  %3133 = vmatmul.mubr.msk.bf16.gmra.mxu0 %vm444_vm1, %v1643_v15 }
  0xf4   : > { %3136 = vmatprep.mubr.msk.bf16.mxu0 %vm3257_vm2, %v3256_v1  ;;  %v1637_v19 = vld [vmem:[#allocation2 + $0x114] ss:$2 sm:$0xff] }
  0xf5   : > { %v3738_v21 = vpop.f32.mrf.mxu1  ;;  %3099 = vmatmul.mubr.msk.bf16.gmra.mxu1 %vm444_vm1, %v1471_v16  ;;  %v2902_v24 = vpop.f32.mrf.mxu0 }
  0xf6   : > { %3102 = vmatprep.mubr.msk.bf16.mxu1 %vm3257_vm2, %v3256_v1  ;;  %v1465_v24 = vld [vmem:[#allocation2 + $0x114] ss:$2 sm:$0xff] }
  0xf7   : > { %v2922_v27 = vpop.f32.mrf.mxu1  ;;  %v3745_v28 = vpop.f32.mrf.mxu0 }
  0xf9   : > { %v3747_v30 = vpop.f32.mrf.mxu1  ;;  %v2903_v32 = vpop.f32.mrf.mxu0 }
  0xfa   : > { %v1476_v32 = vpack.c.bf16 %v1467_v25, %v1465_v24 }
  0xfb   : > { %v2923_v33 = vpop.f32.mrf.mxu1  ;;  %v3749_v34 = vpop.f32.mrf.mxu0  ;;  %3137 = vmatmul.mubr.msk.bf16.gmra.mxu0 %vm444_vm1, %v1644_v29 }
  0xfc   : > { %3140 = vmatprep.mubr.msk.bf16.mxu0 %vm3257_vm2, %v3256_v1 }
  0xfd   : > { %v3752_v35 = vpop.f32.mrf.mxu1  ;;  %3103 = vmatmul.mubr.msk.bf16.gmra.mxu1 %vm444_vm1, %v1472_v31  ;;  %v2906_v38 = vpop.f32.mrf.mxu0 }
  0xfe   : > { %3106 = vmatprep.mubr.msk.bf16.mxu1 %vm3257_vm2, %v3256_v1 }
  0xff   : > { %v2926_v41 = vpop.f32.mrf.mxu1  ;;  %v3759_v42 = vpop.f32.mrf.mxu0 }
 0x100   : > { %v1640_v41 = vld [vmem:[#allocation2 + $0x134] ss:$2 sm:$0xff] }
 0x101   : > { %v3761_v44 = vpop.f32.mrf.mxu1  ;;  %v2907_v46 = vpop.f32.mrf.mxu0  ;;  %v1649_v50 = vpack.c.bf16 %v1640_v41, %v1638_v40  ;;  %v1808_v41 = vld [vmem:[#allocation2 + $0x85] ss:$2 sm:$0xff] }
 0x102   : > { %v1798_v46 = vld [vmem:[#allocation2 + $0x35] ss:$2 sm:$0xff] }
 0x103   : > { %v2927_v47 = vpop.f32.mrf.mxu1  ;;  %v3763_v48 = vpop.f32.mrf.mxu0  ;;  %3141 = vmatmul.mubr.msk.bf16.gmra.mxu0 %vm444_vm1, %v1645_v43 }
 0x104   : > { %3144 = vmatprep.mubr.msk.bf16.mxu0 %vm3257_vm2, %v3256_v1 }
 0x105   : > { %v3766_v49 = vpop.f32.mrf.mxu1  ;;  %3107 = vmatmul.mubr.msk.bf16.gmra.mxu1 %vm444_vm1, %v1473_v45  ;;  %v2910_v51 = vpop.f32.mrf.mxu0 }
 0x106   : > { %3110 = vmatprep.mubr.msk.bf16.mxu1 %vm3257_vm2, %v3256_v1 }
 0x107   : > { %v2930_v54 = vpop.f32.mrf.mxu1  ;;  %v3773_v10 = vpop.f32.mrf.mxu0 }
 0x109   : > { %v745_v56 = vpop.f32.mrf.mxu1  ;;  %v2911_v58 = vpop.f32.mrf.mxu0 }
 0x10b   : > { %v2931_v59 = vpop.f32.mrf.mxu1  ;;  %v712_v60 = vpop.f32.mrf.mxu0  ;;  %3145 = vmatmul.mubr.msk.bf16.gmra.mxu0 %vm444_vm1, %v1646_v55 }
 0x10c   : > { %3148 = vmatprep.mubr.msk.bf16.mxu0 %vm3257_vm2, %v3256_v1  ;;  %v1986_v59 = vld [vmem:[#allocation2 + $0x26] ss:$2 sm:$0xff]  ;;  %v1988_v60 = vld [vmem:[#allocation2 + $0x36] ss:$2 sm:$0xff] }
 0x10d   : > { %v812_v61 = vpop.f32.mrf.mxu1  ;;  %3111 = vmatmul.mubr.msk.bf16.gmra.mxu1 %vm444_vm1, %v1474_v57  ;;  %v2914_v5 = vpop.f32.mrf.mxu0  ;;  %v2021_v2 = vpack.c.bf16 %v1988_v60, %v1986_v59  ;;  %v1814_v59 = vld [vmem:[#allocation2 + $0xb5] ss:$2 sm:$0xff] }
 0x10e   : > { %v813_v0 = vadd.f32 %v812_v61, %v3725_v3  ;;  %3114 = vmatprep.mubr.msk.bf16.mxu1 %vm3257_vm2, %v3256_v1  ;;  %v1636_v3 = vld [vmem:[#allocation2 + $0x104] ss:$2 sm:$0xff] }
 0x10f   : > { %v2936_v6 = vpop.f32.mrf.mxu1  ;;  %v3782_v17 = vpop.f32.mrf.mxu0  ;;  %v1648_v29 = vpack.c.bf16 %v1637_v19, %v1636_v3  ;;  %v1992_v3 = vld [vmem:[#allocation2 + $0x56] ss:$2 sm:$0xff] }
 0x111   : > { %v815_v8 = vpop.f32.mrf.mxu1  ;;  %v2915_v13 = vpop.f32.mrf.mxu0 }
 0x113   : > { %v2937_v14 = vpop.f32.mrf.mxu1  ;;  %v988_v15 = vpop.f32.mrf.mxu0  ;;  %3149 = vmatmul.mubr.msk.bf16.gmra.mxu0 %vm444_vm1, %v1647_v7 }
 0x114   : > { %v3785_v18 = vadd.f32 %v988_v15, %v813_v0  ;;  %3152 = vmatprep.mubr.msk.bf16.mxu0 %vm3257_vm2, %v3256_v1 }
 0x115   : > { %v819_v16 = vpop.f32.mrf.mxu1  ;;  %3115 = vmatmul.mubr.msk.bf16.gmra.mxu1 %vm444_vm1, %v1475_v12  ;;  %v2974_v23 = vpop.f32.mrf.mxu0 }
 0x116   : > { %v820_v22 = vadd.f32 %v819_v16, %v3735_v20  ;;  %3118 = vmatprep.mubr.msk.bf16.mxu1 %vm3257_vm2, %v3256_v1  ;;  %v1990_v16 = vld [vmem:[#allocation2 + $0x46] ss:$2 sm:$0xff] }
 0x117   : > { %v2940_v26 = vpop.f32.mrf.mxu1  ;;  %v991_v27 = vpop.f32.mrf.mxu0  ;;  %v2022_v25 = vpack.c.bf16 %v1992_v3, %v1990_v16  ;;  %v1816_v16 = vld [vmem:[#allocation2 + $0xc5] ss:$2 sm:$0xff] }
 0x119   : > { %v822_v31 = vpop.f32.mrf.mxu1  ;;  %v2975_v36 = vpop.f32.mrf.mxu0 }
 0x11a   : > { %v823_v33 = vadd.f32 %v822_v31, %v3745_v28  ;;  %v1796_v28 = vld [vmem:[#allocation2 + $0x25] ss:$2 sm:$0xff] }
 0x11b   : > { %v2941_v37 = vpop.f32.mrf.mxu1  ;;  %v995_v38 = vpop.f32.mrf.mxu0  ;;  %3153 = vmatmul.mubr.msk.bf16.gmra.mxu0 %vm444_vm1, %v1648_v29  ;;  %v1831_v53 = vpack.c.bf16 %v1798_v46, %v1796_v28 }
 0x11c   : > { %v3795_v20 = vadd.f32 %v995_v38, %v820_v22  ;;  %3156 = vmatprep.mubr.msk.bf16.mxu0 %vm3257_vm2, %v3256_v1  ;;  %v1806_v22 = vld [vmem:[#allocation2 + $0x75] ss:$2 sm:$0xff]  ;;  %v1994_v38 = vld [vmem:[#allocation2 + $0x66] ss:$2 sm:$0xff] }
 0x11d   : > { %v827_v39 = vpop.f32.mrf.mxu1  ;;  %3119 = vmatmul.mubr.msk.bf16.gmra.mxu1 %vm444_vm1, %v1476_v32  ;;  %v2978_v45 = vpop.f32.mrf.mxu0 }
 0x11e   : > { %v828_v43 = vadd.f32 %v827_v39, %v3749_v34  ;;  %3162 = vmatprep.mubr.msk.bf16.mxu1 %vm3257_vm2, %v3256_v1  ;;  %v1996_v39 = vld [vmem:[#allocation2 + $0x76] ss:$2 sm:$0xff] }
 0x11f   : > { %v2944_v47 = vpop.f32.mrf.mxu1  ;;  %v998_v9 = vpop.f32.mrf.mxu0  ;;  %v2023_v28 = vpack.c.bf16 %v1996_v39, %v1994_v38  ;;  %v1820_v39 = vld [vmem:[#allocation2 + $0xe5] ss:$2 sm:$0xff] }
 0x120   : > { %v3803_v52 = vadd.f32 %v998_v9, %v823_v33 }
 0x121   : > { %v830_v51 = vpop.f32.mrf.mxu1  ;;  %v2979_v55 = vpop.f32.mrf.mxu0 }
 0x122   : > { %v831_v54 = vadd.f32 %v830_v51, %v3759_v42  ;;  %v1800_v42 = vld [vmem:[#allocation2 + $0x45] ss:$2 sm:$0xff]  ;;  %v1998_v55 = vld [vmem:[#allocation2 + $0x86] ss:$2 sm:$0xff] }
 0x123   : > { %v2945_v56 = vpop.f32.mrf.mxu1  ;;  %v1003_v57 = vpop.f32.mrf.mxu0  ;;  %3157 = vmatmul.mubr.msk.bf16.gmra.mxu0 %vm444_vm1, %v1649_v50  ;;  %v1832_v7 = vpack.c.bf16 %v1802_v63, %v1800_v42 }
 0x124   : > { %v3807_v58 = vadd.f32 %v1003_v57, %v828_v43  ;;  %3200 = vmatprep.mubr.msk.bf16.mxu0 %vm3257_vm2, %v3256_v1  ;;  %v1810_v43 = vld [vmem:[#allocation2 + $0x95] ss:$2 sm:$0xff]  ;;  %v2000_v56 = vld [vmem:[#allocation2 + $0x96] ss:$2 sm:$0xff] }
 0x125   : > { %v835_v34 = vpop.f32.mrf.mxu1  ;;  %3163 = vmatmul.mubr.msk.bf16.vlgmr.msra.gmra.mxu1 %vm444_vm1, %v1831_v53  ;;  %v2982_v62 = vpop.f32.mrf.mxu0  ;;  %v1834_v9 = vpack.c.bf16 %v1810_v43, %v1808_v41  ;;  %v2024_v42 = vpack.c.bf16 %v2000_v56, %v1998_v55  ;;  %v2012_v56 = vld [vmem:[#allocation2 + $0xf6] ss:$2 sm:$0xff] }
 0x126   : > { %v836_v61 = vadd.f32 %v835_v34, %v3763_v48  ;;  %3166 = vmatprep.mubr.msk.bf16.mxu1 %vm3257_vm2, %v3256_v1  ;;  %v1812_v34 = vld [vmem:[#allocation2 + $0xa5] ss:$2 sm:$0xff] }
 0x127   : > { %v2948_v0 = vpop.f32.mrf.mxu1  ;;  %v1006_v5 = vpop.f32.mrf.mxu0 }
 0x128   : > { %v3815_v6 = vadd.f32 %v1006_v5, %v831_v54  ;;  %v1835_v5 = vpack.c.bf16 %v1814_v59, %v1812_v34  ;;  %v1826_v59 = vld [vmem:[#allocation2 + $0x115] ss:$2 sm:$0xff] }
 0x129   : > { %v838_v4 = vpop.f32.mrf.mxu1  ;;  %v2983_v12 = vpop.f32.mrf.mxu0 }
 0x12a   : > { %v839_v8 = vadd.f32 %v838_v4, %v3773_v10  ;;  %v1804_v10 = vld [vmem:[#allocation2 + $0x65] ss:$2 sm:$0xff] }
 0x12b   : > { %v2949_v13 = vpop.f32.mrf.mxu1  ;;  %v1011_v14 = vpop.f32.mrf.mxu0  ;;  %3201 = vmatmul.mubr.msk.bf16.vlgmr.msra.gmra.mxu0 %vm444_vm1, %v2021_v2  ;;  %v1833_v29 = vpack.c.bf16 %v1806_v22, %v1804_v10 }
 0x12c   : > { %v3819_v15 = vadd.f32 %v1011_v14, %v836_v61  ;;  %3204 = vmatprep.mubr.msk.bf16.mxu0 %vm3257_vm2, %v3256_v1  ;;  %v2004_v14 = vld [vmem:[#allocation2 + $0xb6] ss:$2 sm:$0xff] }
 0x12d   : > { %v843_v48 = vpop.f32.mrf.mxu1  ;;  %3167 = vmatmul.mubr.msk.bf16.gmra.mxu1 %vm444_vm1, %v1832_v7  ;;  %v2986_v19 = vpop.f32.mrf.mxu0 }
 0x12e   : > { %3170 = vmatprep.mubr.msk.bf16.mxu1 %vm3257_vm2, %v3256_v1 }
 0x12f   : > { %v2952_v23 = vpop.f32.mrf.mxu1  ;;  %v1014_v24 = vpop.f32.mrf.mxu0 }
 0x130   : > { %v3826_v27 = vadd.f32 %v1014_v24, %v839_v8 }
 0x131   : > { %v845_v26 = vpop.f32.mrf.mxu1  ;;  %v2987_v32 = vpop.f32.mrf.mxu0 }
 0x132   : > { %v846_v31 = vadd.f32 %v845_v26, %v3782_v17 }
 0x133   : > { %v2953_v33 = vpop.f32.mrf.mxu1  ;;  %v1019_v36 = vpop.f32.mrf.mxu0  ;;  %3205 = vmatmul.mubr.msk.bf16.gmra.mxu0 %vm444_vm1, %v2022_v25 }
 0x134   : > { %3208 = vmatprep.mubr.msk.bf16.mxu0 %vm3257_vm2, %v3256_v1 }
 0x135   : > { %v850_v37 = vpop.f32.mrf.mxu1  ;;  %3171 = vmatmul.mubr.msk.bf16.gmra.mxu1 %vm444_vm1, %v1833_v29  ;;  %v2990_v40 = vpop.f32.mrf.mxu0 }
 0x136   : > { %3174 = vmatprep.mubr.msk.bf16.mxu1 %vm3257_vm2, %v3256_v1  ;;  %v2008_v37 = vld [vmem:[#allocation2 + $0xd6] ss:$2 sm:$0xff] }
 0x137   : > { %v2956_v17 = vpop.f32.mrf.mxu1  ;;  %v1021_v45 = vpop.f32.mrf.mxu0 }
 0x138   : > { %v3835_v47 = vadd.f32 %v1021_v45, %v846_v31 }
 0x139   : > { %v852_v46 = vpop.f32.mrf.mxu1  ;;  %v2991_v50 = vpop.f32.mrf.mxu0 }
 0x13a   : > { %v853_v60 = vadd.f32 %v852_v46, %v3733_v11  ;;  %v2002_v11 = vld [vmem:[#allocation2 + $0xa6] ss:$2 sm:$0xff] }
 0x13b   : > { %v2957_v51 = vpop.f32.mrf.mxu1  ;;  %v1026_v53 = vpop.f32.mrf.mxu0  ;;  %3209 = vmatmul.mubr.msk.bf16.gmra.mxu0 %vm444_vm1, %v2023_v28  ;;  %v2025_v22 = vpack.c.bf16 %v2004_v14, %v2002_v11 }
 0x13c   : > { %3212 = vmatprep.mubr.msk.bf16.mxu0 %vm3257_vm2, %v3256_v1 }
 0x13d   : > { %v857_v54 = vpop.f32.mrf.mxu1  ;;  %3175 = vmatmul.mubr.msk.bf16.gmra.mxu1 %vm444_vm1, %v1834_v9  ;;  %v2994_v57 = vpop.f32.mrf.mxu0 }
 0x13e   : > { %3178 = vmatprep.mubr.msk.bf16.mxu1 %vm3257_vm2, %v3256_v1  ;;  %v858_v4 = vadd.f32 %v857_v54, %v3738_v21  ;;  %v1818_v21 = vld [vmem:[#allocation2 + $0xd5] ss:$2 sm:$0xff] }
 0x13f   : > { %v2960_v61 = vpop.f32.mrf.mxu1  ;;  %v1028_v62 = vpop.f32.mrf.mxu0  ;;  %v1836_v25 = vpack.c.bf16 %v1818_v21, %v1816_v16  ;;  %v1830_v16 = vld [vmem:[#allocation2 + $0x135] ss:$2 sm:$0xff] }
 0x140   : > { %v3844_v0 = vadd.f32 %v1028_v62, %v853_v60 }
 0x141   : > { %v860_v63 = vpop.f32.mrf.mxu1  ;;  %v2995_v2 = vpop.f32.mrf.mxu0 }
 0x142   : > { %v861_v3 = vadd.f32 %v860_v63, %v3747_v30  ;;  %v2006_v30 = vld [vmem:[#allocation2 + $0xc6] ss:$2 sm:$0xff] }
 0x143   : > { %v2961_v7 = vpop.f32.mrf.mxu1  ;;  %v1033_v8 = vpop.f32.mrf.mxu0  ;;  %3213 = vmatmul.mubr.msk.bf16.gmra.mxu0 %vm444_vm1, %v2024_v42  ;;  %v2026_v17 = vpack.c.bf16 %v2008_v37, %v2006_v30 }
 0x144   : > { %v3848_v13 = vadd.f32 %v1033_v8, %v858_v4  ;;  %3216 = vmatprep.mubr.msk.bf16.mxu0 %vm3257_vm2, %v3256_v1 }
 0x145   : > { %v865_v12 = vpop.f32.mrf.mxu1  ;;  %3179 = vmatmul.mubr.msk.bf16.gmra.mxu1 %vm444_vm1, %v1835_v5  ;;  %v2998_v48 = vpop.f32.mrf.mxu0 }
 0x146   : > { %3182 = vmatprep.mubr.msk.bf16.mxu1 %vm3257_vm2, %v3256_v1  ;;  %v866_v29 = vadd.f32 %v865_v12, %v3752_v35  ;;  %v1822_v35 = vld [vmem:[#allocation2 + $0xf5] ss:$2 sm:$0xff]  ;;  %v2016_v12 = vld [vmem:[#allocation2 + $0x116] ss:$2 sm:$0xff]  ;;  %v1828_v48 = vld [vmem:[#allocation2 + $0x125] ss:$2 sm:$0xff] }
 0x147   : > { %v2964_v19 = vpop.f32.mrf.mxu1  ;;  %v1036_v10 = vpop.f32.mrf.mxu0  ;;  %v1837_v46 = vpack.c.bf16 %v1822_v35, %v1820_v39 }
 0x148   : > { %v3856_v24 = vadd.f32 %v1036_v10, %v861_v3 }
 0x149   : > { %v868_v23 = vpop.f32.mrf.mxu1  ;;  %v2999_v26 = vpop.f32.mrf.mxu0 }
 0x14a   : > { %v869_v40 = vadd.f32 %v868_v23, %v3761_v44  ;;  %v2010_v44 = vld [vmem:[#allocation2 + $0xe6] ss:$2 sm:$0xff] }
 0x14b   : > { %v2965_v31 = vpop.f32.mrf.mxu1  ;;  %v1041_v32 = vpop.f32.mrf.mxu0  ;;  %3217 = vmatmul.mubr.msk.bf16.gmra.mxu0 %vm444_vm1, %v2025_v22  ;;  %v2027_v62 = vpack.c.bf16 %v2012_v56, %v2010_v44  ;;  %v1839_v22 = vpack.c.bf16 %v1830_v16, %v1828_v48 }
 0x14c   : > { %v3860_v36 = vadd.f32 %v1041_v32, %v866_v29  ;;  %3220 = vmatprep.mubr.msk.bf16.mxu0 %vm3257_vm2, %v3256_v1  ;;  %v2018_v32 = vld [vmem:[#allocation2 + $0x126] ss:$2 sm:$0xff] }
 0x14d   : > { %v873_v33 = vpop.f32.mrf.mxu1  ;;  %3183 = vmatmul.mubr.msk.bf16.gmra.mxu1 %vm444_vm1, %v1836_v25  ;;  %v3002_v38 = vpop.f32.mrf.mxu0 }
 0x14e   : > { %3186 = vmatprep.mubr.msk.bf16.mxu1 %vm3257_vm2, %v3256_v1  ;;  %v874_v50 = vadd.f32 %v873_v33, %v3766_v49  ;;  %v1824_v49 = vld [vmem:[#allocation2 + $0x105] ss:$2 sm:$0xff]  ;;  %v2020_v33 = vld [vmem:[#allocation2 + $0x136] ss:$2 sm:$0xff] }
 0x14f   : > { %v2968_v41 = vpop.f32.mrf.mxu1  ;;  %v1044_v43 = vpop.f32.mrf.mxu0  ;;  %v1838_v63 = vpack.c.bf16 %v1826_v59, %v1824_v49  ;;  %v2029_v39 = vpack.c.bf16 %v2020_v33, %v2018_v32 }
 0x150   : > { %v3868_v28 = vadd.f32 %v1044_v43, %v869_v40 }
 0x151   : > { %v876_v45 = vpop.f32.mrf.mxu1  ;;  %v3003_v9 = vpop.f32.mrf.mxu0 }
 0x153   : > { %v2969_v51 = vpop.f32.mrf.mxu1  ;;  %v1049_v53 = vpop.f32.mrf.mxu0  ;;  %3221 = vmatmul.mubr.msk.bf16.gmra.mxu0 %vm444_vm1, %v2026_v17 }
 0x154   : > { %v3872_v54 = vadd.f32 %v1049_v53, %v874_v50  ;;  %3224 = vmatprep.mubr.msk.bf16.mxu0 %vm3257_vm2, %v3256_v1 }
 0x155   : > { %v1161_v55 = vpop.f32.mrf.mxu1  ;;  %3187 = vmatmul.mubr.msk.bf16.gmra.mxu1 %vm444_vm1, %v1837_v46  ;;  %v3006_v34 = vpop.f32.mrf.mxu0 }
 0x156   : > { %v1228_v57 = vadd.f32 %v1161_v55, %v3785_v18  ;;  %3190 = vmatprep.mubr.msk.bf16.mxu1 %vm3257_vm2, %v3256_v1  ;;  %v2014_v18 = vld [vmem:[#allocation2 + $0x106] ss:$2 sm:$0xff] }
 0x157   : > { %v3012_v60 = vpop.f32.mrf.mxu1  ;;  %v1052_v61 = vpop.f32.mrf.mxu0  ;;  %v2028_v19 = vpack.c.bf16 %v2016_v12, %v2014_v18 }
 0x159   : > { %v1164_v42 = vpop.f32.mrf.mxu1  ;;  %v3007_v5 = vpop.f32.mrf.mxu0 }
 0x15b   : > { %v3013_v2 = vpop.f32.mrf.mxu1  ;;  %v1351_v4 = vpop.f32.mrf.mxu0  ;;  %3225 = vmatmul.mubr.msk.bf16.gmra.mxu0 %vm444_vm1, %v2027_v62 }
 0x15c   : > { %v3881_v8 = vadd.f32 %v1351_v4, %v1228_v57  ;;  %3228 = vmatprep.mubr.msk.bf16.mxu0 %vm3257_vm2, %v3256_v1 }
 0x15d   : > { %v1168_v7 = vpop.f32.mrf.mxu1  ;;  %3191 = vmatmul.mubr.msk.bf16.gmra.mxu1 %vm444_vm1, %v1838_v63  ;;  %v3050_v14 = vpop.f32.mrf.mxu0 }
 0x15e   : > { %v1229_v11 = vadd.f32 %v1168_v7, %v3795_v20  ;;  %3194 = vmatprep.mubr.msk.bf16.mxu1 %vm3257_vm2, %v3256_v1 }
 0x15f   : > { %v3016_v21 = vpop.f32.mrf.mxu1  ;;  %v1354_v3 = vpop.f32.mrf.mxu0 }
 0x161   : > { %v1171_v10 = vpop.f32.mrf.mxu1  ;;  %v3051_v25 = vpop.f32.mrf.mxu0 }
 0x162   : > { %v1230_v23 = vadd.f32 %v1171_v10, %v3803_v52 }
 0x163   : > { %v3017_v26 = vpop.f32.mrf.mxu1  ;;  %v1358_v29 = vpop.f32.mrf.mxu0  ;;  %3229 = vmatmul.mubr.msk.bf16.gmra.mxu0 %vm444_vm1, %v2028_v19 }
 0x164   : > { %v3891_v20 = vadd.f32 %v1358_v29, %v1229_v11  ;;  %3232 = vmatprep.mubr.msk.bf16.mxu0 %vm3257_vm2, %v3256_v1 }
 0x165   : > { %v1176_v31 = vpop.f32.mrf.mxu1  ;;  %3195 = vmatmul.mubr.msk.bf16.gmra.mxu1 %vm444_vm1, %v1839_v22  ;;  %v3054_v37 = vpop.f32.mrf.mxu0 }
 0x166   : > { %v1231_v30 = vadd.f32 %v1176_v31, %v3807_v58 }
 0x167   : > { %v3020_v38 = vpop.f32.mrf.mxu1  ;;  %v1361_v52 = vpop.f32.mrf.mxu0 }
 0x168   : > { %v3897_v40 = vadd.f32 %v1361_v52, %v1230_v23 }
 0x169   : > { %v1179_v35 = vpop.f32.mrf.mxu1  ;;  %v3055_v43 = vpop.f32.mrf.mxu0 }
 0x16a   : > { %v1232_v41 = vadd.f32 %v1179_v35, %v3815_v6 }
 0x16b   : > { %v3021_v17 = vpop.f32.mrf.mxu1  ;;  %v1366_v45 = vpop.f32.mrf.mxu0  ;;  %3233 = vmatmul.mubr.msk.bf16.gmra.mxu0 %vm444_vm1, %v2029_v39 }
 0x16c   : > { %v3901_v1 = vadd.f32 %v1366_v45, %v1231_v30 }
 0x16d   : > { %v1184_v46 = vpop.f32.mrf.mxu1  ;;  %v3058_v58 = vpop.f32.mrf.mxu0 }
 0x16e   : > { %v1233_v9 = vadd.f32 %v1184_v46, %v3819_v15 }
 0x16f   : > { %v3024_v50 = vpop.f32.mrf.mxu1  ;;  %v1369_v51 = vpop.f32.mrf.mxu0 }
 0x170   : > { %v3904_v55 = vadd.f32 %v1369_v51, %v1232_v41 }
 0x171   : > { %v1187_v53 = vpop.f32.mrf.mxu1  ;;  %v3059_v56 = vpop.f32.mrf.mxu0 }
 0x172   : > { %v1234_v44 = vadd.f32 %v1187_v53, %v3826_v27 }
 0x173   : > { %v3025_v6 = vpop.f32.mrf.mxu1  ;;  %v1374_v57 = vpop.f32.mrf.mxu0 }
 0x174   : > { %v3907_v49 = vadd.f32 %v1374_v57, %v1233_v9 }
 0x175   : > { %v1192_v34 = vpop.f32.mrf.mxu1  ;;  %v3062_v59 = vpop.f32.mrf.mxu0 }
 0x177   : > { %v3028_v60 = vpop.f32.mrf.mxu1  ;;  %v1377_v61 = vpop.f32.mrf.mxu0 }
 0x178   : > { %v3909_v42 = vadd.f32 %v1377_v61, %v1234_v44 }
 0x179   : > { %v1194_v62 = vpop.f32.mrf.mxu1  ;;  %v3063_v63 = vpop.f32.mrf.mxu0 }
 0x17a   : > { %v1235_v15 = vadd.f32 %v1194_v62, %v3835_v47 }
 0x17b   : > { %v3029_v5 = vpop.f32.mrf.mxu1  ;;  %v1382_v2 = vpop.f32.mrf.mxu0 }
 0x17d   : > { %v1199_v4 = vpop.f32.mrf.mxu1  ;;  %v3066_v7 = vpop.f32.mrf.mxu0 }
 0x17f   : > { %v3032_v27 = vpop.f32.mrf.mxu1  ;;  %v1384_v18 = vpop.f32.mrf.mxu0 }
 0x180   : > { %v3912_v11 = vadd.f32 %v1384_v18, %v1235_v15 }
 0x181   : > { %v1201_v12 = vpop.f32.mrf.mxu1  ;;  %v3067_v48 = vpop.f32.mrf.mxu0 }
 0x182   : > { %v1236_v14 = vadd.f32 %v1201_v12, %v3844_v0 }
 0x183   : > { %v3033_v16 = vpop.f32.mrf.mxu1  ;;  %v1389_v21 = vpop.f32.mrf.mxu0 }
 0x185   : > { %v1206_v3 = vpop.f32.mrf.mxu1  ;;  %v3070_v10 = vpop.f32.mrf.mxu0 }
 0x186   : > { %v1237_v19 = vadd.f32 %v1206_v3, %v3848_v13 }
 0x187   : > { %v3036_v47 = vpop.f32.mrf.mxu1  ;;  %v1391_v22 = vpop.f32.mrf.mxu0 }
 0x188   : > { %v3916_v25 = vadd.f32 %v1391_v22, %v1236_v14 }
 0x189   : > { %v1209_v23 = vpop.f32.mrf.mxu1  ;;  %v3071_v29 = vpop.f32.mrf.mxu0 }
 0x18a   : > { %v1238_v26 = vadd.f32 %v1209_v23, %v3856_v24 }
 0x18b   : > { %v3037_v31 = vpop.f32.mrf.mxu1  ;;  %v1396_v32 = vpop.f32.mrf.mxu0 }
 0x18c   : > { %v3919_v30 = vadd.f32 %v1396_v32, %v1237_v19 }
 0x18d   : > { %v1214_v33 = vpop.f32.mrf.mxu1  ;;  %v3074_v37 = vpop.f32.mrf.mxu0 }
 0x18e   : > { %v1239_v0 = vadd.f32 %v1214_v33, %v3860_v36 }
 0x18f   : > { %v3040_v38 = vpop.f32.mrf.mxu1  ;;  %v1399_v52 = vpop.f32.mrf.mxu0 }
 0x190   : > { %v3922_v39 = vadd.f32 %v1399_v52, %v1238_v26 }
 0x191   : > { %v1217_v13 = vpop.f32.mrf.mxu1  ;;  %v3075_v41 = vpop.f32.mrf.mxu0 }
 0x192   : > { %v1240_v35 = vadd.f32 %v1217_v13, %v3868_v28 }
 0x193   : > { %v3041_v43 = vpop.f32.mrf.mxu1  ;;  %v1404_v17 = vpop.f32.mrf.mxu0 }
 0x194   : > { %v3925_v45 = vadd.f32 %v1404_v17, %v1239_v0 }
 0x195   : > { %v1222_v24 = vpop.f32.mrf.mxu1  ;;  %v3078_v9 = vpop.f32.mrf.mxu0 }
 0x196   : > { %v1241_v46 = vadd.f32 %v1222_v24, %v3872_v54 }
 0x197   : > { %v3044_v58 = vpop.f32.mrf.mxu1  ;;  %v1407_v50 = vpop.f32.mrf.mxu0 }
 0x198   : > { %v3928_v51 = vadd.f32 %v1407_v50, %v1240_v35 }
 0x199   : > { %v1225_v36 = vpop.f32.mrf.mxu1  ;;  %v3079_v53 = vpop.f32.mrf.mxu0 }
 0x19b   : > { %v3045_v44 = vpop.f32.mrf.mxu1  ;;  %v1412_v56 = vpop.f32.mrf.mxu0 }
 0x19c   : > { %v3930_v6 = vadd.f32 %v1412_v56, %v1241_v46 }
 0x19d   : > { %v1541_v28 = vpop.f32.mrf.mxu1  ;;  %v3082_v34 = vpop.f32.mrf.mxu0 }
 0x19e   : > { %v1608_v57 = vadd.f32 %v1541_v28, %v3881_v8 }
 0x19f   : > { %v3088_v59 = vpop.f32.mrf.mxu1  ;;  %v1415_v60 = vpop.f32.mrf.mxu0 }
 0x1a1   : > { %v1544_v61 = vpop.f32.mrf.mxu1  ;;  %v3083_v62 = vpop.f32.mrf.mxu0 }
 0x1a3   : > { %v3089_v54 = vpop.f32.mrf.mxu1  ;;  %v1714_v15 = vpop.f32.mrf.mxu0 }
 0x1a4   : > { %v3933_v5 = vadd.f32 %v1714_v15, %v1608_v57 }
 0x1a5   : > { %v1548_v63 = vpop.f32.mrf.mxu1  ;;  %v3126_v4 = vpop.f32.mrf.mxu0 }
 0x1a6   : > { %v1609_v2 = vadd.f32 %v1548_v63, %v3891_v20 }
 0x1a7   : > { %v3092_v7 = vpop.f32.mrf.mxu1  ;;  %v1717_v27 = vpop.f32.mrf.mxu0 }
 0x1a9   : > { %v1551_v18 = vpop.f32.mrf.mxu1  ;;  %v3127_v14 = vpop.f32.mrf.mxu0 }
 0x1aa   : > { %v1610_v12 = vadd.f32 %v1551_v18, %v3897_v40 }
 0x1ab   : > { %v3093_v8 = vpop.f32.mrf.mxu1  ;;  %v1721_v48 = vpop.f32.mrf.mxu0 }
 0x1ac   : > { %v3937_v21 = vadd.f32 %v1721_v48, %v1609_v2 }
 0x1ad   : > { %v1556_v16 = vpop.f32.mrf.mxu1  ;;  %v3130_v19 = vpop.f32.mrf.mxu0 }
 0x1ae   : > { %v1611_v3 = vadd.f32 %v1556_v16, %v3901_v1 }
 0x1af   : > { %v3096_v10 = vpop.f32.mrf.mxu1  ;;  %v1724_v47 = vpop.f32.mrf.mxu0 }
 0x1b0   : > { %v3940_v23 = vadd.f32 %v1724_v47, %v1610_v12 }
 0x1b1   : > { %v1559_v22 = vpop.f32.mrf.mxu1  ;;  %v3131_v26 = vpop.f32.mrf.mxu0 }
 0x1b2   : > { %v1612_v20 = vadd.f32 %v1559_v22, %v3904_v55 }
 0x1b3   : > { %v3097_v29 = vpop.f32.mrf.mxu1  ;;  %v1729_v31 = vpop.f32.mrf.mxu0 }
 0x1b4   : > { %v3943_v32 = vadd.f32 %v1729_v31, %v1611_v3 }
 0x1b5   : > { %v1564_v40 = vpop.f32.mrf.mxu1  ;;  %v3134_v0 = vpop.f32.mrf.mxu0 }
 0x1b6   : > { %v1613_v33 = vadd.f32 %v1564_v40, %v3907_v49 }
 0x1b7   : > { %v3100_v37 = vpop.f32.mrf.mxu1  ;;  %v1732_v38 = vpop.f32.mrf.mxu0 }
 0x1b8   : > { %v3946_v52 = vadd.f32 %v1732_v38, %v1612_v20 }
 0x1b9   : > { %v1567_v1 = vpop.f32.mrf.mxu1  ;;  %v3135_v35 = vpop.f32.mrf.mxu0 }
 0x1ba   : > { %v1614_v13 = vadd.f32 %v1567_v1, %v3909_v42 }
 0x1bb   : > { %v3101_v41 = vpop.f32.mrf.mxu1  ;;  %v1737_v43 = vpop.f32.mrf.mxu0 }
 0x1bc   : > { %v3949_v17 = vadd.f32 %v1737_v43, %v1613_v33 }
 0x1bd   : > { %v1572_v55 = vpop.f32.mrf.mxu1  ;;  %v3138_v24 = vpop.f32.mrf.mxu0 }
 0x1bf   : > { %v3104_v46 = vpop.f32.mrf.mxu1  ;;  %v1740_v9 = vpop.f32.mrf.mxu0 }
 0x1c0   : > { %v3951_v50 = vadd.f32 %v1740_v9, %v1614_v13 }
 0x1c1   : > { %v1574_v58 = vpop.f32.mrf.mxu1  ;;  %v3139_v36 = vpop.f32.mrf.mxu0 }
 0x1c2   : > { %v1615_v49 = vadd.f32 %v1574_v58, %v3912_v11 }
 0x1c3   : > { %v3105_v53 = vpop.f32.mrf.mxu1  ;;  %v1745_v44 = vpop.f32.mrf.mxu0 }
 0x1c5   : > { %v1579_v56 = vpop.f32.mrf.mxu1  ;;  %v3142_v28 = vpop.f32.mrf.mxu0 }
 0x1c7   : > { %v3108_v42 = vpop.f32.mrf.mxu1  ;;  %v1747_v57 = vpop.f32.mrf.mxu0 }
 0x1c8   : > { %v3954_v59 = vadd.f32 %v1747_v57, %v1615_v49 }
 0x1c9   : > { %v1581_v34 = vpop.f32.mrf.mxu1  ;;  %v3143_v61 = vpop.f32.mrf.mxu0 }
 0x1ca   : > { %v1616_v60 = vadd.f32 %v1581_v34, %v3916_v25 }
 0x1cb   : > { %v3109_v62 = vpop.f32.mrf.mxu1  ;;  %v1752_v54 = vpop.f32.mrf.mxu0 }
 0x1cd   : > { %v1586_v15 = vpop.f32.mrf.mxu1  ;;  %v3146_v2 = vpop.f32.mrf.mxu0 }
 0x1ce   : > { %v1617_v63 = vadd.f32 %v1586_v15, %v3919_v30 }
 0x1cf   : > { %v3112_v11 = vpop.f32.mrf.mxu1  ;;  %v1754_v4 = vpop.f32.mrf.mxu0 }
 0x1d0   : > { %v3958_v27 = vadd.f32 %v1754_v4, %v1616_v60 }
 0x1d1   : > { %v1589_v7 = vpop.f32.mrf.mxu1  ;;  %v3147_v12 = vpop.f32.mrf.mxu0 }
 0x1d2   : > { %v1618_v18 = vadd.f32 %v1589_v7, %v3922_v39 }
 0x1d3   : > { %v3113_v14 = vpop.f32.mrf.mxu1  ;;  %v1759_v8 = vpop.f32.mrf.mxu0 }
 0x1d4   : > { %v3961_v16 = vadd.f32 %v1759_v8, %v1617_v63 }
 0x1d5   : > { %v1594_v48 = vpop.f32.mrf.mxu1  ;;  %v3150_v3 = vpop.f32.mrf.mxu0 }
 0x1d6   : > { %v1619_v25 = vadd.f32 %v1594_v48, %v3925_v45 }
 0x1d7   : > { %v3116_v19 = vpop.f32.mrf.mxu1  ;;  %v1762_v10 = vpop.f32.mrf.mxu0 }
 0x1d8   : > { %v3964_v47 = vadd.f32 %v1762_v10, %v1618_v18 }
 0x1d9   : > { %v1597_v30 = vpop.f32.mrf.mxu1  ;;  %v3151_v20 = vpop.f32.mrf.mxu0 }
 0x1da   : > { %v1620_v22 = vadd.f32 %v1597_v30, %v3928_v51 }
 0x1db   : > { %v3117_v26 = vpop.f32.mrf.mxu1  ;;  %v1767_v29 = vpop.f32.mrf.mxu0 }
 0x1dc   : > { %v3967_v31 = vadd.f32 %v1767_v29, %v1619_v25 }
 0x1dd   : > { %v1602_v39 = vpop.f32.mrf.mxu1  ;;  %v3154_v33 = vpop.f32.mrf.mxu0 }
 0x1de   : > { %v1621_v40 = vadd.f32 %v1602_v39, %v3930_v6 }
 0x1df   : > { %v3120_v0 = vpop.f32.mrf.mxu1  ;;  %v1770_v45 = vpop.f32.mrf.mxu0 }
 0x1e0   : > { %v3970_v38 = vadd.f32 %v1770_v45, %v1620_v22 }
 0x1e1   : > { %v1605_v37 = vpop.f32.mrf.mxu1  ;;  %v3155_v1 = vpop.f32.mrf.mxu0 }
 0x1e3   : > { %v3121_v13 = vpop.f32.mrf.mxu1  ;;  %v1775_v35 = vpop.f32.mrf.mxu0 }
 0x1e4   : > { %v3972_v41 = vadd.f32 %v1775_v35, %v1621_v40 }
 0x1e5   : > { %v1904_v51 = vpop.f32.mrf.mxu1  ;;  %v3158_v43 = vpop.f32.mrf.mxu0 }
 0x1e6   : > { %v1971_v6 = vadd.f32 %v1904_v51, %v3933_v5 }
 0x1e7   : > { %v3164_v55 = vpop.f32.mrf.mxu1  ;;  %v1778_v24 = vpop.f32.mrf.mxu0 }
 0x1e9   : > { %v1907_v46 = vpop.f32.mrf.mxu1  ;;  %v3159_v9 = vpop.f32.mrf.mxu0 }
 0x1eb   : > { %v3165_v58 = vpop.f32.mrf.mxu1  ;;  %v2094_v49 = vpop.f32.mrf.mxu0 }
 0x1ec   : > { %v2161_v53 = vadd.f32 %v2094_v49, %v1971_v6 }
 0x1ed   : > { %v1911_v36 = vpop.f32.mrf.mxu1  ;;  %v3202_v44 = vpop.f32.mrf.mxu0 }
 0x1ee   : > { %v2175_v56 = vsel %vm444_vm1, %v2161_v53, 0.0  ;;  %v2183_v28 = vmul.f32 %v2161_v53, %v2161_v53  ;;  %v2192_v42 = vpack.c.bf16 %v2161_v53, %v2161_v53  ;;  %v1972_v15 = vadd.f32 %v1911_v36, %v3937_v21 }
 0x1ef   : > { %v3168_v57 = vpop.f32.mrf.mxu1  ;;  %v2176_v34 = vrot.slane %v2175_v56, 4  ;;  %v2097_v5 = vpop.f32.mrf.mxu0 }
 0x1f0   : > { %v2184_v60 = vsel %vm444_vm1, %v2183_v28, 0.0  ;;  %2194 = vst.msk [vmem:[%s3979_s30] sm:$0xf] %vm2193_vm3, %v2192_v42 }
 0x1f1   : > { %v1914_v61 = vpop.f32.mrf.mxu1  ;;  %v2177_v62 = vadd.f32 %v2176_v34, %v2175_v56  ;;  %v3203_v54 = vpop.f32.mrf.mxu0  ;;  %v2185_v2 = vrot.slane %v2184_v60, 4 }
 0x1f2   : > { %v1973_v14 = vadd.f32 %v1914_v61, %v3940_v23 }
 0x1f3   : > { %v3169_v63 = vpop.f32.mrf.mxu1  ;;  %v2101_v11 = vpop.f32.mrf.mxu0  ;;  %v2178_v18 = vrot.slane %v2177_v62, 2  ;;  %v2186_v48 = vadd.f32 %v2185_v2, %v2184_v60 }
 0x1f4   : > { %v2162_v7 = vadd.f32 %v2101_v11, %v1972_v15 }
 0x1f5   : > { %v1919_v4 = vpop.f32.mrf.mxu1  ;;  %v3206_v12 = vpop.f32.mrf.mxu0  ;;  %v2179_v22 = vadd.f32 %v2178_v18, %v2177_v62  ;;  %v2187_v23 = vrot.slane %v2186_v48, 2 }
 0x1f6   : > { %v2210_v25 = vmul.f32 %v2162_v7, %v2162_v7  ;;  %v2713_v3 = vpack.c.bf16 %v2162_v7, %v2162_v7  ;;  %v1974_v21 = vadd.f32 %v1919_v4, %v3943_v32  ;;  %v2198_v26 = vrot.slane %v2162_v7, 2 }
 0x1f7   : > { %v3172_v8 = vpop.f32.mrf.mxu1  ;;  %v2104_v19 = vpop.f32.mrf.mxu0  ;;  %v2180_v55 = vrot.slane %v2179_v22, 1  ;;  %v2188_v53 = vadd.f32 %v2187_v23, %v2186_v48 }
 0x1f8   : > { %v2163_v30 = vadd.f32 %v2104_v19, %v1973_v14  ;;  %v2214_v0 = vrot.slane %v2210_v25, 2  ;;  %v2686_v45 = vrot.slane %v2713_v3, 9 }
 0x1f9   : > { %v1922_v10 = vpop.f32.mrf.mxu1  ;;  %v3207_v20 = vpop.f32.mrf.mxu0  ;;  %v2189_v4 = vrot.slane %v2188_v53, 1 }
 0x1fa   : > { %v2199_v29 = vrot.slane %v2163_v30, 2  ;;  %v2211_v39 = vmul.f32 %v2163_v30, %v2163_v30  ;;  %v2714_v40 = vpack.c.bf16 %v2163_v30, %v2163_v30  ;;  %v1975_v9 = vadd.f32 %v1922_v10, %v3946_v52 }
 0x1fb   : > { %v3173_v33 = vpop.f32.mrf.mxu1  ;;  %v2109_v1 = vpop.f32.mrf.mxu0  ;;  %v2181_v52 = vadd.f32 %v2180_v55, %v2179_v22 }
 0x1fc   : > { %v2200_v13 = vsel %vm2197_vm6, %v2198_v26, %v2199_v29  ;;  %v2215_v35 = vrot.slane %v2211_v39, 2  ;;  %v2237_v32 = vrot.slane %v2714_v40, 5  ;;  %v2164_v43 = vadd.f32 %v2109_v1, %v1974_v21 }
 0x1fd   : > { %v1927_v51 = vpop.f32.mrf.mxu1  ;;  %v2202_v24 = vsel %vm444_vm1, %v2200_v13, 0.0  ;;  %v3210_v46 = vpop.f32.mrf.mxu0 }
 0x1fe   : > { %v2203_v6 = vrot.slane %v2202_v24, 4  ;;  %v2216_v58 = vsel %vm2197_vm6, %v2214_v0, %v2215_v35  ;;  %v2238_v49 = vsel %vm3988_vm7, %v2686_v45, %v2237_v32  ;;  %v2257_v56 = vmul.f32 %v2164_v43, %v2164_v43 }
 0x1ff   : > { %v3176_v36 = vpop.f32.mrf.mxu1  ;;  %v2218_v44 = vsel %vm444_vm1, %v2216_v58, 0.0  ;;  %2687 = vst.msk [vmem:[%s3979_s30 + $0x4] sm:$0xf] %vm2193_vm3, %v2238_v49  ;;  %v2112_v28 = vpop.f32.mrf.mxu0  ;;  %v2245_v60 = vrot.slane %v2164_v43, 4  ;;  %v2715_v61 = vpack.c.bf16 %v2164_v43, %v2164_v43  ;;  %v1976_v7 = vadd.f32 %v1927_v51, %v3949_v17 }
 0x200   : > { %v2204_v42 = vadd.f32 %v2203_v6, %v2202_v24  ;;  %v2219_v57 = vrot.slane %v2218_v44, 4  ;;  %v2165_v5 = vadd.f32 %v2112_v28, %v1975_v9  ;;  %v2261_v18 = vrot.slane %v2257_v56, 4 }
 0x201   : > { %v1930_v34 = vpop.f32.mrf.mxu1  ;;  %v3211_v62 = vpop.f32.mrf.mxu0  ;;  %v2690_v30 = vrot.slane %v2715_v61, 10  ;;  %v2190_v24 = vadd.f32 %v2189_v4, %v2188_v53 }
 0x202   : > { %v2205_v54 = vrot.slane %v2204_v42, 2  ;;  %v2220_v15 = vadd.f32 %v2219_v57, %v2218_v44  ;;  %v2246_v63 = vrot.slane %v2165_v5, 4  ;;  %v2258_v2 = vmul.f32 %v2165_v5, %v2165_v5 }
 0x203   : > { %v3177_v11 = vpop.f32.mrf.mxu1  ;;  %v2716_v12 = vpack.c.bf16 %v2165_v5, %v2165_v5  ;;  %v2117_v14 = vpop.f32.mrf.mxu0  ;;  %v1977_v23 = vadd.f32 %v1930_v34, %v3951_v50 }
 0x204   : > { %v2206_v8 = vadd.f32 %v2205_v54, %v2204_v42  ;;  %v2221_v48 = vrot.slane %v2220_v15, 2  ;;  %v2247_v25 = vsel %vm2244_vm8, %v2245_v60, %v2246_v63  ;;  %v2262_v3 = vrot.slane %v2258_v2, 4 }
 0x205   : > { %v1935_v10 = vpop.f32.mrf.mxu1  ;;  %v2249_v22 = vsel %vm444_vm1, %v2247_v25, 0.0  ;;  %v2284_v21 = vrot.slane %v2716_v12, 6  ;;  %v2166_v17 = vadd.f32 %v2117_v14, %v1976_v7  ;;  %v3214_v20 = vpop.f32.mrf.mxu0 }
 0x206   : > { %v2207_v26 = vrot.slane %v2206_v8, 1  ;;  %v2222_v29 = vadd.f32 %v2221_v48, %v2220_v15  ;;  %v2250_v39 = vrot.slane %v2249_v22, 4  ;;  %v2263_v40 = vsel %vm2244_vm8, %v2261_v18, %v2262_v3 }
 0x207   : > { %v3180_v33 = vpop.f32.mrf.mxu1  ;;  %v2265_v0 = vsel %vm444_vm1, %v2263_v40, 0.0  ;;  %v2285_v45 = vsel %vm4005_vm11, %v2690_v30, %v2284_v21  ;;  %v2303_v1 = vmul.f32 %v2166_v17, %v2166_v17  ;;  %v2120_v13 = vpop.f32.mrf.mxu0  ;;  %v2717_v46 = vpack.c.bf16 %v2166_v17, %v2166_v17 }
 0x208   : > { %v2208_v35 = vadd.f32 %v2207_v26, %v2206_v8  ;;  %v2223_v32 = vrot.slane %v2222_v29, 1  ;;  %v2251_v51 = vadd.f32 %v2250_v39, %v2249_v22  ;;  %v2266_v43 = vrot.slane %v2265_v0, 4  ;;  %2691 = vst.msk [vmem:[%s3979_s30 + $0x8] sm:$0xf] %vm2193_vm3, %v2285_v45 }
 0x209   : > { %v1937_v55 = vpop.f32.mrf.mxu1  ;;  %v2167_v9 = vadd.f32 %v2120_v13, %v1977_v23  ;;  %v3215_v6 = vpop.f32.mrf.mxu0  ;;  %v2291_v56 = vrot.slane %v2166_v17, 6  ;;  %v2307_v62 = vrot.slane %v2303_v1, 6  ;;  %v2694_v54 = vrot.slane %v2717_v46, 11 }
 0x20a   : > { %v2209_v50 = vadd.f32 %v2208_v35, %v2181_v52  ;;  %v2224_v58 = vadd.f32 %v2223_v32, %v2222_v29  ;;  %v2252_v49 = vrot.slane %v2251_v51, 2  ;;  %v2267_v36 = vadd.f32 %v2266_v43, %v2265_v0 }
 0x20b   : > { %v3181_v44 = vpop.f32.mrf.mxu1  ;;  %v2292_v28 = vrot.slane %v2167_v9, 6  ;;  %v2304_v42 = vmul.f32 %v2167_v9, %v2167_v9  ;;  %v2718_v57 = vpack.c.bf16 %v2167_v9, %v2167_v9  ;;  %v2125_v34 = vpop.f32.mrf.mxu0  ;;  %v1978_v18 = vadd.f32 %v1937_v55, %v3954_v59 }
 0x20c   : > { %v2225_v5 = vadd.f32 %v2224_v58, %v2190_v24  ;;  %v2253_v60 = vadd.f32 %v2252_v49, %v2251_v51  ;;  %v2268_v61 = vrot.slane %v2267_v36, 2 }
 0x20d   : > { %v1942_v52 = vpop.f32.mrf.mxu1  ;;  %v2293_v15 = vsel %vm643_vm0, %v2291_v56, %v2292_v28  ;;  %v2308_v63 = vrot.slane %v2304_v42, 6  ;;  %v2330_v2 = vrot.slane %v2718_v57, 7  ;;  %v3218_v11 = vpop.f32.mrf.mxu0 }
 0x20e   : > { %v2254_v4 = vrot.slane %v2253_v60, 1  ;;  %v2269_v7 = vadd.f32 %v2268_v61, %v2267_v36  ;;  %v2295_v12 = vsel %vm444_vm1, %v2293_v15, 0.0 }
 0x20f   : > { %v3184_v14 = vpop.f32.mrf.mxu1  ;;  %v2296_v8 = vrot.slane %v2295_v12, 4  ;;  %v2309_v48 = vsel %vm643_vm0, %v2307_v62, %v2308_v63  ;;  %v2331_v25 = vsel %vm4019_vm13, %v2694_v54, %v2330_v2  ;;  %v2127_v3 = vpop.f32.mrf.mxu0 }
 0x210   : > { %v2255_v10 = vadd.f32 %v2254_v4, %v2253_v60  ;;  %v2270_v30 = vrot.slane %v2269_v7, 1  ;;  %v2311_v22 = vsel %vm444_vm1, %v2309_v48, 0.0  ;;  %2695 = vst.msk [vmem:[%s3979_s30 + $0xc] sm:$0xf] %vm2193_vm3, %v2331_v25  ;;  %v2168_v17 = vadd.f32 %v2127_v3, %v1978_v18 }
 0x211   : > { %v1944_v21 = vpop.f32.mrf.mxu1  ;;  %v2297_v20 = vadd.f32 %v2296_v8, %v2295_v12  ;;  %v2312_v59 = vrot.slane %v2311_v22, 4  ;;  %v3219_v26 = vpop.f32.mrf.mxu0 }
 0x212   : > { %v2271_v29 = vadd.f32 %v2270_v30, %v2269_v7  ;;  %v2256_v39 = vadd.f32 %v2255_v10, %v2209_v50  ;;  %v2335_v40 = vsel %vm444_vm1, %v2168_v17, 0.0  ;;  %v2343_v33 = vmul.f32 %v2168_v17, %v2168_v17 }
 0x213   : > { %v3185_v23 = vpop.f32.mrf.mxu1  ;;  %v2298_v0 = vrot.slane %v2297_v20, 2  ;;  %v2313_v45 = vadd.f32 %v2312_v59, %v2311_v22  ;;  %v2336_v1 = vrot.slane %v2335_v40, 4  ;;  %v2352_v13 = vpack.c.bf16 %v2168_v17, %v2168_v17  ;;  %v2132_v35 = vpop.f32.mrf.mxu0 }
 0x214   : > { %v2272_v32 = vadd.f32 %v2271_v29, %v2225_v5  ;;  %v2344_v51 = vsel %vm444_vm1, %v2343_v33, 0.0  ;;  %v1979_v50 = vadd.f32 %v1944_v21, %v3958_v27 }
 0x215   : > { %v1949_v43 = vpop.f32.mrf.mxu1  ;;  %v2299_v55 = vadd.f32 %v2298_v0, %v2297_v20  ;;  %v2314_v24 = vrot.slane %v2313_v45, 2  ;;  %v2337_v46 = vadd.f32 %v2336_v1, %v2335_v40  ;;  %v2345_v9 = vrot.slane %v2344_v51, 4  ;;  %2696 = vst.msk [vmem:[%s3979_s30 + $0x10] sm:$0xf] %vm2193_vm3, %v2352_v13  ;;  %v3222_v6 = vpop.f32.mrf.mxu0 }
 0x216   : > { %v1980_v52 = vadd.f32 %v1949_v43, %v3961_v16 }
 0x217   : > { %v3188_v58 = vpop.f32.mrf.mxu1  ;;  %v2300_v49 = vrot.slane %v2299_v55, 1  ;;  %v2315_v36 = vadd.f32 %v2314_v24, %v2313_v45  ;;  %v2338_v44 = vrot.slane %v2337_v46, 2  ;;  %v2346_v56 = vadd.f32 %v2345_v9, %v2344_v51  ;;  %v2134_v28 = vpop.f32.mrf.mxu0 }
 0x218   : > { %v2169_v57 = vadd.f32 %v2134_v28, %v1979_v50 }
 0x219   : > { %v1952_v42 = vpop.f32.mrf.mxu1  ;;  %v2301_v34 = vadd.f32 %v2300_v49, %v2299_v55  ;;  %v2316_v5 = vrot.slane %v2315_v36, 1  ;;  %v2339_v60 = vadd.f32 %v2338_v44, %v2337_v46  ;;  %v2347_v61 = vrot.slane %v2346_v56, 2  ;;  %v3223_v62 = vpop.f32.mrf.mxu0 }
 0x21a   : > { %v2369_v54 = vmul.f32 %v2169_v57, %v2169_v57  ;;  %v2719_v15 = vpack.c.bf16 %v2169_v57, %v2169_v57  ;;  %v1981_v25 = vadd.f32 %v1952_v42, %v3964_v47  ;;  %v2357_v10 = vrot.slane %v2169_v57, 2 }
 0x21b   : > { %v3189_v63 = vpop.f32.mrf.mxu1  ;;  %v2317_v2 = vadd.f32 %v2316_v5, %v2315_v36  ;;  %v2302_v27 = vadd.f32 %v2301_v34, %v2256_v39  ;;  %v2340_v11 = vrot.slane %v2339_v60, 1  ;;  %v2348_v4 = vadd.f32 %v2347_v61, %v2346_v56  ;;  %v2139_v7 = vpop.f32.mrf.mxu0 }
 0x21c   : > { %v2170_v12 = vadd.f32 %v2139_v7, %v1980_v52  ;;  %v2373_v59 = vrot.slane %v2369_v54, 2  ;;  %v2699_v26 = vrot.slane %v2719_v15, 9 }
 0x21d   : > { %v1957_v18 = vpop.f32.mrf.mxu1  ;;  %v2318_v14 = vadd.f32 %v2317_v2, %v2272_v32  ;;  %v2341_v8 = vadd.f32 %v2340_v11, %v2339_v60  ;;  %v2349_v48 = vrot.slane %v2348_v4, 1  ;;  %v3226_v3 = vpop.f32.mrf.mxu0 }
 0x21e   : > { %v2358_v30 = vrot.slane %v2170_v12, 2  ;;  %v2370_v22 = vmul.f32 %v2170_v12, %v2170_v12  ;;  %v2720_v16 = vpack.c.bf16 %v2170_v12, %v2170_v12  ;;  %v1982_v13 = vadd.f32 %v1957_v18, %v3967_v31 }
 0x21f   : > { %v3192_v21 = vpop.f32.mrf.mxu1  ;;  %v4039_v17 = vadd.f32 %v2341_v8, %v2302_v27  ;;  %v2350_v20 = vadd.f32 %v2349_v48, %v2348_v4  ;;  %v2142_v29 = vpop.f32.mrf.mxu0 }
 0x220   : > { %v2359_v39 = vsel %vm2197_vm6, %v2357_v10, %v2358_v30  ;;  %v2374_v40 = vrot.slane %v2370_v22, 2  ;;  %v2393_v33 = vrot.slane %v2720_v16, 5  ;;  %v2171_v0 = vadd.f32 %v2142_v29, %v1981_v25 }
 0x221   : > { %v1960_v23 = vpop.f32.mrf.mxu1  ;;  %v4042_v47 = vadd.f32 %v2350_v20, %v2318_v14  ;;  %v2361_v45 = vsel %vm444_vm1, %v2359_v39, 0.0  ;;  %v3227_v1 = vpop.f32.mrf.mxu0 }
 0x222   : > { %v2362_v35 = vrot.slane %v2361_v45, 4  ;;  %v2375_v32 = vsel %vm2197_vm6, %v2373_v59, %v2374_v40  ;;  %v2394_v51 = vsel %vm3988_vm7, %v2699_v26, %v2393_v33  ;;  %v2412_v24 = vmul.f32 %v2171_v0, %v2171_v0 }
 0x223   : > { %v3193_v43 = vpop.f32.mrf.mxu1  ;;  %v2377_v55 = vsel %vm444_vm1, %v2375_v32, 0.0  ;;  %2700 = vst.msk [vmem:[%s3979_s30 + $0x14] sm:$0xf] %vm2193_vm3, %v2394_v51  ;;  %v2147_v46 = vpop.f32.mrf.mxu0  ;;  %v2400_v49 = vrot.slane %v2171_v0, 4  ;;  %v2721_v36 = vpack.c.bf16 %v2171_v0, %v2171_v0  ;;  %v1983_v57 = vadd.f32 %v1960_v23, %v3970_v38 }
 0x224   : > { %v2363_v9 = vadd.f32 %v2362_v35, %v2361_v45  ;;  %v2378_v6 = vrot.slane %v2377_v55, 4  ;;  %v2172_v58 = vadd.f32 %v2147_v46, %v1982_v13  ;;  %v2416_v34 = vrot.slane %v2412_v24, 4 }
 0x225   : > { %v1965_v50 = vpop.f32.mrf.mxu1  ;;  %v3230_v31 = vpop.f32.mrf.mxu0  ;;  %v2703_v63 = vrot.slane %v2721_v36, 10 }
 0x226   : > { %v2364_v44 = vrot.slane %v2363_v9, 2  ;;  %v2379_v56 = vadd.f32 %v2378_v6, %v2377_v55  ;;  %v2401_v28 = vrot.slane %v2172_v58, 4  ;;  %v2413_v42 = vmul.f32 %v2172_v58, %v2172_v58 }
 0x227   : > { %v3196_v37 = vpop.f32.mrf.mxu1  ;;  %v2722_v5 = vpack.c.bf16 %v2172_v58, %v2172_v58  ;;  %v2150_v60 = vpop.f32.mrf.mxu0  ;;  %v1984_v8 = vadd.f32 %v1965_v50, %v3972_v41 }
 0x228   : > { %v2365_v61 = vadd.f32 %v2364_v44, %v2363_v9  ;;  %v2380_v62 = vrot.slane %v2379_v56, 2  ;;  %v2402_v52 = vsel %vm2244_vm8, %v2400_v49, %v2401_v28  ;;  %v2417_v54 = vrot.slane %v2413_v42, 4 }
 0x229   : > { %v1968_v15 = vpop.f32.mrf.mxu1  ;;  %v2404_v2 = vsel %vm444_vm1, %v2402_v52, 0.0  ;;  %v2436_v27 = vrot.slane %v2722_v5, 6  ;;  %v2173_v11 = vadd.f32 %v2150_v60, %v1983_v57  ;;  %v3231_v4 = vpop.f32.mrf.mxu0 }
 0x22a   : > { %v2366_v7 = vrot.slane %v2365_v61, 1  ;;  %v2381_v18 = vadd.f32 %v2380_v62, %v2379_v56  ;;  %v2405_v12 = vrot.slane %v2404_v2, 4  ;;  %v2418_v38 = vsel %vm2244_vm8, %v2416_v34, %v2417_v54 }
 0x22b   : > { %v3197_v14 = vpop.f32.mrf.mxu1  ;;  %v2420_v48 = vsel %vm444_vm1, %v2418_v38, 0.0  ;;  %v2437_v25 = vsel %vm4005_vm11, %v2703_v63, %v2436_v27  ;;  %v2455_v3 = vmul.f32 %v2173_v11, %v2173_v11  ;;  %v2155_v10 = vpop.f32.mrf.mxu0  ;;  %v2723_v20 = vpack.c.bf16 %v2173_v11, %v2173_v11 }
 0x22c   : > { %v2367_v30 = vadd.f32 %v2366_v7, %v2365_v61  ;;  %v2382_v22 = vrot.slane %v2381_v18, 1  ;;  %v2406_v16 = vadd.f32 %v2405_v12, %v2404_v2  ;;  %v2421_v21 = vrot.slane %v2420_v48, 4  ;;  %2704 = vst.msk [vmem:[%s3979_s30 + $0x18] sm:$0xf] %vm2193_vm3, %v2437_v25 }
 0x22d   : > { %v2174_v59 = vadd.f32 %v2155_v10, %v1984_v8  ;;  %v3234_v26 = vpop.f32.mrf.mxu0  ;;  %v2443_v33 = vrot.slane %v2173_v11, 6  ;;  %v2459_v32 = vrot.slane %v2455_v3, 6  ;;  %v2707_v51 = vrot.slane %v2723_v20, 11 }
 0x22e   : > { %v2368_v29 = vadd.f32 %v2367_v30, %v4039_v17  ;;  %v2383_v39 = vadd.f32 %v2382_v22, %v2381_v18  ;;  %v2407_v41 = vrot.slane %v2406_v16, 2  ;;  %v2422_v40 = vadd.f32 %v2421_v21, %v2420_v48 }
 0x22f   : > { %v2444_v23 = vrot.slane %v2174_v59, 6  ;;  %v2456_v19 = vmul.f32 %v2174_v59, %v2174_v59  ;;  %v2724_v0 = vpack.c.bf16 %v2174_v59, %v2174_v59  ;;  %v2158_v45 = vpop.f32.mrf.mxu0 }
 0x230   : > { %v2384_v1 = vadd.f32 %v2383_v39, %v4042_v47  ;;  %v2408_v13 = vadd.f32 %v2407_v41, %v2406_v16  ;;  %v2423_v35 = vrot.slane %v2422_v40, 2 }
 0x231   : > { %v2445_v43 = vsel %vm643_vm0, %v2443_v33, %v2444_v23  ;;  %v2460_v55 = vrot.slane %v2456_v19, 6  ;;  %v2479_v24 = vrot.slane %v2724_v0, 7  ;;  %v3235_v17 = vpop.f32.mrf.mxu0 }
 0x232   : > { %v2409_v46 = vrot.slane %v2408_v13, 1  ;;  %v2424_v9 = vadd.f32 %v2423_v35, %v2422_v40  ;;  %v2447_v6 = vsel %vm444_vm1, %v2445_v43, 0.0 }
 0x233   : > { %v2448_v50 = vrot.slane %v2447_v6, 4  ;;  %v2461_v58 = vsel %vm643_vm0, %v2459_v32, %v2460_v55  ;;  %v2480_v47 = vsel %vm4019_vm13, %v2707_v51, %v2479_v24 }
 0x234   : > { %v2410_v49 = vadd.f32 %v2409_v46, %v2408_v13  ;;  %v2425_v36 = vrot.slane %v2424_v9, 1  ;;  %v2463_v31 = vsel %vm444_vm1, %v2461_v58, 0.0  ;;  %2708 = vst.msk [vmem:[%s3979_s30 + $0x1c] sm:$0xf] %vm2193_vm3, %v2480_v47 }
 0x235   : > { %v2449_v44 = vadd.f32 %v2448_v50, %v2447_v6  ;;  %v2464_v56 = vrot.slane %v2463_v31, 4 }
 0x236   : > { %v2411_v28 = vadd.f32 %v2410_v49, %v2368_v29  ;;  %v2426_v42 = vadd.f32 %v2425_v36, %v2424_v9 }
 0x237   : > { %v2450_v37 = vrot.slane %v2449_v44, 2  ;;  %v2465_v57 = vadd.f32 %v2464_v56, %v2463_v31 }
 0x238   : > { %v2427_v34 = vadd.f32 %v2426_v42, %v2384_v1 }
 0x239   : > { %v2451_v5 = vadd.f32 %v2450_v37, %v2449_v44  ;;  %v2466_v60 = vrot.slane %v2465_v57, 2 }
 0x23b   : > { %v2452_v61 = vrot.slane %v2451_v5, 1  ;;  %v2467_v53 = vadd.f32 %v2466_v60, %v2465_v57 }
 0x23d   : > { %v2453_v62 = vadd.f32 %v2452_v61, %v2451_v5  ;;  %v2468_v52 = vrot.slane %v2467_v53, 1 }
 0x23f   : > { %v2454_v54 = vadd.f32 %v2453_v62, %v2411_v28  ;;  %v2469_v15 = vadd.f32 %v2468_v52, %v2467_v53 }
 0x241   : > { %v2470_v63 = vadd.f32 %v2469_v15, %v2427_v34  ;;  %2485 = vst.msk [vmem:[%s265_s9] sm:$0x1] %vm2484_vm14, %v2454_v54 }
 0x243   : > { %2486 = vst.msk [vmem:[%s268_s12] sm:$0x1] %vm2484_vm14, %v2470_v63 }
 0x244 PF: > { %s17_s21 = sadd.s32 1, %s3254_s21  }
 0x245   : > { %p14_p4 = scmp.ge.s32.totalorder %s17_s21, 4  }
 0x247   :  { %16 = sbr.rel (!%p14_p4) target bundleno = 1 (0x1), region = 224 }

</bundles_post_ra>
